<compile_context>
chip_gen: v7x
topology: tpu7x:2x2x1
jax: 0.10.0
libtpu: 0.0.40
codegen_flags: <defaults>
</compile_context>

<pallas_src>
import functools

import jax
import jax.numpy as jnp
from jax.experimental import pallas as pl
from jax.experimental.pallas import tpu as pltpu


def _round_up(n, m):
    return ((n + m - 1) // m) * m


def _fused_forward_kernel(x_ref, mask_ref, wc_ref, bc_ref, wf_ref, bf_ref,
                          o_ref, acc_ref, *,
                          tile_rows, width_ext, inv_hw, num_classes):
    """One (batch b, row-tile t) grid step.

    x_ref   : (1, Lflat, C)  f32  zero-padded image, rows flattened row-major (width_ext wide)
    mask_ref: (Lflat, 1)     f32  1.0 on real image columns, 0.0 on the 2 horizontal pad columns
    wc_ref  : (9, C, Fp)     bf16 3x3 conv taps, tap k = 3*di + dj
    bc_ref  : (1, Fp)        f32
    wf_ref  : (Fp, NCp)      bf16 classifier Linear (Dropout p=0.4 is identity in eval mode)
    bf_ref  : (1, NCp)       f32
    o_ref   : (1, 1, NCp)    f32  softmax probabilities (padded class lanes are 0)
    acc_ref : (1, Fp)        f32  VMEM scratch: running pool-sum of SiLU activations
    """
    t = pl.program_id(1)
    rows = tile_rows * width_ext            # "extended" pixels handled this grid step
    f_pad = wc_ref.shape[-1]

    @pl.when(t == 0)
    def _init():
        acc_ref[...] = jnp.zeros_like(acc_ref)

    # --- 3x3 conv (stride 1, padding 1) as 9 shifted matmuls, gathered on-chip.
    # For tap (di, dj) the sources of `rows` consecutive extended pixels of this tile are the
    # contiguous flat slice starting at (t*tile_rows + di)*width_ext + dj.
    acc = jnp.zeros((rows, f_pad), jnp.float32)
    for di in range(3):
        for dj in range(3):
            start = (t * tile_rows + di) * width_ext + dj
            lhs = x_ref[0, pl.ds(start, rows), :].astype(jnp.bfloat16)       # (rows, C)
            acc += jnp.dot(lhs, wc_ref[3 * di + dj],
                           preferred_element_type=jnp.float32)               # (rows, Fp)
    acc = acc + bc_ref[...]

    # SiLU: x * sigmoid(x).  exp + approx reciprocal stay on the EUP slot.
    act = acc * pl.reciprocal(1.0 + jnp.exp(-acc), approx=True)

    # Zero the 2 junk "extended" columns of each image row, then accumulate the pool sum.
    valid = mask_ref[pl.ds(t * tile_rows * width_ext, rows), :]              # (rows, 1)
    acc_ref[...] += jnp.sum(act * valid, axis=0, keepdims=True)              # (1, Fp)

    # --- finalize: global average pool -> Dropout(eval: identity) -> Linear -> softmax.
    @pl.when(t == pl.num_programs(1) - 1)
    def _finalize():
        pooled = acc_ref[...] * inv_hw                                       # (1, Fp)
        logits = jnp.dot(pooled.astype(jnp.bfloat16), wf_ref[...],
                         preferred_element_type=jnp.float32) + bf_ref[...]   # (1, NCp)
        m = jnp.max(logits, axis=-1, keepdims=True)
        e = jnp.exp(logits - m)
        lane = jax.lax.broadcasted_iota(jnp.int32, e.shape, 1)
        e = jnp.where(lane < num_classes, e, 0.0)                            # drop pad lanes
        o_ref[0] = e * pl.reciprocal(jnp.sum(e, axis=-1, keepdims=True), approx=True)


@functools.partial(jax.jit, static_argnames=("tile_rows",))
def simple_classifier_forward(x_nchw, w_conv, b_conv, w_fc, b_fc, *, tile_rows=None):
    """probs = softmax(Linear(Dropout(GlobalAvgPool(SiLU(Conv3x3(x))))), dim=1)."""
    B, C, H, W = x_nchw.shape
    hidden = w_conv.shape[-1]
    num_classes = w_fc.shape[-1]
    assert w_conv.shape == (3, 3, C, hidden)
    assert w_fc.shape == (hidden, num_classes)

    we = W + 2                                    # padded ("extended") row width
    f_pad = _round_up(hidden, 128)                # lane-dense feature dim
    nc_pad = _round_up(num_classes, 128)          # lane-dense class dim

    if tile_rows is None:                         # ~512 extended pixels per grid step
        target = max(1, 512 // we)
        tile_rows = max([d for d in range(1, H + 1) if H % d == 0 and d <= target] or [1])
    assert H % tile_rows == 0, "tile_rows must divide H"
    num_tiles = H // tile_rows

    # ---- layout plumbing (plain JAX, outside the kernel) --------------------------------
    # NCHW -> NHWC, zero-pad spatially (+1 extra bottom row so the last tile's junk columns
    # never index past the flat buffer), then flatten rows row-major.
    x_nhwc = jnp.transpose(x_nchw, (0, 2, 3, 1)).astype(jnp.float32)
    xp = jnp.pad(x_nhwc, ((0, 0), (1, 2), (1, 1), (0, 0)))                   # (B, H+3, W+2, C)
    l_flat = (H + 3) * we
    x_flat = xp.reshape(B, l_flat, C)

    # Column-validity mask over the flat layout: 1.0 for the W real columns of each row.
    col_valid = (jnp.arange(we) < W).astype(jnp.float32)                     # (We,)
    mask_flat = jnp.tile(col_valid, H + 3).reshape(l_flat, 1)                # (Lflat, 1)

    # Lane-padded (128-wide) bf16 weights, f32 biases.  Zero padding keeps padded feature
    # lanes identically zero (SiLU(0) == 0) so they do not perturb the pool or logits.
    wc = jnp.pad(w_conv.reshape(9, C, hidden).astype(jnp.float32),
                 ((0, 0), (0, 0), (0, f_pad - hidden))).astype(jnp.bfloat16)
    bc = jnp.pad(b_conv.reshape(1, hidden).astype(jnp.float32),
                 ((0, 0), (0, f_pad - hidden)))
    wf = jnp.pad(w_fc.astype(jnp.float32),
                 ((0, f_pad - hidden), (0, nc_pad - num_classes))).astype(jnp.bfloat16)
    bf = jnp.pad(b_fc.reshape(1, num_classes).astype(jnp.float32),
                 ((0, 0), (0, nc_pad - num_classes)))

    kernel = functools.partial(
        _fused_forward_kernel,
        tile_rows=tile_rows, width_ext=we,
        inv_hw=1.0 / float(H * W), num_classes=num_classes)

    probs_padded = pl.pallas_call(
        kernel,
        out_shape=jax.ShapeDtypeStruct((B, 1, nc_pad), jnp.float32),
        grid=(B, num_tiles),
        in_specs=[
            pl.BlockSpec((1, l_flat, C), lambda b, t: (b, 0, 0)),     # padded image (per batch)
            pl.BlockSpec((l_flat, 1), lambda b, t: (0, 0)),           # column-validity mask
            pl.BlockSpec((9, C, f_pad), lambda b, t: (0, 0, 0)),      # conv taps
            pl.BlockSpec((1, f_pad), lambda b, t: (0, 0)),            # conv bias
            pl.BlockSpec((f_pad, nc_pad), lambda b, t: (0, 0)),       # fc weight
            pl.BlockSpec((1, nc_pad), lambda b, t: (0, 0)),           # fc bias
        ],
        out_specs=pl.BlockSpec((1, 1, nc_pad), lambda b, t: (b, 0, 0)),
        scratch_shapes=[pltpu.VMEM((1, f_pad), jnp.float32)],
        compiler_params=pltpu.CompilerParams(
            dimension_semantics=("parallel", "arbitrary"),
            vmem_limit_bytes=32 * 1024 * 1024),
    )(x_flat, mask_flat, wc, bc, wf, bf)

    return probs_padded[:, 0, :num_classes]


def _reference_forward(x_nchw, w_conv, b_conv, w_fc, b_fc):
    """Pure-JAX reference of the same forward pass (f32 everywhere)."""
    x = jnp.transpose(x_nchw, (0, 2, 3, 1)).astype(jnp.float32)
    B, H, W, C = x.shape
    xp = jnp.pad(x, ((0, 0), (1, 1), (1, 1), (0, 0)))
    acc = jnp.zeros((B, H, W, w_conv.shape[-1]), jnp.float32)
    for di in range(3):
        for dj in range(3):
            acc += jnp.einsum("bhwc,cf->bhwf",
                              xp[:, di:di + H, dj:dj + W, :], w_conv[di, dj])
    acc += b_conv
    act = acc * jax.nn.sigmoid(acc)
    pooled = jnp.mean(act, axis=(1, 2))
    logits = pooled @ w_fc + b_fc
    return jax.nn.softmax(logits, axis=1)


if __name__ == "__main__":
    B, C, H, W = 2, 4, 16, 16
    HIDDEN = 32
    NUM_CLASSES = 8

    key = jax.random.PRNGKey(0)
    kx, kw1, kb1, kw2, kb2 = jax.random.split(key, 5)

    x = jax.random.normal(kx, (B, C, H, W), dtype=jnp.float32)
    # Deterministic synthetic parameters (no checkpoint loading).
    w_conv = jax.random.normal(kw1, (3, 3, C, HIDDEN), dtype=jnp.float32) * 0.05
    b_conv = jax.random.normal(kb1, (HIDDEN,), dtype=jnp.float32) * 0.01
    w_fc = jax.random.normal(kw2, (HIDDEN, NUM_CLASSES), dtype=jnp.float32) * 0.05
    b_fc = jax.random.normal(kb2, (NUM_CLASSES,), dtype=jnp.float32) * 0.01

    # tile_rows=8 -> grid = (2 batches, 2 row-tiles): exercises the pool-accumulator path.
    probs = simple_classifier_forward(x, w_conv, b_conv, w_fc, b_fc, tile_rows=8)
    probs = jax.block_until_ready(probs)

    assert probs.shape == (B, NUM_CLASSES)
    assert bool(jnp.all(jnp.isfinite(probs)))
    # Softmax rows must sum to ~1 (approx-reciprocal normalization).
    assert jnp.allclose(jnp.sum(probs, axis=1), 1.0, atol=5e-3), jnp.sum(probs, axis=1)
    # Match the pure-JAX f32 reference within bf16/approx-recip tolerance.
    ref = _reference_forward(x, w_conv, b_conv, w_fc, b_fc)
    assert jnp.allclose(probs, ref, atol=1e-2), float(jnp.max(jnp.abs(probs - ref)))

    print("KERNEL_OK")
</pallas_src>

<mosaic_0001>
module attributes {stable_mosaic.version = 11 : i64} {
  func.func @_fused_forward_kernel(%arg0: i32, %arg1: i32, %arg2: memref<1x342x4xf32, #tpu.memory_space<vmem>>, %arg3: memref<342x1xf32, #tpu.memory_space<vmem>>, %arg4: memref<9x4x128xbf16, #tpu.memory_space<vmem>>, %arg5: memref<1x128xf32, #tpu.memory_space<vmem>>, %arg6: memref<128x128xbf16, #tpu.memory_space<vmem>>, %arg7: memref<1x128xf32, #tpu.memory_space<vmem>>, %arg8: memref<1x1x128xf32, #tpu.memory_space<vmem>>, %arg9: memref<1x128xf32, #tpu.memory_space<vmem>>) attributes {dimension_semantics = [#tpu.dimension_semantics<parallel>, #tpu.dimension_semantics<arbitrary>], iteration_bounds = array<i64: 2, 2>, scalar_prefetch = 0 : i64, scratch_operands = 1 : i64, tpu.core_type = #tpu.core_type<tc>, window_params = [{transform_indices = @transform_0, window_bounds = array<i64: 1, 342, 4>}, {pipeline_mode = #tpu.pipeline_mode<synchronous>, transform_indices = @transform_1, window_bounds = array<i64: 342, 1>}, {pipeline_mode = #tpu.pipeline_mode<synchronous>, transform_indices = @transform_2, window_bounds = array<i64: 9, 4, 128>}, {pipeline_mode = #tpu.pipeline_mode<synchronous>, transform_indices = @transform_3, window_bounds = array<i64: 1, 128>}, {pipeline_mode = #tpu.pipeline_mode<synchronous>, transform_indices = @transform_4, window_bounds = array<i64: 128, 128>}, {pipeline_mode = #tpu.pipeline_mode<synchronous>, transform_indices = @transform_5, window_bounds = array<i64: 1, 128>}, {transform_indices = @transform_6, window_bounds = array<i64: 1, 1, 128>}]} {
    %c0_i32 = arith.constant 0 : i32
    %0 = arith.cmpi eq, %arg1, %c0_i32 : i32
    %1 = arith.extui %0 : i1 to i32
    %c0_i32_0 = arith.constant 0 : i32
    %2 = arith.cmpi ne, %1, %c0_i32_0 : i32
    scf.if %2 {
      %cst_92 = arith.constant 0.000000e+00 : f32
      %136 = vector.broadcast %cst_92 : f32 to vector<1x128xf32>
      %c0_93 = arith.constant 0 : index
      %c0_94 = arith.constant 0 : index
      %137 = vector.load %arg9[%c0_93, %c0_94] : memref<1x128xf32, #tpu.memory_space<vmem>>, vector<1x128xf32>
      tpu.vector_store %arg9[%c0_93, %c0_94], %136 {strides = array<i32>} : memref<1x128xf32, #tpu.memory_space<vmem>>, vector<1x128xf32>,
    } else {
    }
    %cst = arith.constant 0.000000e+00 : f32
    %3 = vector.broadcast %cst : f32 to vector<144x128xf32>
    %c8_i32 = arith.constant 8 : i32
    %4 = arith.muli %arg1, %c8_i32 : i32
    %c0_i32_1 = arith.constant 0 : i32
    %5 = arith.addi %4, %c0_i32_1 : i32
    %c18_i32 = arith.constant 18 : i32
    %6 = arith.muli %5, %c18_i32 : i32
    %c0_i32_2 = arith.constant 0 : i32
    %7 = arith.addi %6, %c0_i32_2 : i32
    %c0 = arith.constant 0 : index
    %8 = arith.index_cast %7 : i32 to index
    %c0_3 = arith.constant 0 : index
    %9 = vector.load %arg2[%c0, %8, %c0_3] : memref<1x342x4xf32, #tpu.memory_space<vmem>>, vector<1x144x4xf32>
    %10 = vector.shape_cast %9 : vector<1x144x4xf32> to vector<144x4xf32>
    %11 = arith.truncf %10 : vector<144x4xf32> to vector<144x4xbf16>
    %c0_4 = arith.constant 0 : index
    %c0_5 = arith.constant 0 : index
    %c0_6 = arith.constant 0 : index
    %12 = vector.load %arg4[%c0_4, %c0_5, %c0_6] : memref<9x4x128xbf16, #tpu.memory_space<vmem>>, vector<1x4x128xbf16>
    %13 = vector.shape_cast %12 : vector<1x4x128xbf16> to vector<4x128xbf16>
    %cst_7 = arith.constant dense<0.000000e+00> : vector<144x128xf32>
    %14 = tpu.matmul %11, %13, %cst_7 {dimension_numbers = #tpu.dot_dimension_numbers<[1], [0], [0], [1], [0, 0, 1, 1], [], []>} : vector<144x4xbf16>, vector<4x128xbf16>, vector<144x128xf32> -> vector<144x128xf32>
    %15 = arith.addf %3, %14 : vector<144x128xf32>
    %c8_i32_8 = arith.constant 8 : i32
    %16 = arith.muli %arg1, %c8_i32_8 : i32
    %c0_i32_9 = arith.constant 0 : i32
    %17 = arith.addi %16, %c0_i32_9 : i32
    %c18_i32_10 = arith.constant 18 : i32
    %18 = arith.muli %17, %c18_i32_10 : i32
    %c1_i32 = arith.constant 1 : i32
    %19 = arith.addi %18, %c1_i32 : i32
    %c0_11 = arith.constant 0 : index
    %20 = arith.index_cast %19 : i32 to index
    %c0_12 = arith.constant 0 : index
    %21 = vector.load %arg2[%c0_11, %20, %c0_12] : memref<1x342x4xf32, #tpu.memory_space<vmem>>, vector<1x144x4xf32>
    %22 = vector.shape_cast %21 : vector<1x144x4xf32> to vector<144x4xf32>
    %23 = arith.truncf %22 : vector<144x4xf32> to vector<144x4xbf16>
    %c1 = arith.constant 1 : index
    %c0_13 = arith.constant 0 : index
    %c0_14 = arith.constant 0 : index
    %24 = vector.load %arg4[%c1, %c0_13, %c0_14] : memref<9x4x128xbf16, #tpu.memory_space<vmem>>, vector<1x4x128xbf16>
    %25 = vector.shape_cast %24 : vector<1x4x128xbf16> to vector<4x128xbf16>
    %cst_15 = arith.constant dense<0.000000e+00> : vector<144x128xf32>
    %26 = tpu.matmul %23, %25, %cst_15 {dimension_numbers = #tpu.dot_dimension_numbers<[1], [0], [0], [1], [0, 0, 1, 1], [], []>} : vector<144x4xbf16>, vector<4x128xbf16>, vector<144x128xf32> -> vector<144x128xf32>
    %27 = arith.addf %15, %26 : vector<144x128xf32>
    %c8_i32_16 = arith.constant 8 : i32
    %28 = arith.muli %arg1, %c8_i32_16 : i32
    %c0_i32_17 = arith.constant 0 : i32
    %29 = arith.addi %28, %c0_i32_17 : i32
    %c18_i32_18 = arith.constant 18 : i32
    %30 = arith.muli %29, %c18_i32_18 : i32
    %c2_i32 = arith.constant 2 : i32
    %31 = arith.addi %30, %c2_i32 : i32
    %c0_19 = arith.constant 0 : index
    %32 = arith.index_cast %31 : i32 to index
    %c0_20 = arith.constant 0 : index
    %33 = vector.load %arg2[%c0_19, %32, %c0_20] : memref<1x342x4xf32, #tpu.memory_space<vmem>>, vector<1x144x4xf32>
    %34 = vector.shape_cast %33 : vector<1x144x4xf32> to vector<144x4xf32>
    %35 = arith.truncf %34 : vector<144x4xf32> to vector<144x4xbf16>
    %c2 = arith.constant 2 : index
    %c0_21 = arith.constant 0 : index
    %c0_22 = arith.constant 0 : index
    %36 = vector.load %arg4[%c2, %c0_21, %c0_22] : memref<9x4x128xbf16, #tpu.memory_space<vmem>>, vector<1x4x128xbf16>
    %37 = vector.shape_cast %36 : vector<1x4x128xbf16> to vector<4x128xbf16>
    %cst_23 = arith.constant dense<0.000000e+00> : vector<144x128xf32>
    %38 = tpu.matmul %35, %37, %cst_23 {dimension_numbers = #tpu.dot_dimension_numbers<[1], [0], [0], [1], [0, 0, 1, 1], [], []>} : vector<144x4xbf16>, vector<4x128xbf16>, vector<144x128xf32> -> vector<144x128xf32>
    %39 = arith.addf %27, %38 : vector<144x128xf32>
    %c8_i32_24 = arith.constant 8 : i32
    %40 = arith.muli %arg1, %c8_i32_24 : i32
    %c1_i32_25 = arith.constant 1 : i32
    %41 = arith.addi %40, %c1_i32_25 : i32
    %c18_i32_26 = arith.constant 18 : i32
    %42 = arith.muli %41, %c18_i32_26 : i32
    %c0_i32_27 = arith.constant 0 : i32
    %43 = arith.addi %42, %c0_i32_27 : i32
    %c0_28 = arith.constant 0 : index
    %44 = arith.index_cast %43 : i32 to index
    %c0_29 = arith.constant 0 : index
    %45 = vector.load %arg2[%c0_28, %44, %c0_29] : memref<1x342x4xf32, #tpu.memory_space<vmem>>, vector<1x144x4xf32>
    %46 = vector.shape_cast %45 : vector<1x144x4xf32> to vector<144x4xf32>
    %47 = arith.truncf %46 : vector<144x4xf32> to vector<144x4xbf16>
    %c3 = arith.constant 3 : index
    %c0_30 = arith.constant 0 : index
    %c0_31 = arith.constant 0 : index
    %48 = vector.load %arg4[%c3, %c0_30, %c0_31] : memref<9x4x128xbf16, #tpu.memory_space<vmem>>, vector<1x4x128xbf16>
    %49 = vector.shape_cast %48 : vector<1x4x128xbf16> to vector<4x128xbf16>
    %cst_32 = arith.constant dense<0.000000e+00> : vector<144x128xf32>
    %50 = tpu.matmul %47, %49, %cst_32 {dimension_numbers = #tpu.dot_dimension_numbers<[1], [0], [0], [1], [0, 0, 1, 1], [], []>} : vector<144x4xbf16>, vector<4x128xbf16>, vector<144x128xf32> -> vector<144x128xf32>
    %51 = arith.addf %39, %50 : vector<144x128xf32>
    %c8_i32_33 = arith.constant 8 : i32
    %52 = arith.muli %arg1, %c8_i32_33 : i32
    %c1_i32_34 = arith.constant 1 : i32
    %53 = arith.addi %52, %c1_i32_34 : i32
    %c18_i32_35 = arith.constant 18 : i32
    %54 = arith.muli %53, %c18_i32_35 : i32
    %c1_i32_36 = arith.constant 1 : i32
    %55 = arith.addi %54, %c1_i32_36 : i32
    %c0_37 = arith.constant 0 : index
    %56 = arith.index_cast %55 : i32 to index
    %c0_38 = arith.constant 0 : index
    %57 = vector.load %arg2[%c0_37, %56, %c0_38] : memref<1x342x4xf32, #tpu.memory_space<vmem>>, vector<1x144x4xf32>
    %58 = vector.shape_cast %57 : vector<1x144x4xf32> to vector<144x4xf32>
    %59 = arith.truncf %58 : vector<144x4xf32> to vector<144x4xbf16>
    %c4 = arith.constant 4 : index
    %c0_39 = arith.constant 0 : index
    %c0_40 = arith.constant 0 : index
    %60 = vector.load %arg4[%c4, %c0_39, %c0_40] : memref<9x4x128xbf16, #tpu.memory_space<vmem>>, vector<1x4x128xbf16>
    %61 = vector.shape_cast %60 : vector<1x4x128xbf16> to vector<4x128xbf16>
    %cst_41 = arith.constant dense<0.000000e+00> : vector<144x128xf32>
    %62 = tpu.matmul %59, %61, %cst_41 {dimension_numbers = #tpu.dot_dimension_numbers<[1], [0], [0], [1], [0, 0, 1, 1], [], []>} : vector<144x4xbf16>, vector<4x128xbf16>, vector<144x128xf32> -> vector<144x128xf32>
    %63 = arith.addf %51, %62 : vector<144x128xf32>
    %c8_i32_42 = arith.constant 8 : i32
    %64 = arith.muli %arg1, %c8_i32_42 : i32
    %c1_i32_43 = arith.constant 1 : i32
    %65 = arith.addi %64, %c1_i32_43 : i32
    %c18_i32_44 = arith.constant 18 : i32
    %66 = arith.muli %65, %c18_i32_44 : i32
    %c2_i32_45 = arith.constant 2 : i32
    %67 = arith.addi %66, %c2_i32_45 : i32
    %c0_46 = arith.constant 0 : index
    %68 = arith.index_cast %67 : i32 to index
    %c0_47 = arith.constant 0 : index
    %69 = vector.load %arg2[%c0_46, %68, %c0_47] : memref<1x342x4xf32, #tpu.memory_space<vmem>>, vector<1x144x4xf32>
    %70 = vector.shape_cast %69 : vector<1x144x4xf32> to vector<144x4xf32>
    %71 = arith.truncf %70 : vector<144x4xf32> to vector<144x4xbf16>
    %c5 = arith.constant 5 : index
    %c0_48 = arith.constant 0 : index
    %c0_49 = arith.constant 0 : index
    %72 = vector.load %arg4[%c5, %c0_48, %c0_49] : memref<9x4x128xbf16, #tpu.memory_space<vmem>>, vector<1x4x128xbf16>
    %73 = vector.shape_cast %72 : vector<1x4x128xbf16> to vector<4x128xbf16>
    %cst_50 = arith.constant dense<0.000000e+00> : vector<144x128xf32>
    %74 = tpu.matmul %71, %73, %cst_50 {dimension_numbers = #tpu.dot_dimension_numbers<[1], [0], [0], [1], [0, 0, 1, 1], [], []>} : vector<144x4xbf16>, vector<4x128xbf16>, vector<144x128xf32> -> vector<144x128xf32>
    %75 = arith.addf %63, %74 : vector<144x128xf32>
    %c8_i32_51 = arith.constant 8 : i32
    %76 = arith.muli %arg1, %c8_i32_51 : i32
    %c2_i32_52 = arith.constant 2 : i32
    %77 = arith.addi %76, %c2_i32_52 : i32
    %c18_i32_53 = arith.constant 18 : i32
    %78 = arith.muli %77, %c18_i32_53 : i32
    %c0_i32_54 = arith.constant 0 : i32
    %79 = arith.addi %78, %c0_i32_54 : i32
    %c0_55 = arith.constant 0 : index
    %80 = arith.index_cast %79 : i32 to index
    %c0_56 = arith.constant 0 : index
    %81 = vector.load %arg2[%c0_55, %80, %c0_56] : memref<1x342x4xf32, #tpu.memory_space<vmem>>, vector<1x144x4xf32>
    %82 = vector.shape_cast %81 : vector<1x144x4xf32> to vector<144x4xf32>
    %83 = arith.truncf %82 : vector<144x4xf32> to vector<144x4xbf16>
    %c6 = arith.constant 6 : index
    %c0_57 = arith.constant 0 : index
    %c0_58 = arith.constant 0 : index
    %84 = vector.load %arg4[%c6, %c0_57, %c0_58] : memref<9x4x128xbf16, #tpu.memory_space<vmem>>, vector<1x4x128xbf16>
    %85 = vector.shape_cast %84 : vector<1x4x128xbf16> to vector<4x128xbf16>
    %cst_59 = arith.constant dense<0.000000e+00> : vector<144x128xf32>
    %86 = tpu.matmul %83, %85, %cst_59 {dimension_numbers = #tpu.dot_dimension_numbers<[1], [0], [0], [1], [0, 0, 1, 1], [], []>} : vector<144x4xbf16>, vector<4x128xbf16>, vector<144x128xf32> -> vector<144x128xf32>
    %87 = arith.addf %75, %86 : vector<144x128xf32>
    %c8_i32_60 = arith.constant 8 : i32
    %88 = arith.muli %arg1, %c8_i32_60 : i32
    %c2_i32_61 = arith.constant 2 : i32
    %89 = arith.addi %88, %c2_i32_61 : i32
    %c18_i32_62 = arith.constant 18 : i32
    %90 = arith.muli %89, %c18_i32_62 : i32
    %c1_i32_63 = arith.constant 1 : i32
    %91 = arith.addi %90, %c1_i32_63 : i32
    %c0_64 = arith.constant 0 : index
    %92 = arith.index_cast %91 : i32 to index
    %c0_65 = arith.constant 0 : index
    %93 = vector.load %arg2[%c0_64, %92, %c0_65] : memref<1x342x4xf32, #tpu.memory_space<vmem>>, vector<1x144x4xf32>
    %94 = vector.shape_cast %93 : vector<1x144x4xf32> to vector<144x4xf32>
    %95 = arith.truncf %94 : vector<144x4xf32> to vector<144x4xbf16>
    %c7 = arith.constant 7 : index
    %c0_66 = arith.constant 0 : index
    %c0_67 = arith.constant 0 : index
    %96 = vector.load %arg4[%c7, %c0_66, %c0_67] : memref<9x4x128xbf16, #tpu.memory_space<vmem>>, vector<1x4x128xbf16>
    %97 = vector.shape_cast %96 : vector<1x4x128xbf16> to vector<4x128xbf16>
    %cst_68 = arith.constant dense<0.000000e+00> : vector<144x128xf32>
    %98 = tpu.matmul %95, %97, %cst_68 {dimension_numbers = #tpu.dot_dimension_numbers<[1], [0], [0], [1], [0, 0, 1, 1], [], []>} : vector<144x4xbf16>, vector<4x128xbf16>, vector<144x128xf32> -> vector<144x128xf32>
    %99 = arith.addf %87, %98 : vector<144x128xf32>
    %c8_i32_69 = arith.constant 8 : i32
    %100 = arith.muli %arg1, %c8_i32_69 : i32
    %c2_i32_70 = arith.constant 2 : i32
    %101 = arith.addi %100, %c2_i32_70 : i32
    %c18_i32_71 = arith.constant 18 : i32
    %102 = arith.muli %101, %c18_i32_71 : i32
    %c2_i32_72 = arith.constant 2 : i32
    %103 = arith.addi %102, %c2_i32_72 : i32
    %c0_73 = arith.constant 0 : index
    %104 = arith.index_cast %103 : i32 to index
    %c0_74 = arith.constant 0 : index
    %105 = vector.load %arg2[%c0_73, %104, %c0_74] : memref<1x342x4xf32, #tpu.memory_space<vmem>>, vector<1x144x4xf32>
    %106 = vector.shape_cast %105 : vector<1x144x4xf32> to vector<144x4xf32>
    %107 = arith.truncf %106 : vector<144x4xf32> to vector<144x4xbf16>
    %c8 = arith.constant 8 : index
    %c0_75 = arith.constant 0 : index
    %c0_76 = arith.constant 0 : index
    %108 = vector.load %arg4[%c8, %c0_75, %c0_76] : memref<9x4x128xbf16, #tpu.memory_space<vmem>>, vector<1x4x128xbf16>
    %109 = vector.shape_cast %108 : vector<1x4x128xbf16> to vector<4x128xbf16>
    %cst_77 = arith.constant dense<0.000000e+00> : vector<144x128xf32>
    %110 = tpu.matmul %107, %109, %cst_77 {dimension_numbers = #tpu.dot_dimension_numbers<[1], [0], [0], [1], [0, 0, 1, 1], [], []>} : vector<144x4xbf16>, vector<4x128xbf16>, vector<144x128xf32> -> vector<144x128xf32>
    %111 = arith.addf %99, %110 : vector<144x128xf32>
    %c0_78 = arith.constant 0 : index
    %c0_79 = arith.constant 0 : index
    %112 = vector.load %arg5[%c0_78, %c0_79] : memref<1x128xf32, #tpu.memory_space<vmem>>, vector<1x128xf32>
    %113 = vector.broadcast %112 : vector<1x128xf32> to vector<144x128xf32>
    %114 = arith.addf %111, %113 : vector<144x128xf32>
    %cst_80 = arith.constant 0.000000e+00 : f32
    %115 = vector.broadcast %cst_80 : f32 to vector<144x128xf32>
    %116 = arith.subf %115, %114 : vector<144x128xf32>
    %117 = math.exp %116 : vector<144x128xf32>
    %cst_81 = arith.constant 1.000000e+00 : f32
    %118 = vector.broadcast %cst_81 : f32 to vector<144x128xf32>
    %119 = arith.addf %118, %117 : vector<144x128xf32>
    %120 = tpu.reciprocal %119 {approx = true} : vector<144x128xf32> -> vector<144x128xf32>
    %121 = arith.mulf %114, %120 : vector<144x128xf32>
    %c8_i32_82 = arith.constant 8 : i32
    %122 = arith.muli %arg1, %c8_i32_82 : i32
    %c18_i32_83 = arith.constant 18 : i32
    %123 = arith.muli %122, %c18_i32_83 : i32
    %124 = arith.index_cast %123 : i32 to index
    %c0_84 = arith.constant 0 : index
    %125 = vector.load %arg3[%124, %c0_84] : memref<342x1xf32, #tpu.memory_space<vmem>>, vector<144x1xf32>
    %c0_85 = arith.constant 0 : index
    %c0_86 = arith.constant 0 : index
    %126 = vector.load %arg9[%c0_85, %c0_86] : memref<1x128xf32, #tpu.memory_space<vmem>>, vector<1x128xf32>
    %127 = vector.broadcast %125 : vector<144x1xf32> to vector<144x128xf32>
    %128 = arith.mulf %121, %127 : vector<144x128xf32>
    %cst_87 = arith.constant dense<0.000000e+00> : vector<128xf32>
    %129 = vector.multi_reduction <add>, %128, %cst_87 [0] : vector<144x128xf32> to vector<128xf32>
    %130 = vector.shape_cast %129 : vector<128xf32> to vector<1x128xf32>
    %131 = arith.addf %126, %130 : vector<1x128xf32>
    %c0_88 = arith.constant 0 : index
    %c0_89 = arith.constant 0 : index
    %132 = vector.load %arg9[%c0_88, %c0_89] : memref<1x128xf32, #tpu.memory_space<vmem>>, vector<1x128xf32>
    tpu.vector_store %arg9[%c0_88, %c0_89], %131 {strides = array<i32>} : memref<1x128xf32, #tpu.memory_space<vmem>>, vector<1x128xf32>,
    %c1_i32_90 = arith.constant 1 : i32
    %133 = arith.cmpi eq, %arg1, %c1_i32_90 : i32
    %134 = arith.extui %133 : i1 to i32
    %c0_i32_91 = arith.constant 0 : i32
    %135 = arith.cmpi ne, %134, %c0_i32_91 : i32
    scf.if %135 {
      %c0_92 = arith.constant 0 : index
      %c0_93 = arith.constant 0 : index
      %136 = vector.load %arg9[%c0_92, %c0_93] : memref<1x128xf32, #tpu.memory_space<vmem>>, vector<1x128xf32>
      %cst_94 = arith.constant 3.906250e-03 : f32
      %137 = vector.broadcast %cst_94 : f32 to vector<1x128xf32>
      %138 = arith.mulf %136, %137 : vector<1x128xf32>
      %139 = arith.truncf %138 : vector<1x128xf32> to vector<1x128xbf16>
      %c0_95 = arith.constant 0 : index
      %c0_96 = arith.constant 0 : index
      %140 = vector.load %arg6[%c0_95, %c0_96] : memref<128x128xbf16, #tpu.memory_space<vmem>>, vector<128x128xbf16>
      %cst_97 = arith.constant dense<0.000000e+00> : vector<1x128xf32>
      %141 = tpu.matmul %139, %140, %cst_97 {dimension_numbers = #tpu.dot_dimension_numbers<[1], [0], [0], [1], [0, 0, 1, 1], [], []>} : vector<1x128xbf16>, vector<128x128xbf16>, vector<1x128xf32> -> vector<1x128xf32>
      %c0_98 = arith.constant 0 : index
      %c0_99 = arith.constant 0 : index
      %142 = vector.load %arg7[%c0_98, %c0_99] : memref<1x128xf32, #tpu.memory_space<vmem>>, vector<1x128xf32>
      %143 = arith.addf %141, %142 : vector<1x128xf32>
      %cst_100 = arith.constant dense<0xFF800000> : vector<1xf32>
      %144 = vector.multi_reduction <maximumf>, %143, %cst_100 [1] : vector<1x128xf32> to vector<1xf32>
      %145 = vector.shape_cast %144 : vector<1xf32> to vector<1x1xf32>
      %146 = vector.broadcast %145 : vector<1x1xf32> to vector<1x128xf32>
      %147 = arith.subf %143, %146 : vector<1x128xf32>
      %148 = math.exp %147 : vector<1x128xf32>
      %149 = tpu.iota {dimensions = array<i32: 1>} : vector<1x128xi32>
      %c8_i32_101 = arith.constant 8 : i32
      %150 = vector.broadcast %c8_i32_101 : i32 to vector<1x128xi32>
      %151 = arith.cmpi slt, %149, %150 : vector<1x128xi32>
      %cst_102 = arith.constant 0.000000e+00 : f32
      %152 = vector.broadcast %cst_102 : f32 to vector<1x128xf32>
      %153 = arith.select %151, %148, %152 : vector<1x128xi1>, vector<1x128xf32>
      %cst_103 = arith.constant dense<0.000000e+00> : vector<1xf32>
      %154 = vector.multi_reduction <add>, %153, %cst_103 [1] : vector<1x128xf32> to vector<1xf32>
      %155 = vector.shape_cast %154 : vector<1xf32> to vector<1x1xf32>
      %156 = tpu.reciprocal %155 {approx = true} : vector<1x1xf32> -> vector<1x1xf32>
      %157 = vector.broadcast %156 : vector<1x1xf32> to vector<1x128xf32>
      %158 = arith.mulf %153, %157 : vector<1x128xf32>
      %c0_104 = arith.constant 0 : index
      %c0_105 = arith.constant 0 : index
      %c0_106 = arith.constant 0 : index
      %159 = vector.load %arg8[%c0_104, %c0_105, %c0_106] : memref<1x1x128xf32, #tpu.memory_space<vmem>>, vector<1x1x128xf32>
      %160 = vector.shape_cast %159 : vector<1x1x128xf32> to vector<1x128xf32>
      %161 = vector.shape_cast %158 : vector<1x128xf32> to vector<1x1x128xf32>
      tpu.vector_store %arg8[%c0_104, %c0_105, %c0_106], %161 {strides = array<i32>} : memref<1x1x128xf32, #tpu.memory_space<vmem>>, vector<1x1x128xf32>,
    } else {
    }
    return
  }
  func.func @transform_0(%arg0: i32, %arg1: i32) -> (i32, i32, i32) {
    %c0_i32 = arith.constant 0 : i32
    %c0_i32_0 = arith.constant 0 : i32
    %c0_i32_1 = arith.constant 0 : i32
    return %arg0, %c0_i32, %c0_i32_0 : i32, i32, i32
  }
  func.func @transform_1(%arg0: i32, %arg1: i32) -> (i32, i32) {
    %c0_i32 = arith.constant 0 : i32
    %c0_i32_0 = arith.constant 0 : i32
    %c0_i32_1 = arith.constant 0 : i32
    return %c0_i32, %c0_i32_0 : i32, i32
  }
  func.func @transform_2(%arg0: i32, %arg1: i32) -> (i32, i32, i32) {
    %c0_i32 = arith.constant 0 : i32
    %c0_i32_0 = arith.constant 0 : i32
    %c0_i32_1 = arith.constant 0 : i32
    %c0_i32_2 = arith.constant 0 : i32
    return %c0_i32, %c0_i32_0, %c0_i32_1 : i32, i32, i32
  }
  func.func @transform_3(%arg0: i32, %arg1: i32) -> (i32, i32) {
    %c0_i32 = arith.constant 0 : i32
    %c0_i32_0 = arith.constant 0 : i32
    %c0_i32_1 = arith.constant 0 : i32
    return %c0_i32, %c0_i32_0 : i32, i32
  }
  func.func @transform_4(%arg0: i32, %arg1: i32) -> (i32, i32) {
    %c0_i32 = arith.constant 0 : i32
    %c0_i32_0 = arith.constant 0 : i32
    %c0_i32_1 = arith.constant 0 : i32
    return %c0_i32, %c0_i32_0 : i32, i32
  }
  func.func @transform_5(%arg0: i32, %arg1: i32) -> (i32, i32) {
    %c0_i32 = arith.constant 0 : i32
    %c0_i32_0 = arith.constant 0 : i32
    %c0_i32_1 = arith.constant 0 : i32
    return %c0_i32, %c0_i32_0 : i32, i32
  }
  func.func @transform_6(%arg0: i32, %arg1: i32) -> (i32, i32, i32) {
    %c0_i32 = arith.constant 0 : i32
    %c0_i32_0 = arith.constant 0 : i32
    %c0_i32_1 = arith.constant 0 : i32
    return %arg0, %c0_i32, %c0_i32_0 : i32, i32, i32
  }
}

</mosaic_0001>

<bundles_post_ra>
// kernel: tile.8
= control target key start
LH: loop header
LB: loop body
LE: loop exit
PB: predicated region body
PF: predicated region fallthrough
CT: control target
= control target key end

     0   :  { %s34_s0 = inlined_call_operand.vmem [shape: f32[18], index: 0, kind: input, shape index: {}]   ;;  %s35_s1 = inlined_call_operand.vmem [shape: f32[19,18], index: 1, kind: output, shape index: {}]  }
   0x1   :  { %v4_v0 = vld [vmem:[%s34_s0] ss:$0 sm:$0xff] }
   0x2   :  { %5 = vst [vmem:[%s35_s1] sm:$0xff] %v4_v0  ;;  %10 = vst [vmem:[%s35_s1 + $0x8] sm:$0xff] %v4_v0 }
   0x3   :  { %11 = vst [vmem:[%s35_s1 + $0x10] sm:$0xff] %v4_v0 }

// kernel: tile.0
= control target key start
LH: loop header
LB: loop body
LE: loop exit
PB: predicated region body
PF: predicated region fallthrough
CT: control target
= control target key end

     0   :  { %vm31_vm0 = vcmask 1047555   ;;  %s899_s10 = smov 127   ;;  %vm69_vm1 = vcmask 1047556   ;;  %s900_s21 = smov 126   ;;  %vm145_vm2 = vcmask 1047557   ;;  %vm222_vm3 = vcmask 1047558   ;;  %s1754_s0 = inlined_call_operand.vmem [shape: f32[19,18], index: 0, kind: input, shape index: {}]   ;;  %s1755_s1 = inlined_call_operand.vmem [shape: f32[342,1], index: 1, kind: output, shape index: {}]  }
   0x1   :  { %v15_v0 = vld.sshfl [vmem:[%s1754_s0] sm:$0xff pattern:$0xf6d4b290]   ;;  %v673_v1 = vld.sshfl [vmem:[%s1754_s0 + $0x7] sm:$0xff pattern:$0x7a]  }
   0x2   :  { %16 = vrot.lane.b32.xlu0 %v15_v0, %s899_s10  ;;  %46 = vrot.lane.b32.xlu1 %v673_v1, %s899_s10  ;;  %v667_v2 = vld.sshfl [vmem:[%s1754_s0 + $0x8] sm:$0xff pattern:$0xa8]   ;;  %v668_v3 = vld.sshfl [vmem:[%s1754_s0 + $0x1] sm:$0xff pattern:$0x4b290000]  }
   0x3   :  { %v32_v4 = vsel %vm31_vm0, %v668_v3, %v667_v2  ;;  %v53_v5 = vld.sshfl [vmem:[%s1754_s0] sm:$0xff pattern:$0x6d4b2907]   ;;  %v680_v6 = vld.sshfl [vmem:[%s1754_s0 + $0x8] sm:$0xff pattern:$0x7a8]  }
   0x4   :  { %v681_v7 = vld.sshfl [vmem:[%s1754_s0 + $0x1] sm:$0xff pattern:$0xb2900000]   ;;  %v686_v9 = vld.sshfl [vmem:[%s1754_s0 + $0x5] sm:$0xff pattern:$0x9999990c]  }
   0x5   :  { %v70_v8 = vsel %vm69_vm1, %v681_v7, %v680_v6  ;;  %s901_s24 = smov 125   ;;  %v129_v10 = vld.sshfl [vmem:[%s1754_s0] sm:$0xff pattern:$0xd4b2907e]   ;;  %s902_s2 = smov 124   ;;  %vm299_vm4 = vcmask 1047559  }
   0x6   :  { %33 = vrot.lane.b32.xlu0 %v32_v4, %s899_s10  ;;  %54 = vrot.lane.b32.xlu1 %v53_v5, %s900_s21  ;;  %v706_v11 = vld.sshfl [vmem:[%s1754_s0 + $0x6] sm:$0xff pattern:$0x222290ca]   ;;  %v707_v12 = vld.sshfl [vmem:[%s1754_s0 + $0x1] sm:$0xff pattern:$0x29000000]  }
   0x7   :  { %v146_v13 = vsel %vm145_vm2, %v707_v12, %v706_v11  ;;  %v712_v14 = vld.sshfl [vmem:[%s1754_s0 + $0x5] sm:$0xff pattern:$0x7c]   ;;  %s220_s5 = smov 192  ;;  %s903_s6 = smov 123   ;;  %vm385_vm5 = vcmask 1042434  }
   0x8   :  { %v205_v15 = vld.sshfl [vmem:[%s1754_s0] sm:$0xff pattern:$0x4b2907e5]   ;;  %v732_v16 = vld.sshfl [vmem:[%s1754_s0 + $0x6] sm:$0xff pattern:$0x222907ca]  }
   0x9   :  { %v733_v17 = vld [vmem:[%s1754_s0 - $0x35] ss:$9 sm:%s220_s5]   ;;  %s259_s13 = smov 192  ;;  %s904_s14 = smov 122   ;;  %v788_v32 = vld [vmem:[%s1754_s0 + $0xf] sm:$0x4]  }
   0xa   :  { %71 = vrot.lane.b32.xlu0 %v70_v8, %s900_s21  ;;  %84 = vrot.lane.b32.xlu1 %v686_v9, %s900_s21  ;;  %v223_v18 = vsel %vm222_vm3, %v733_v17, %v732_v16  ;;  %v738_v19 = vld.sshfl [vmem:[%s1754_s0 + $0x3] sm:$0xff pattern:$0x9999990e]   ;;  %s905_s19 = smov 121   ;;  %v759_v24 = vld [vmem:[%s1754_s0 - $0x6] sm:$0x80]  }
   0xb   :  { %v746_v20 = vld [vmem:[%s1754_s0 - $0x35] ss:$9 sm:%s259_s13]   ;;  %s906_s26 = smov 120   ;;  %s907_s3 = smov 119   ;;  %v801_v36 = vld [vmem:[%s1754_s0 + $0xf] sm:$0x4]  }
   0xc   :  { %v262_v21 = vsel %vm222_vm3, %v746_v20, %v732_v16  ;;  %v283_v22 = vld.sshfl [vmem:[%s1754_s0] sm:$0xff pattern:$0xb2907e5c]   ;;  %v758_v23 = vld.sshfl [vmem:[%s1754_s0 + $0x4] sm:$0xff pattern:$0x44b290ec]  }
   0xd   :  { %v300_v25 = vsel %vm299_vm4, %v759_v24, %v758_v23  ;;  %v764_v26 = vld [vmem:[%s1754_s0 + $0x11] ss:$-7 sm:$0x7]   ;;  %v771_v27 = vld [vmem:[%s1754_s0 - $0x6] sm:$0x80]   ;;  %s908_s12 = smov 118  }
   0xe   :  { %92 = vrot.lane.b32.xlu0 %v53_v5, %s901_s24  ;;  %109 = vrot.lane.b32.xlu1 %v70_v8, %s901_s24  ;;  %v336_v28 = vsel %vm299_vm4, %v771_v27, %v758_v23  ;;  %v776_v29 = vld [vmem:[%s1754_s0 + $0x11] ss:$-7 sm:$0x7]   ;;  %v782_v33 = vld.sshfl [vmem:[%s1754_s0 + $0x4] sm:$0xff pattern:$0x4b2907ec]  }
   0xf   :  { %v355_v30 = vld.sshfl [vmem:[%s1754_s0] sm:$0xff pattern:$0x2907e5c3]   ;;  %s420_s15 = smov 3  ;;  %s459_s20 = smov 3  ;;  %vm597_vm6 = vcmask 1047554  }
  0x10   :  { %v800_v35 = vld [vmem:[%s1754_s0 + $0x1] ss:$9 sm:%s420_s15]   ;;  %s909_s21 = smov 117   ;;  %v814_v40 = vld [vmem:[%s1754_s0 + $0xf] sm:$0x4]   ;;  %s910_s28 = smov 116  }
  0x11   :  { %v425_v37 = vsel %vm385_vm5, %v801_v36, %v800_v35  ;;  %v433_v38 = vld.sshfl [vmem:[%s1754_s0] sm:$0xff pattern:$0x907e5c3a]   ;;  %v808_v41 = vld.sshfl [vmem:[%s1754_s0 + $0x2] sm:$0xff pattern:$0x6d4b290e]  }
  0x12   :  { %122 = vrot.lane.b32.xlu0 %v686_v9, %s901_s24  ;;  %130 = vrot.lane.b32.xlu1 %v129_v10, %s902_s2  ;;  %v813_v39 = vld [vmem:[%s1754_s0 + $0x12] ss:$-17 sm:%s459_s20]   ;;  %s911_s7 = smov 115   ;;  %s912_s10 = smov 114   ;;  %vm3_vm7 = vcmask 7168  }
  0x13   :  { %v464_v42 = vsel %vm385_vm5, %v814_v40, %v813_v39  ;;  %v827_v44 = vld [vmem:[%s1754_s0 + $0xf] sm:$0x4]   ;;  %v511_v46 = vld.sshfl [vmem:[%s1754_s0] sm:$0xff pattern:$0x7e5c3a1]   ;;  %s593_s15 = smov 3 }
  0x14   :  { %v834_v47 = vld.sshfl [vmem:[%s1754_s0 + $0x2] sm:$0xff pattern:$0x4b2907ef]   ;;  %v839_v48 = vld.sshfl [vmem:[%s1754_s0 + $0x8] sm:$0xff pattern:$0x7a]  }
  0x15   :  { %s913_s16 = smov 113   ;;  %v854_v49 = vld.sshfl [vmem:[%s1754_s0 + $0x1] sm:$0xff pattern:$0x6d4b2907]   ;;  %v859_v50 = vld [vmem:[%s1754_s0 + $0x11] ss:$-17 sm:%s593_s15]  }
  0x16   :  { %147 = vrot.lane.b32.xlu0 %v146_v13, %s902_s2  ;;  %160 = vrot.lane.b32.xlu1 %v712_v14, %s902_s2  ;;  %s381_s2 = smov 3  ;;  %v860_v51 = vld.sshfl [vmem:[%s1754_s0 + $0x2] sm:$0xff pattern:$0x4b290777]   ;;  %v661_v54 = vld [vmem:[%s1754_s0 + $0x10] sm:$0x7]  }
  0x17   :  { %v787_v31 = vld [vmem:[%s1754_s0 + $0x1] ss:$9 sm:%s381_s2]   ;;  %s498_s2 = smov 3  ;;  %s633_s29 = smov 3  ;;  %v598_v55 = vsel %vm597_vm6, %v860_v51, %v859_v50 }
  0x18   :  { %v386_v34 = vsel %vm385_vm5, %v788_v32, %v787_v31  ;;  %v826_v43 = vld [vmem:[%s1754_s0 + $0x12] ss:$-17 sm:%s498_s2]   ;;  %662 = vst.msk [vmem:[%s1755_s1 + $0x120] ss:$18 sm:$0x7] %vm3_vm7, %v661_v54  }
  0x19   :  { %v503_v45 = vsel %vm385_vm5, %v827_v44, %v826_v43  ;;  %v2_v52 = vld [vmem:[%s1754_s0] sm:$0xff]   ;;  %v659_v53 = vld [vmem:[%s1754_s0 + $0x8] sm:$0xff]  }
  0x1a   :  { %168 = vrot.lane.b32.xlu0 %v129_v10, %s903_s6  ;;  %185 = vrot.lane.b32.xlu1 %v146_v13, %s903_s6  ;;  %4 = vst.msk [vmem:[%s1755_s1] ss:$18 sm:$0xff] %vm3_vm7, %v2_v52   ;;  %660 = vst.msk [vmem:[%s1755_s1 + $0x90] ss:$18 sm:$0xff] %vm3_vm7, %v659_v53  }
  0x1b   :  { %v865_v56 = vld.sshfl [vmem:[%s1754_s0 + $0xf] sm:$0xff pattern:$0x31]  }
  0x1c   :  { %v873_v57 = vld [vmem:[%s1754_s0 + $0x11] ss:$-17 sm:%s633_s29]   ;;  %s915_s0 = smov 111  }
  0x1d   :  { %v638_v58 = vsel %vm597_vm6, %v860_v51, %v873_v57 }
  0x1e   :  { %198 = vrot.lane.b32.xlu0 %v712_v14, %s903_s6  ;;  %206 = vrot.lane.b32.xlu1 %v205_v15, %s904_s14 }
  0x22   :  { %224 = vrot.lane.b32.xlu0 %v223_v18, %s904_s14  ;;  %237 = vrot.lane.b32.xlu1 %v738_v19, %s904_s14 }
  0x26   :  { %245 = vrot.lane.b32.xlu0 %v205_v15, %s905_s19  ;;  %263 = vrot.lane.b32.xlu1 %v262_v21, %s905_s19 }
  0x2a   :  { %276 = vrot.lane.b32.xlu0 %v738_v19, %s905_s19  ;;  %284 = vrot.lane.b32.xlu1 %v283_v22, %s906_s26 }
  0x2e   :  { %301 = vrot.lane.b32.xlu0 %v300_v25, %s906_s26  ;;  %314 = vrot.lane.b32.xlu1 %v764_v26, %s906_s26 }
  0x32   :  { %320 = vrot.lane.b32.xlu0 %v283_v22, %s907_s3  ;;  %337 = vrot.lane.b32.xlu1 %v336_v28, %s907_s3 }
  0x36   :  { %350 = vrot.lane.b32.xlu0 %v776_v29, %s907_s3  ;;  %356 = vrot.lane.b32.xlu1 %v355_v30, %s908_s12 }
  0x3a   :  { %369 = vrot.lane.b32.xlu0 %v782_v33, %s908_s12  ;;  %387 = vrot.lane.b32.xlu1 %v386_v34, %s908_s12 }
  0x3e   :  { %395 = vrot.lane.b32.xlu0 %v355_v30, %s909_s21  ;;  %408 = vrot.lane.b32.xlu1 %v782_v33, %s909_s21 }
  0x42   :  { %426 = vrot.lane.b32.xlu0 %v425_v37, %s909_s21  ;;  %434 = vrot.lane.b32.xlu1 %v433_v38, %s910_s28 }
  0x46   :  { %447 = vrot.lane.b32.xlu0 %v808_v41, %s910_s28  ;;  %465 = vrot.lane.b32.xlu1 %v464_v42, %s910_s28 }
  0x4a   :  { %473 = vrot.lane.b32.xlu0 %v433_v38, %s911_s7  ;;  %486 = vrot.lane.b32.xlu1 %v808_v41, %s911_s7 }
  0x4e   :  { %504 = vrot.lane.b32.xlu0 %v503_v45, %s911_s7  ;;  %512 = vrot.lane.b32.xlu1 %v511_v46, %s912_s10  ;;  %s914_s7 = smov 112  }
  0x52   :  { %525 = vrot.lane.b32.xlu0 %v834_v47, %s912_s10  ;;  %538 = vrot.lane.b32.xlu1 %v839_v48, %s912_s10 }
  0x56   :  { %546 = vrot.lane.b32.xlu0 %v511_v46, %s913_s16  ;;  %559 = vrot.lane.b32.xlu1 %v834_v47, %s913_s16 }
  0x5a   :  { %572 = vrot.lane.b32.xlu0 %v839_v48, %s913_s16  ;;  %581 = vrot.lane.b32.xlu1 %v854_v49, %s914_s7 }
  0x5e   :  { %599 = vrot.lane.b32.xlu0 %v598_v55, %s914_s7  ;;  %612 = vrot.lane.b32.xlu1 %v865_v56, %s914_s7 }
  0x62   :  { %621 = vrot.lane.b32.xlu0 %v854_v49, %s915_s0  ;;  %639 = vrot.lane.b32.xlu1 %v638_v58, %s915_s0 }
  0x66   :  { %652 = vrot.lane.b32.xlu0 %v865_v56, %s915_s0 }
  0x74   :  { %v17_v59 = vpop.permute.xlu0 %16   ;;  %v47_v60 = vpop.permute.xlu1 %46  }
  0x75   :  { %663 = vst.msk [vmem:[%s1755_s1 + $0x1] ss:$162 sm:$0x3] %vm3_vm7, %v17_v59   ;;  %664 = vst.msk [vmem:[%s1755_s1 - $0x11f] ss:$162 sm:$0xc] %vm3_vm7, %v17_v59  }
  0x76   :  { %665 = vst.msk [vmem:[%s1755_s1 - $0x23f] ss:$162 sm:$0x30] %vm3_vm7, %v17_v59   ;;  %666 = vst.msk [vmem:[%s1755_s1 - $0x35f] ss:$162 sm:$0xc0] %vm3_vm7, %v17_v59  }
  0x77   :  { %674 = vst.msk [vmem:[%s1755_s1 + $0x133] ss:$-54 sm:$0x3] %vm3_vm7, %v47_v60   ;;  %675 = vst.msk [vmem:[%s1755_s1 + $0x7d] sm:$0x4] %vm3_vm7, %v47_v60  }
  0x78   :  { %v34_v61 = vpop.permute.xlu0 %33   ;;  %v55_v62 = vpop.permute.xlu1 %54  }
  0x79   :  { %669 = vst.msk [vmem:[%s1755_s1 + $0x121] ss:$36 sm:$0x3] %vm3_vm7, %v34_v61   ;;  %670 = vst.msk [vmem:[%s1755_s1 + $0x18d] ss:$-126 sm:$0xc] %vm3_vm7, %v34_v61  }
  0x7a   :  { %671 = vst.msk [vmem:[%s1755_s1 + $0x2ad] ss:$-126 sm:$0x30] %vm3_vm7, %v34_v61   ;;  %672 = vst.msk [vmem:[%s1755_s1 + $0x3cd] ss:$-126 sm:$0xc0] %vm3_vm7, %v34_v61  }
  0x7b   :  { %676 = vst.msk [vmem:[%s1755_s1 + $0x80] ss:$-126 sm:$0x3] %vm3_vm7, %v55_v62   ;;  %677 = vst.msk [vmem:[%s1755_s1 + $0x1a0] ss:$-126 sm:$0xc] %vm3_vm7, %v55_v62  }
  0x7c   :  { %678 = vst.msk [vmem:[%s1755_s1 + $0x2c0] ss:$-126 sm:$0x30] %vm3_vm7, %v55_v62   ;;  %679 = vst.msk [vmem:[%s1755_s1 + $0x3e0] ss:$-126 sm:$0xc0] %vm3_vm7, %v55_v62   ;;  %v72_v63 = vpop.permute.xlu0 %71   ;;  %v85_v0 = vpop.permute.xlu1 %84  }
  0x7d   :  { %682 = vst.msk [vmem:[%s1755_s1 + $0x122] ss:$36 sm:$0x3] %vm3_vm7, %v72_v63   ;;  %683 = vst.msk [vmem:[%s1755_s1 + $0x20c] ss:$-126 sm:$0x1c] %vm3_vm7, %v72_v63  }
  0x7e   :  { %684 = vst.msk [vmem:[%s1755_s1 + $0x32c] ss:$-126 sm:$0x60] %vm3_vm7, %v72_v63   ;;  %685 = vst.msk [vmem:[%s1755_s1 + $0xd3] sm:$0x80] %vm3_vm7, %v72_v63  }
  0x7f   :  { %687 = vst.msk [vmem:[%s1755_s1 + $0x134] ss:$-216 sm:$0x3] %vm3_vm7, %v85_v0   ;;  %688 = vst.msk [vmem:[%s1755_s1 + $0xfc] sm:$0x4] %vm3_vm7, %v85_v0  }
  0x80   :  { %v93_v1 = vpop.permute.xlu0 %92   ;;  %v110_v2 = vpop.permute.xlu1 %109  }
  0x81   :  { %689 = vst.msk [vmem:[%s1755_s1 + $0x81] ss:$-126 sm:$0x3] %vm3_vm7, %v93_v1   ;;  %690 = vst.msk [vmem:[%s1755_s1 + $0x1a1] ss:$-126 sm:$0xc] %vm3_vm7, %v93_v1  }
  0x82   :  { %691 = vst.msk [vmem:[%s1755_s1 + $0x2c1] ss:$-126 sm:$0x30] %vm3_vm7, %v93_v1   ;;  %692 = vst.msk [vmem:[%s1755_s1 + $0x3e1] ss:$-126 sm:$0xc0] %vm3_vm7, %v93_v1  }
  0x83   :  { %695 = vst.msk [vmem:[%s1755_s1 + $0x123] ss:$36 sm:$0x3] %vm3_vm7, %v110_v2   ;;  %696 = vst.msk [vmem:[%s1755_s1 + $0x20d] ss:$-126 sm:$0x1c] %vm3_vm7, %v110_v2  }
  0x84   :  { %697 = vst.msk [vmem:[%s1755_s1 + $0x32d] ss:$-126 sm:$0x60] %vm3_vm7, %v110_v2   ;;  %698 = vst.msk [vmem:[%s1755_s1 + $0xd4] sm:$0x80] %vm3_vm7, %v110_v2   ;;  %v123_v3 = vpop.permute.xlu0 %122   ;;  %v131_v4 = vpop.permute.xlu1 %130  }
  0x85   :  { %700 = vst.msk [vmem:[%s1755_s1 + $0x135] ss:$-216 sm:$0x3] %vm3_vm7, %v123_v3   ;;  %701 = vst.msk [vmem:[%s1755_s1 + $0xfd] sm:$0x4] %vm3_vm7, %v123_v3  }
  0x86   :  { %702 = vst.msk [vmem:[%s1755_s1 + $0x100] ss:$-126 sm:$0x7] %vm3_vm7, %v131_v4   ;;  %703 = vst.msk [vmem:[%s1755_s1 + $0x220] ss:$-126 sm:$0x18] %vm3_vm7, %v131_v4  }
  0x87   :  { %704 = vst.msk [vmem:[%s1755_s1 + $0x340] ss:$-126 sm:$0x60] %vm3_vm7, %v131_v4   ;;  %705 = vst.msk [vmem:[%s1755_s1 + $0xe7] sm:$0x80] %vm3_vm7, %v131_v4  }
  0x88   :  { %v148_v5 = vpop.permute.xlu0 %147   ;;  %v161_v6 = vpop.permute.xlu1 %160  }
  0x89   :  { %708 = vst.msk [vmem:[%s1755_s1 + $0x124] ss:$36 sm:$0x3] %vm3_vm7, %v148_v5   ;;  %709 = vst.msk [vmem:[%s1755_s1 - $0xd4] ss:$162 sm:$0xc] %vm3_vm7, %v148_v5  }
  0x8a   :  { %710 = vst.msk [vmem:[%s1755_s1 + $0x28c] ss:$-126 sm:$0x30] %vm3_vm7, %v148_v5   ;;  %711 = vst.msk [vmem:[%s1755_s1 + $0x3ac] ss:$-126 sm:$0xc0] %vm3_vm7, %v148_v5  }
  0x8b   :  { %713 = vst.msk [vmem:[%s1755_s1 + $0x136] ss:$-90 sm:$0x3] %vm3_vm7, %v161_v6   ;;  %714 = vst.msk [vmem:[%s1755_s1 + $0x5c] sm:$0x4] %vm3_vm7, %v161_v6  }
  0x8c   :  { %v169_v7 = vpop.permute.xlu0 %168   ;;  %v186_v8 = vpop.permute.xlu1 %185  }
  0x8d   :  { %715 = vst.msk [vmem:[%s1755_s1 + $0x101] ss:$-126 sm:$0x7] %vm3_vm7, %v169_v7   ;;  %716 = vst.msk [vmem:[%s1755_s1 + $0x221] ss:$-126 sm:$0x18] %vm3_vm7, %v169_v7  }
  0x8e   :  { %717 = vst.msk [vmem:[%s1755_s1 + $0x341] ss:$-126 sm:$0x60] %vm3_vm7, %v169_v7   ;;  %718 = vst.msk [vmem:[%s1755_s1 + $0xe8] sm:$0x80] %vm3_vm7, %v169_v7  }
  0x8f   :  { %721 = vst.msk [vmem:[%s1755_s1 + $0x125] ss:$36 sm:$0x3] %vm3_vm7, %v186_v8   ;;  %722 = vst.msk [vmem:[%s1755_s1 - $0xd3] ss:$162 sm:$0xc] %vm3_vm7, %v186_v8  }
  0x90   :  { %723 = vst.msk [vmem:[%s1755_s1 + $0x28d] ss:$-126 sm:$0x30] %vm3_vm7, %v186_v8   ;;  %724 = vst.msk [vmem:[%s1755_s1 + $0x3ad] ss:$-126 sm:$0xc0] %vm3_vm7, %v186_v8   ;;  %v199_v9 = vpop.permute.xlu0 %198   ;;  %v207_v10 = vpop.permute.xlu1 %206  }
  0x91   :  { %726 = vst.msk [vmem:[%s1755_s1 + $0x137] ss:$-90 sm:$0x3] %vm3_vm7, %v199_v9   ;;  %727 = vst.msk [vmem:[%s1755_s1 + $0x5d] sm:$0x4] %vm3_vm7, %v199_v9  }
  0x92   :  { %728 = vst.msk [vmem:[%s1755_s1 + $0x60] ss:$162 sm:$0x3] %vm3_vm7, %v207_v10   ;;  %729 = vst.msk [vmem:[%s1755_s1 + $0x180] ss:$-126 sm:$0xc] %vm3_vm7, %v207_v10  }
  0x93   :  { %730 = vst.msk [vmem:[%s1755_s1 + $0x2a0] ss:$-126 sm:$0x30] %vm3_vm7, %v207_v10   ;;  %731 = vst.msk [vmem:[%s1755_s1 + $0x3c0] ss:$-126 sm:$0xc0] %vm3_vm7, %v207_v10  }
  0x94   :  { %v225_v11 = vpop.permute.xlu0 %224   ;;  %v238_v12 = vpop.permute.xlu1 %237  }
  0x95   :  { %734 = vst.msk [vmem:[%s1755_s1 + $0x126] ss:$36 sm:$0x3] %vm3_vm7, %v225_v11   ;;  %735 = vst.msk [vmem:[%s1755_s1 + $0x1ec] ss:$-126 sm:$0xc] %vm3_vm7, %v225_v11  }
  0x96   :  { %736 = vst.msk [vmem:[%s1755_s1 + $0x30c] ss:$-126 sm:$0x70] %vm3_vm7, %v225_v11   ;;  %737 = vst.msk [vmem:[%s1755_s1 + $0xb3] sm:$0x80] %vm3_vm7, %v225_v11  }
  0x97   :  { %739 = vst.msk [vmem:[%s1755_s1 + $0x138] ss:$-252 sm:$0x3] %vm3_vm7, %v238_v12   ;;  %740 = vst.msk [vmem:[%s1755_s1 + $0xdc] sm:$0x4] %vm3_vm7, %v238_v12  }
  0x98   :  { %v246_v13 = vpop.permute.xlu0 %245   ;;  %v264_v14 = vpop.permute.xlu1 %263  }
  0x99   :  { %741 = vst.msk [vmem:[%s1755_s1 + $0x61] ss:$162 sm:$0x3] %vm3_vm7, %v246_v13   ;;  %742 = vst.msk [vmem:[%s1755_s1 + $0x181] ss:$-126 sm:$0xc] %vm3_vm7, %v246_v13  }
  0x9a   :  { %743 = vst.msk [vmem:[%s1755_s1 + $0x2a1] ss:$-126 sm:$0x30] %vm3_vm7, %v246_v13   ;;  %744 = vst.msk [vmem:[%s1755_s1 + $0x3c1] ss:$-126 sm:$0xc0] %vm3_vm7, %v246_v13  }
  0x9b   :  { %747 = vst.msk [vmem:[%s1755_s1 + $0x127] ss:$36 sm:$0x3] %vm3_vm7, %v264_v14   ;;  %748 = vst.msk [vmem:[%s1755_s1 + $0x1ed] ss:$-126 sm:$0xc] %vm3_vm7, %v264_v14  }
  0x9c   :  { %749 = vst.msk [vmem:[%s1755_s1 + $0x30d] ss:$-126 sm:$0x70] %vm3_vm7, %v264_v14   ;;  %750 = vst.msk [vmem:[%s1755_s1 + $0xb4] sm:$0x80] %vm3_vm7, %v264_v14   ;;  %v277_v15 = vpop.permute.xlu0 %276   ;;  %v285_v16 = vpop.permute.xlu1 %284  }
  0x9d   :  { %752 = vst.msk [vmem:[%s1755_s1 + $0x139] ss:$-252 sm:$0x3] %vm3_vm7, %v277_v15   ;;  %753 = vst.msk [vmem:[%s1755_s1 + $0xdd] sm:$0x4] %vm3_vm7, %v277_v15  }
  0x9e   :  { %754 = vst.msk [vmem:[%s1755_s1 + $0xe0] ss:$-126 sm:$0x3] %vm3_vm7, %v285_v16   ;;  %755 = vst.msk [vmem:[%s1755_s1 + $0x200] ss:$-126 sm:$0x1c] %vm3_vm7, %v285_v16  }
  0x9f   :  { %756 = vst.msk [vmem:[%s1755_s1 + $0x320] ss:$-126 sm:$0x60] %vm3_vm7, %v285_v16   ;;  %757 = vst.msk [vmem:[%s1755_s1 + $0xc7] sm:$0x80] %vm3_vm7, %v285_v16  }
  0xa0   :  { %v302_v17 = vpop.permute.xlu0 %301   ;;  %v315_v18 = vpop.permute.xlu1 %314  }
  0xa1   :  { %760 = vst.msk [vmem:[%s1755_s1 + $0x128] ss:$36 sm:$0x3] %vm3_vm7, %v302_v17   ;;  %761 = vst.msk [vmem:[%s1755_s1 - $0xf4] ss:$162 sm:$0xc] %vm3_vm7, %v302_v17  }
  0xa2   :  { %762 = vst.msk [vmem:[%s1755_s1 - $0x214] ss:$162 sm:$0x30] %vm3_vm7, %v302_v17   ;;  %763 = vst.msk [vmem:[%s1755_s1 + $0x38c] ss:$-126 sm:$0xc0] %vm3_vm7, %v302_v17  }
  0xa3   :  { %765 = vst.msk [vmem:[%s1755_s1 + $0x13a] ss:$-126 sm:$0x7] %vm3_vm7, %v315_v18  }
  0xa4   :  { %v321_v19 = vpop.permute.xlu0 %320   ;;  %v338_v20 = vpop.permute.xlu1 %337  }
  0xa5   :  { %766 = vst.msk [vmem:[%s1755_s1 + $0xe1] ss:$-126 sm:$0x3] %vm3_vm7, %v321_v19   ;;  %767 = vst.msk [vmem:[%s1755_s1 + $0x201] ss:$-126 sm:$0x1c] %vm3_vm7, %v321_v19  }
  0xa6   :  { %768 = vst.msk [vmem:[%s1755_s1 + $0x321] ss:$-126 sm:$0x60] %vm3_vm7, %v321_v19   ;;  %769 = vst.msk [vmem:[%s1755_s1 + $0xc8] sm:$0x80] %vm3_vm7, %v321_v19  }
  0xa7   :  { %772 = vst.msk [vmem:[%s1755_s1 + $0x129] ss:$36 sm:$0x3] %vm3_vm7, %v338_v20   ;;  %773 = vst.msk [vmem:[%s1755_s1 - $0xf3] ss:$162 sm:$0xc] %vm3_vm7, %v338_v20  }
  0xa8   :  { %774 = vst.msk [vmem:[%s1755_s1 - $0x213] ss:$162 sm:$0x30] %vm3_vm7, %v338_v20   ;;  %775 = vst.msk [vmem:[%s1755_s1 + $0x38d] ss:$-126 sm:$0xc0] %vm3_vm7, %v338_v20   ;;  %v351_v21 = vpop.permute.xlu0 %350   ;;  %v357_v22 = vpop.permute.xlu1 %356  }
  0xa9   :  { %777 = vst.msk [vmem:[%s1755_s1 + $0x13b] ss:$-126 sm:$0x7] %vm3_vm7, %v351_v21   ;;  %778 = vst.msk [vmem:[%s1755_s1 + $0x40] ss:$162 sm:$0x3] %vm3_vm7, %v357_v22  }
  0xaa   :  { %779 = vst.msk [vmem:[%s1755_s1 - $0xe0] ss:$162 sm:$0xc] %vm3_vm7, %v357_v22   ;;  %780 = vst.msk [vmem:[%s1755_s1 + $0x280] ss:$-126 sm:$0x30] %vm3_vm7, %v357_v22  }
  0xab   :  { %781 = vst.msk [vmem:[%s1755_s1 + $0x3a0] ss:$-126 sm:$0xc0] %vm3_vm7, %v357_v22  }
  0xac   :  { %v370_v23 = vpop.permute.xlu0 %369   ;;  %v388_v24 = vpop.permute.xlu1 %387  }
  0xad   :  { %783 = vst.msk [vmem:[%s1755_s1 + $0x12a] ss:$36 sm:$0x3] %vm3_vm7, %v370_v23   ;;  %784 = vst.msk [vmem:[%s1755_s1 + $0x1cc] ss:$-126 sm:$0xc] %vm3_vm7, %v370_v23  }
  0xae   :  { %785 = vst.msk [vmem:[%s1755_s1 + $0x2ec] ss:$-126 sm:$0x30] %vm3_vm7, %v370_v23   ;;  %786 = vst.msk [vmem:[%s1755_s1 + $0x40c] ss:$-126 sm:$0xc0] %vm3_vm7, %v370_v23  }
  0xaf   :  { %789 = vst.msk [vmem:[%s1755_s1 + $0x1c] ss:$162 sm:$0x3] %vm3_vm7, %v388_v24   ;;  %790 = vst.msk [vmem:[%s1755_s1 + $0x13a] sm:$0x4] %vm3_vm7, %v388_v24  }
  0xb0   :  { %v396_v25 = vpop.permute.xlu0 %395   ;;  %v409_v26 = vpop.permute.xlu1 %408  }
  0xb1   :  { %791 = vst.msk [vmem:[%s1755_s1 + $0x41] ss:$162 sm:$0x3] %vm3_vm7, %v396_v25   ;;  %792 = vst.msk [vmem:[%s1755_s1 - $0xdf] ss:$162 sm:$0xc] %vm3_vm7, %v396_v25  }
  0xb2   :  { %793 = vst.msk [vmem:[%s1755_s1 + $0x281] ss:$-126 sm:$0x30] %vm3_vm7, %v396_v25   ;;  %794 = vst.msk [vmem:[%s1755_s1 + $0x3a1] ss:$-126 sm:$0xc0] %vm3_vm7, %v396_v25  }
  0xb3   :  { %796 = vst.msk [vmem:[%s1755_s1 + $0x12b] ss:$36 sm:$0x3] %vm3_vm7, %v409_v26   ;;  %797 = vst.msk [vmem:[%s1755_s1 + $0x1cd] ss:$-126 sm:$0xc] %vm3_vm7, %v409_v26  }
  0xb4   :  { %798 = vst.msk [vmem:[%s1755_s1 + $0x2ed] ss:$-126 sm:$0x30] %vm3_vm7, %v409_v26   ;;  %799 = vst.msk [vmem:[%s1755_s1 + $0x40d] ss:$-126 sm:$0xc0] %vm3_vm7, %v409_v26   ;;  %v427_v27 = vpop.permute.xlu0 %426   ;;  %v435_v28 = vpop.permute.xlu1 %434  }
  0xb5   :  { %802 = vst.msk [vmem:[%s1755_s1 + $0x1d] ss:$162 sm:$0x3] %vm3_vm7, %v427_v27   ;;  %803 = vst.msk [vmem:[%s1755_s1 + $0x13b] sm:$0x4] %vm3_vm7, %v427_v27  }
  0xb6   :  { %804 = vst.msk [vmem:[%s1755_s1 + $0xc0] ss:$-126 sm:$0x3] %vm3_vm7, %v435_v28   ;;  %805 = vst.msk [vmem:[%s1755_s1 + $0x1e0] ss:$-126 sm:$0xc] %vm3_vm7, %v435_v28  }
  0xb7   :  { %806 = vst.msk [vmem:[%s1755_s1 + $0x300] ss:$-126 sm:$0x70] %vm3_vm7, %v435_v28   ;;  %807 = vst.msk [vmem:[%s1755_s1 + $0xa7] sm:$0x80] %vm3_vm7, %v435_v28  }
  0xb8   :  { %v448_v29 = vpop.permute.xlu0 %447   ;;  %v466_v30 = vpop.permute.xlu1 %465  }
  0xb9   :  { %809 = vst.msk [vmem:[%s1755_s1 + $0x12c] ss:$-252 sm:$0x3] %vm3_vm7, %v448_v29   ;;  %810 = vst.msk [vmem:[%s1755_s1 + $0x1ce] ss:$-126 sm:$0xc] %vm3_vm7, %v448_v29  }
  0xba   :  { %811 = vst.msk [vmem:[%s1755_s1 + $0x2ee] ss:$-126 sm:$0x30] %vm3_vm7, %v448_v29   ;;  %812 = vst.msk [vmem:[%s1755_s1 + $0x40e] ss:$-126 sm:$0xc0] %vm3_vm7, %v448_v29  }
  0xbb   :  { %815 = vst.msk [vmem:[%s1755_s1 + $0x150] ss:$-306 sm:$0x3] %vm3_vm7, %v466_v30   ;;  %816 = vst.msk [vmem:[%s1755_s1 + $0x13c] sm:$0x4] %vm3_vm7, %v466_v30  }
  0xbc   :  { %v474_v31 = vpop.permute.xlu0 %473   ;;  %v487_v32 = vpop.permute.xlu1 %486  }
  0xbd   :  { %817 = vst.msk [vmem:[%s1755_s1 + $0xc1] ss:$-126 sm:$0x3] %vm3_vm7, %v474_v31   ;;  %818 = vst.msk [vmem:[%s1755_s1 + $0x1e1] ss:$-126 sm:$0xc] %vm3_vm7, %v474_v31  }
  0xbe   :  { %819 = vst.msk [vmem:[%s1755_s1 + $0x301] ss:$-126 sm:$0x70] %vm3_vm7, %v474_v31   ;;  %820 = vst.msk [vmem:[%s1755_s1 + $0xa8] sm:$0x80] %vm3_vm7, %v474_v31  }
  0xbf   :  { %822 = vst.msk [vmem:[%s1755_s1 + $0x12d] ss:$-252 sm:$0x3] %vm3_vm7, %v487_v32   ;;  %823 = vst.msk [vmem:[%s1755_s1 + $0x1cf] ss:$-126 sm:$0xc] %vm3_vm7, %v487_v32  }
  0xc0   :  { %824 = vst.msk [vmem:[%s1755_s1 + $0x2ef] ss:$-126 sm:$0x30] %vm3_vm7, %v487_v32   ;;  %825 = vst.msk [vmem:[%s1755_s1 + $0x40f] ss:$-126 sm:$0xc0] %vm3_vm7, %v487_v32   ;;  %v505_v33 = vpop.permute.xlu0 %504   ;;  %v513_v34 = vpop.permute.xlu1 %512  }
  0xc1   :  { %828 = vst.msk [vmem:[%s1755_s1 + $0x151] ss:$-306 sm:$0x3] %vm3_vm7, %v505_v33   ;;  %829 = vst.msk [vmem:[%s1755_s1 + $0x13d] sm:$0x4] %vm3_vm7, %v505_v33  }
  0xc2   :  { %830 = vst.msk [vmem:[%s1755_s1 + $0x20] ss:$162 sm:$0x3] %vm3_vm7, %v513_v34   ;;  %831 = vst.msk [vmem:[%s1755_s1 - $0x100] ss:$162 sm:$0xc] %vm3_vm7, %v513_v34  }
  0xc3   :  { %832 = vst.msk [vmem:[%s1755_s1 - $0x220] ss:$162 sm:$0x30] %vm3_vm7, %v513_v34   ;;  %833 = vst.msk [vmem:[%s1755_s1 + $0x380] ss:$-126 sm:$0xc0] %vm3_vm7, %v513_v34  }
  0xc4   :  { %v526_v35 = vpop.permute.xlu0 %525   ;;  %v539_v36 = vpop.permute.xlu1 %538  }
  0xc5   :  { %835 = vst.msk [vmem:[%s1755_s1 + $0x140] ss:$-18 sm:$0x3] %vm3_vm7, %v526_v35   ;;  %836 = vst.msk [vmem:[%s1755_s1 + $0x1ac] ss:$-126 sm:$0xc] %vm3_vm7, %v526_v35  }
  0xc6   :  { %837 = vst.msk [vmem:[%s1755_s1 + $0x2cc] ss:$-126 sm:$0x30] %vm3_vm7, %v526_v35   ;;  %838 = vst.msk [vmem:[%s1755_s1 + $0x3ec] ss:$-126 sm:$0xc0] %vm3_vm7, %v526_v35  }
  0xc7   :  { %840 = vst.msk [vmem:[%s1755_s1 + $0x152] ss:$-54 sm:$0x3] %vm3_vm7, %v539_v36   ;;  %841 = vst.msk [vmem:[%s1755_s1 + $0x9c] sm:$0x4] %vm3_vm7, %v539_v36  }
  0xc8   :  { %v547_v37 = vpop.permute.xlu0 %546   ;;  %v560_v38 = vpop.permute.xlu1 %559  }
  0xc9   :  { %842 = vst.msk [vmem:[%s1755_s1 + $0x21] ss:$162 sm:$0x3] %vm3_vm7, %v547_v37   ;;  %843 = vst.msk [vmem:[%s1755_s1 - $0xff] ss:$162 sm:$0xc] %vm3_vm7, %v547_v37  }
  0xca   :  { %844 = vst.msk [vmem:[%s1755_s1 - $0x21f] ss:$162 sm:$0x30] %vm3_vm7, %v547_v37   ;;  %845 = vst.msk [vmem:[%s1755_s1 + $0x381] ss:$-126 sm:$0xc0] %vm3_vm7, %v547_v37  }
  0xcb   :  { %847 = vst.msk [vmem:[%s1755_s1 + $0x141] ss:$-18 sm:$0x3] %vm3_vm7, %v560_v38   ;;  %848 = vst.msk [vmem:[%s1755_s1 + $0x1ad] ss:$-126 sm:$0xc] %vm3_vm7, %v560_v38  }
  0xcc   :  { %849 = vst.msk [vmem:[%s1755_s1 + $0x2cd] ss:$-126 sm:$0x30] %vm3_vm7, %v560_v38   ;;  %850 = vst.msk [vmem:[%s1755_s1 + $0x3ed] ss:$-126 sm:$0xc0] %vm3_vm7, %v560_v38   ;;  %v573_v39 = vpop.permute.xlu0 %572   ;;  %v582_v40 = vpop.permute.xlu1 %581  }
  0xcd   :  { %852 = vst.msk [vmem:[%s1755_s1 + $0x153] ss:$-54 sm:$0x3] %vm3_vm7, %v573_v39   ;;  %853 = vst.msk [vmem:[%s1755_s1 + $0x9d] sm:$0x4] %vm3_vm7, %v573_v39  }
  0xce   :  { %855 = vst.msk [vmem:[%s1755_s1 + $0xa0] ss:$-126 sm:$0x3] %vm3_vm7, %v582_v40   ;;  %856 = vst.msk [vmem:[%s1755_s1 + $0x1c0] ss:$-126 sm:$0xc] %vm3_vm7, %v582_v40  }
  0xcf   :  { %857 = vst.msk [vmem:[%s1755_s1 + $0x2e0] ss:$-126 sm:$0x30] %vm3_vm7, %v582_v40   ;;  %858 = vst.msk [vmem:[%s1755_s1 + $0x400] ss:$-126 sm:$0xc0] %vm3_vm7, %v582_v40  }
  0xd0   :  { %v600_v41 = vpop.permute.xlu0 %599   ;;  %v613_v42 = vpop.permute.xlu1 %612  }
  0xd1   :  { %861 = vst.msk [vmem:[%s1755_s1 + $0x142] ss:$-306 sm:$0x3] %vm3_vm7, %v600_v41   ;;  %862 = vst.msk [vmem:[%s1755_s1 + $0x1ae] ss:$-126 sm:$0xc] %vm3_vm7, %v600_v41  }
  0xd2   :  { %863 = vst.msk [vmem:[%s1755_s1 + $0x2ce] ss:$-126 sm:$0x30] %vm3_vm7, %v600_v41   ;;  %864 = vst.msk [vmem:[%s1755_s1 + $0x3ee] ss:$-126 sm:$0xc0] %vm3_vm7, %v600_v41  }
  0xd3   :  { %866 = vst.msk [vmem:[%s1755_s1 + $0x130] ss:$36 sm:$0x3] %vm3_vm7, %v613_v42   ;;  %867 = vst.msk [vmem:[%s1755_s1 + $0x11c] sm:$0x4] %vm3_vm7, %v613_v42  }
  0xd4   :  { %v622_v43 = vpop.permute.xlu0 %621   ;;  %v640_v44 = vpop.permute.xlu1 %639  }
  0xd5   :  { %869 = vst.msk [vmem:[%s1755_s1 + $0xa1] ss:$-126 sm:$0x3] %vm3_vm7, %v622_v43   ;;  %870 = vst.msk [vmem:[%s1755_s1 + $0x1c1] ss:$-126 sm:$0xc] %vm3_vm7, %v622_v43  }
  0xd6   :  { %871 = vst.msk [vmem:[%s1755_s1 + $0x2e1] ss:$-126 sm:$0x30] %vm3_vm7, %v622_v43   ;;  %872 = vst.msk [vmem:[%s1755_s1 + $0x401] ss:$-126 sm:$0xc0] %vm3_vm7, %v622_v43  }
  0xd7   :  { %875 = vst.msk [vmem:[%s1755_s1 + $0x143] ss:$-306 sm:$0x3] %vm3_vm7, %v640_v44   ;;  %876 = vst.msk [vmem:[%s1755_s1 + $0x1af] ss:$-126 sm:$0xc] %vm3_vm7, %v640_v44  }
  0xd8   :  { %877 = vst.msk [vmem:[%s1755_s1 + $0x2cf] ss:$-126 sm:$0x30] %vm3_vm7, %v640_v44   ;;  %878 = vst.msk [vmem:[%s1755_s1 + $0x3ef] ss:$-126 sm:$0xc0] %vm3_vm7, %v640_v44   ;;  %v653_v45 = vpop.permute.xlu0 %652  }
  0xd9   :  { %880 = vst.msk [vmem:[%s1755_s1 + $0x131] ss:$36 sm:$0x3] %vm3_vm7, %v653_v45   ;;  %881 = vst.msk [vmem:[%s1755_s1 + $0x11d] sm:$0x4] %vm3_vm7, %v653_v45  }

// kernel: simple_classifier_forward.1
= control target key start
LH: loop header
LB: loop body
LE: loop exit
PB: predicated region body
PF: predicated region fallthrough
CT: control target
= control target key end

     0   :  { %11 = vsyncpa [#allocation4], 0  ;;  %s4394_s0 = inlined_call_operand.vmem [shape: f32[2,342,4], index: 0, kind: input, shape index: {}]   ;;  %s4395_s1 = inlined_call_operand.vmem [shape: f32[342,1], index: 1, kind: input, shape index: {}]   ;;  %s4396_s2 = inlined_call_operand.vmem [shape: bf16[9,4,128], index: 2, kind: input, shape index: {}]   ;;  %s4397_s3 = inlined_call_operand.vmem [shape: f32[1,128], index: 3, kind: input, shape index: {}]   ;;  %s4398_s4 = inlined_call_operand.vmem [shape: bf16[128,128], index: 4, kind: input, shape index: {}]   ;;  %s4399_s5 = inlined_call_operand.vmem [shape: f32[1,128], index: 5, kind: input, shape index: {}]   ;;  %s4400_s6 = inlined_call_operand.hbm [shape: f32[2,1,128], index: 6, kind: output, shape index: {}]  }
   0x1   :  { %13 = vsyncpa [#allocation4 + $0x1], 0  ;;  %s3449_s21 = smov 0   ;;  %s3451_s22 = smov 0  }
   0x2   :  { %s3453_s23 = smov 0   ;;  %s3455_s24 = smov 0  }
   0x3   :  { %s3457_s25 = smov 0   ;;  %s3459_s26 = smov 0  }
   0x4   :  { %s3461_s27 = smov 0   ;;  %s3463_s28 = smov 0  }
   0x5 LB: > { %s2419_s29 = sadd.s32 4294967295, %s3405_s28   ;;  %s2420_s30 = sadd.s32 4294967294, %s3405_s28   ;;  %s3405_s28 = sphi %s3463_s28, %s19_s28   ;;  %s3401_s27 = sphi %s3461_s27, %s4409_s27   ;;  %s3397_s26 = sphi %s3459_s26, %s4408_s26   ;;  %s3393_s25 = sphi %s3457_s25, %s4407_s25   ;;  %s3389_s24 = sphi %s3455_s24, %s4406_s24   ;;  %s3385_s23 = sphi %s3453_s23, %s4405_s23   ;;  %s3381_s22 = sphi %s3451_s22, %s4404_s22   ;;  %s3377_s21 = sphi %s3449_s21, %s4403_s21  }
   0x6   : > { %s28_s7 = sadd.s32 1, %s3397_s26  ;;  %s31_s8 = sadd.s32 1, %s3401_s27 }
   0x7   : > { %p29_p0 = scmp.ge.s32.totalorder %s28_s7, 2  ;;  %p179_p1 = scmp.ne.s32.totalorder %s3385_s23, %s3381_s22 }
   0x8   : > { %p180_p2 = scmp.eq.s32.totalorder %s2419_s29, 3  ;;  %p185_p4 = scmp.ne.s32.totalorder %s3381_s22, %s3377_s21 }
   0x9   : > { %s4411_s7 = smov (%p29_p0, %s28_s7), 0  ;;  %s4413_s8 = smov (!%p29_p0, %s31_s8), %s3401_s27 }
   0xa   : > { %p3498_p3 = por %p180_p2, %p179_p1  ;;  %p33_p5 = scmp.ge.s32.totalorder %s4413_s8, 2 }
   0xb   : > { %p186_p6 = scmp.eq.s32.totalorder %s2420_s30, 3  ;;  %p2423_p7 = scmp.ge.s32.totalorder %s3405_s28, 1 }
   0xc   : > { %p227_p8 = scmp.lt.s32.totalorder %s3405_s28, 5  ;;  %s4415_s8 = smov (%p33_p5, %s4413_s8), 0 }
   0xd   : > { %p3508_p9 = por %p186_p6, %p185_p4  ;;  %s166_s11 = ssub.s32 %s3401_s27, %s4415_s8 }
   0xe   : > { %p228_p10 = pnand %p2423_p7, %p227_p8  ;;  %s169_s12 = sadd.s32 1, %s3385_s23 }
   0xf   : > { %p167_p11 = scmp.eq.s32.totalorder %s166_s11, 0  ;;  %s254_s14 = sand.u32 (!%p228_p10), 1, %s3381_s22  }
  0x10   : > { %231 = sbr.rel (%p228_p10) target bundleno = 1190 (0x4a6), region = 44  ;;  %p256_p12 = scmp.lt.s32.totalorder (!%p228_p10), %s3393_s25, 1 }
  0x11   : > { %s3516_s13 = scalar_select %p167_p11, %s3385_s23, %s169_s12  }
  0x12   : > { %s3526_s20 = scalar_lea.vmem (!%p228_p10), [#allocation3], %s254_s14  ;;  %p2425_p13 = scmp.ne.s32.totalorder (!%p228_p10), %s3389_s24, 0 }
  0x17   : > { %s257_s15 = scalar_select %p256_p12, %s3393_s25, 1 }
  0x18   : > { %265 = sbr.rel (%p2425_p13) target bundleno = 31 (0x1f), region = 48  ;;  %v3407_v0 = vmov (!%p2425_p13), 0.0  }
  0x19   : > { %s3147_s16 = smul.u32 344, %s257_s15  ;;  %266 = vst [vmem:[#allocation2] sm:$0x1] (!%p2425_p13), %v3407_v0 }
  0x1b   : > { %s260_s19 = scalar_lea.vmem %s4394_s0, %s3147_s16 }
  0x1f PF: > { %v2444_v1 = vld [vmem:[%s4396_s2 + $0x2] sm:$0x3]  ;;  %vm356_vm0 = vcmask 1041408   ;;  %s267_s11 = smul.u32 144, %s3389_s24  ;;  %v3408_v2 = vmov 0.0   ;;  %vm3409_vm1 = vmmov 0  }
  0x20   : > { %2783 = vmatprep.subr.bf16.mxu0 %v3408_v2  ;;  %3145 = vmatprep.subr.bf16.mxu1 %v3408_v2  ;;  %v358_v3 = vsel %vm356_vm0, %v2444_v1, 0  ;;  %v2481_v4 = vld [vmem:[%s4396_s2 + $0x4] sm:$0x3]  ;;  %v296_v5 = vld [vmem:[%s4396_s2] sm:$0x3]  ;;  %vm328_vm2 = vcmask 31744  }
  0x21   : > { %2784 = vmatpush3.bf16.msra.mxu0 %v358_v3  ;;  %3146 = vmatpush3.bf16.msra.mxu1 %v358_v3  ;;  %s3541_s16 = scalar_lea.vmem %s260_s19, %s267_s11  ;;  %v659_v11 = vsel %vm356_vm0, %v2481_v4, 0  ;;  %v493_v13 = vsel %vm356_vm0, %v296_v5, 0  ;;  %v2511_v37 = vld [vmem:[%s4396_s2 + $0x6] sm:$0x3]  ;;  %v2541_v44 = vld [vmem:[%s4396_s2 + $0x8] sm:$0x3]  ;;  %s3929_s19 = scalar_lea.vmem %s4395_s1, %s267_s11 }
  0x22   : > { %2785 = vmatprep.mubr.msk.bf16.mxu0 %vm3409_vm1, %v3408_v2  ;;  %2805 = vmatprep.mubr.msk.bf16.mxu1 %vm3409_vm1, %v3408_v2  ;;  %v2426_v6 = vld [vmem:[%s3541_s16 + $0x1] sm:$0xff]  ;;  %v2427_v7 = vld [vmem:[%s3541_s16 + $0x9] sm:$0xff]  ;;  %v2436_v8 = vld [vmem:[%s3541_s16 + $0x51] sm:$0xff]  ;;  %v845_v39 = vsel %vm356_vm0, %v2511_v37, 0  ;;  %v1029_v47 = vsel %vm356_vm0, %v2541_v44, 0  ;;  %p2672_p0 = scmp.ne.s32.totalorder %s3389_s24, 1 }
  0x23   : > { %2859 = vmatprep.subr.bf16.mxu0 %v3408_v2  ;;  %v317_v9 = vpack.c.bf16 %v2427_v7, %v2426_v6  ;;  %v2437_v10 = vld [vmem:[%s3541_s16 + $0x59] sm:$0xff]  ;;  %2821 = vmatprep.subr.bf16.mxu1 %v3408_v2  ;;  %v2428_v14 = vld [vmem:[%s3541_s16 + $0x11] sm:$0xff]  ;;  %v2438_v16 = vld [vmem:[%s3541_s16 + $0x61] sm:$0xff]  ;;  %vm3412_vm3 = vmmov (!%p2672_p0), 0   ;;  %vm2289_vm4 = vcmask (!%p2672_p0), 1040384  }
  0x24   : > { %v322_v12 = vpack.c.bf16 %v2437_v10, %v2436_v8  ;;  %v2429_v15 = vld [vmem:[%s3541_s16 + $0x19] sm:$0xff]  ;;  %v2439_v17 = vld [vmem:[%s3541_s16 + $0x69] sm:$0xff]  ;;  %v2430_v20 = vld [vmem:[%s3541_s16 + $0x21] sm:$0xff] }
  0x25   : > { %2786 = vmatmul.mubr.msk.bf16.vlgmr.msra.gmra.mrb[0].mxu0 %vm328_vm2, %v317_v9  ;;  %v318_v18 = vpack.c.bf16 %v2429_v15, %v2428_v14  ;;  %v323_v19 = vpack.c.bf16 %v2439_v17, %v2438_v16  ;;  %v2431_v21 = vld [vmem:[%s3541_s16 + $0x29] sm:$0xff]  ;;  %v2440_v22 = vld [vmem:[%s3541_s16 + $0x71] sm:$0xff]  ;;  %v2441_v23 = vld [vmem:[%s3541_s16 + $0x79] sm:$0xff] }
  0x26   : > { %2806 = vmatmul.mubr.msk.bf16.vlgmr.msra.gmra.mrb[0].mxu1 %vm328_vm2, %v322_v12  ;;  %2860 = vmatpush3.bf16.msra.mxu0 %v659_v11  ;;  %v319_v24 = vpack.c.bf16 %v2431_v21, %v2430_v20  ;;  %v324_v25 = vpack.c.bf16 %v2441_v23, %v2440_v22  ;;  %v2432_v26 = vld [vmem:[%s3541_s16 + $0x31] sm:$0xff]  ;;  %v2433_v27 = vld [vmem:[%s3541_s16 + $0x39] sm:$0xff]  ;;  %v2442_v28 = vld [vmem:[%s3541_s16 + $0x81] sm:$0xff] }
  0x27   : > { %2822 = vmatpush3.bf16.msra.mxu1 %v493_v13  ;;  %2789 = vmatprep.mubr.msk.bf16.mxu0 %vm3409_vm1, %v3408_v2  ;;  %v2443_v29 = vld [vmem:[%s3541_s16 + $0x89] sm:$0xff]  ;;  %v320_v30 = vpack.c.bf16 %v2433_v27, %v2432_v26  ;;  %v2434_v32 = vld [vmem:[%s3541_s16 + $0x41] sm:$0xff]  ;;  %v272_v43 = vld [vmem:[%s3541_s16 + $0x18] sm:$0xff] }
  0x28   : > { %2809 = vmatprep.mubr.msk.bf16.mxu1 %vm3409_vm1, %v3408_v2  ;;  %2897 = vmatprep.subr.bf16.mxu1 %v3408_v2  ;;  %v325_v31 = vpack.c.bf16 %v2443_v29, %v2442_v28  ;;  %v2435_v33 = vld [vmem:[%s3541_s16 + $0x49] sm:$0xff]  ;;  %v269_v34 = vld [vmem:[%s3541_s16] sm:$0xff]  ;;  %v2465_v48 = vld [vmem:[%s3541_s16 + $0x12] sm:$0xff] }
  0x29   : > { %2935 = vmatprep.subr.bf16.mxu0 %v3408_v2  ;;  %v270_v35 = vld [vmem:[%s3541_s16 + $0x8] sm:$0xff]  ;;  %v321_v36 = vpack.c.bf16 %v2435_v33, %v2434_v32  ;;  %v271_v42 = vld [vmem:[%s3541_s16 + $0x10] sm:$0xff]  ;;  %v2466_v49 = vld [vmem:[%s3541_s16 + $0x1a] sm:$0xff] }
  0x2a   : > { %v287_v38 = vpack.c.bf16 %v270_v35, %v269_v34  ;;  %v2463_v40 = vld [vmem:[%s3541_s16 + $0x2] sm:$0xff]  ;;  %v2464_v41 = vld [vmem:[%s3541_s16 + $0xa] sm:$0xff]  ;;  %v288_v46 = vpack.c.bf16 %v272_v43, %v271_v42  ;;  %v3630_v52 = vpack.c.bf16 %v2466_v49, %v2465_v48  ;;  %v276_v57 = vld [vmem:[%s3541_s16 + $0x38] sm:$0xff] }
  0x2b   : > { %v620_v45 = vpack.c.bf16 %v2464_v41, %v2463_v40  ;;  %v273_v50 = vld [vmem:[%s3541_s16 + $0x20] sm:$0xff]  ;;  %v274_v51 = vld [vmem:[%s3541_s16 + $0x28] sm:$0xff]  ;;  %v275_v56 = vld [vmem:[%s3541_s16 + $0x30] sm:$0xff] }
  0x2c   : > { %v289_v53 = vpack.c.bf16 %v274_v51, %v273_v50  ;;  %v2467_v54 = vld [vmem:[%s3541_s16 + $0x22] sm:$0xff]  ;;  %v2468_v55 = vld [vmem:[%s3541_s16 + $0x2a] sm:$0xff]  ;;  %v290_v59 = vpack.c.bf16 %v276_v57, %v275_v56  ;;  %v2469_v60 = vld [vmem:[%s3541_s16 + $0x32] sm:$0xff] }
  0x2d   : > { %2790 = vmatmul.mubr.msk.bf16.gmra.mrb[4].mxu0 %vm328_vm2, %v318_v18  ;;  %v3643_v58 = vpack.c.bf16 %v2468_v55, %v2467_v54  ;;  %v2470_v61 = vld [vmem:[%s3541_s16 + $0x3a] sm:$0xff]  ;;  %v278_v63 = vld [vmem:[%s3541_s16 + $0x48] sm:$0xff]  ;;  %v279_v5 = vld [vmem:[%s3541_s16 + $0x50] sm:$0xff] }
  0x2e   : > { %2810 = vmatmul.mubr.msk.bf16.gmra.mrb[4].mxu1 %vm328_vm2, %v323_v19  ;;  %2793 = vmatprep.mubr.msk.bf16.mxu0 %vm3409_vm1, %v3408_v2  ;;  %v277_v62 = vld [vmem:[%s3541_s16 + $0x40] sm:$0xff]  ;;  %v3656_v0 = vpack.c.bf16 %v2470_v61, %v2469_v60  ;;  %v2472_v4 = vld [vmem:[%s3541_s16 + $0x4a] sm:$0xff]  ;;  %v280_v6 = vld [vmem:[%s3541_s16 + $0x58] sm:$0xff] }
  0x2f   : > { %2813 = vmatprep.mubr.msk.bf16.mxu1 %vm3409_vm1, %v3408_v2  ;;  %v291_v1 = vpack.c.bf16 %v278_v63, %v277_v62  ;;  %v2471_v3 = vld [vmem:[%s3541_s16 + $0x42] sm:$0xff]  ;;  %v292_v8 = vpack.c.bf16 %v280_v6, %v279_v5  ;;  %v2473_v9 = vld [vmem:[%s3541_s16 + $0x52] sm:$0xff]  ;;  %v2474_v10 = vld [vmem:[%s3541_s16 + $0x5a] sm:$0xff] }
  0x30   : > { %v3669_v7 = vpack.c.bf16 %v2472_v4, %v2471_v3  ;;  %v281_v11 = vld [vmem:[%s3541_s16 + $0x60] sm:$0xff]  ;;  %v282_v12 = vld [vmem:[%s3541_s16 + $0x68] sm:$0xff]  ;;  %v3682_v13 = vpack.c.bf16 %v2474_v10, %v2473_v9  ;;  %v283_v17 = vld [vmem:[%s3541_s16 + $0x70] sm:$0xff] }
  0x31   : > { %v293_v14 = vpack.c.bf16 %v282_v12, %v281_v11  ;;  %v2475_v15 = vld [vmem:[%s3541_s16 + $0x62] sm:$0xff]  ;;  %v2476_v16 = vld [vmem:[%s3541_s16 + $0x6a] sm:$0xff]  ;;  %v284_v18 = vld [vmem:[%s3541_s16 + $0x78] sm:$0xff] }
  0x32   : > { %v3695_v19 = vpack.c.bf16 %v2476_v16, %v2475_v15  ;;  %v294_v20 = vpack.c.bf16 %v284_v18, %v283_v17  ;;  %v2477_v21 = vld [vmem:[%s3541_s16 + $0x72] sm:$0xff]  ;;  %v2478_v22 = vld [vmem:[%s3541_s16 + $0x7a] sm:$0xff]  ;;  %v2479_v27 = vld [vmem:[%s3541_s16 + $0x82] sm:$0xff] }
  0x33   : > { %v285_v23 = vld [vmem:[%s3541_s16 + $0x80] sm:$0xff]  ;;  %v2480_v28 = vld [vmem:[%s3541_s16 + $0x8a] sm:$0xff]  ;;  %v2523_v32 = vld [vmem:[%s3541_s16 + $0x13] sm:$0xff] }
  0x34   : > { %v628_v29 = vpack.c.bf16 %v2480_v28, %v2479_v27  ;;  %v2524_v33 = vld [vmem:[%s3541_s16 + $0x1b] sm:$0xff]  ;;  %v2601_v34 = vld [vmem:[%s4396_s2 + $0xc] sm:$0x3]  ;;  %v2525_v37 = vld [vmem:[%s3541_s16 + $0x23] sm:$0xff] }
  0x35   : > { %2794 = vmatmul.mubr.msk.bf16.gmra.mrb[8].mxu0 %vm328_vm2, %v319_v24  ;;  %v286_v24 = vld [vmem:[%s3541_s16 + $0x88] sm:$0xff]  ;;  %v990_v35 = vpack.c.bf16 %v2524_v33, %v2523_v32  ;;  %v2527_v40 = vld [vmem:[%s3541_s16 + $0x33] sm:$0xff]  ;;  %v2528_v41 = vld [vmem:[%s3541_s16 + $0x3b] sm:$0xff] }
  0x36   : > { %2814 = vmatmul.mubr.msk.bf16.gmra.mrb[8].mxu1 %vm328_vm2, %v324_v25  ;;  %2797 = vmatprep.mubr.msk.bf16.mxu0 %vm3409_vm1, %v3408_v2  ;;  %v627_v25 = vpack.c.bf16 %v2478_v22, %v2477_v21  ;;  %v295_v26 = vpack.c.bf16 %v286_v24, %v285_v23  ;;  %v992_v42 = vpack.c.bf16 %v2528_v41, %v2527_v40  ;;  %v2529_v43 = vld [vmem:[%s3541_s16 + $0x43] sm:$0xff]  ;;  %v2530_v44 = vld [vmem:[%s3541_s16 + $0x4b] sm:$0xff]  ;;  %v2539_v61 = vld [vmem:[%s3541_s16 + $0x93] sm:$0xff] }
  0x37   : > { %2817 = vmatprep.mubr.msk.bf16.mxu1 %vm3409_vm1, %v3408_v2  ;;  %v2533_v49 = vld [vmem:[%s3541_s16 + $0x63] sm:$0xff]  ;;  %v2534_v50 = vld [vmem:[%s3541_s16 + $0x6b] sm:$0xff]  ;;  %v2540_v62 = vld [vmem:[%s3541_s16 + $0x9b] sm:$0xff] }
  0x38   : > { %v995_v51 = vpack.c.bf16 %v2534_v50, %v2533_v49  ;;  %v2537_v55 = vld [vmem:[%s3541_s16 + $0x83] sm:$0xff]  ;;  %v2538_v56 = vld [vmem:[%s3541_s16 + $0x8b] sm:$0xff]  ;;  %v2553_v63 = vld [vmem:[%s3541_s16 + $0x14] sm:$0xff] }
  0x39   : > { %v2509_v57 = vld [vmem:[%s3541_s16 + $0x92] sm:$0xff]  ;;  %v2631_v3 = vld [vmem:[%s4396_s2 + $0xe] sm:$0x3]  ;;  %v2555_v6 = vld [vmem:[%s3541_s16 + $0x24] sm:$0xff] }
  0x3a   : > { %v1582_v5 = vsel %vm356_vm0, %v2631_v3, 0  ;;  %v2557_v11 = vld [vmem:[%s3541_s16 + $0x34] sm:$0xff]  ;;  %v2558_v12 = vld [vmem:[%s3541_s16 + $0x3c] sm:$0xff]  ;;  %v2560_v15 = vld [vmem:[%s3541_s16 + $0x4c] sm:$0xff] }
  0x3b   : > { %v2561_v17 = vld [vmem:[%s3541_s16 + $0x54] sm:$0xff]  ;;  %v2562_v18 = vld [vmem:[%s3541_s16 + $0x5c] sm:$0xff]  ;;  %v2564_v21 = vld [vmem:[%s3541_s16 + $0x6c] sm:$0xff] }
  0x3c   : > { %v2566_v32 = vld [vmem:[%s3541_s16 + $0x7c] sm:$0xff]  ;;  %v2600_v3 = vld [vmem:[%s3541_s16 + $0xac] sm:$0xff] }
  0x3d   : > { %2798 = vmatmul.mubr.msk.bf16.gmra.mrb[12].mxu0 %vm328_vm2, %v320_v30  ;;  %v2571_v30 = vld [vmem:[%s4396_s2 + $0xa] sm:$0x3] }
  0x3e   : > { %2818 = vmatmul.mubr.msk.bf16.gmra.mrb[12].mxu1 %vm328_vm2, %v325_v31  ;;  %2801 = vmatprep.mubr.msk.bf16.mxu0 %vm3409_vm1, %v3408_v2  ;;  %v1213_v31 = vsel %vm356_vm0, %v2571_v30, 0 }
  0x3f   : > { %2823 = vmatprep.mubr.msk.bf16.mxu1 %vm3409_vm1, %v3408_v2 }
  0x45   : > { %2802 = vmatmul.mubr.msk.bf16.gmra.mrb[16].mxu0 %vm328_vm2, %v321_v36  ;;  %v1398_v36 = vsel %vm356_vm0, %v2601_v34, 0 }
  0x46   : > { %2824 = vmatmul.mubr.msk.bf16.vlgmr.msra.gmra.mrb[16].mxu1 %vm328_vm2, %v287_v38  ;;  %2861 = vmatprep.mubr.msk.bf16.mxu0 %vm3409_vm1, %v3408_v2  ;;  %v2526_v38 = vld [vmem:[%s3541_s16 + $0x2b] sm:$0xff] }
  0x47   : > { %2898 = vmatpush3.bf16.msra.mxu1 %v845_v39  ;;  %2827 = vmatprep.mubr.msk.bf16.mxu1 %vm3409_vm1, %v3408_v2  ;;  %v991_v39 = vpack.c.bf16 %v2526_v38, %v2525_v37 }
  0x48   : > { %2973 = vmatprep.subr.bf16.mxu1 %v3408_v2 }
  0x4d   : > { %2862 = vmatmul.mubr.msk.bf16.vlgmr.msra.gmra.mrb[20].mxu0 %vm328_vm2, %v620_v45  ;;  %v993_v45 = vpack.c.bf16 %v2530_v44, %v2529_v43  ;;  %v2568_v43 = vld [vmem:[%s3541_s16 + $0x8c] sm:$0xff] }
  0x4e   : > { %2828 = vmatmul.mubr.msk.bf16.gmra.mrb[20].mxu1 %vm328_vm2, %v288_v46  ;;  %2936 = vmatpush3.bf16.msra.mxu0 %v1029_v47  ;;  %v2531_v46 = vld [vmem:[%s3541_s16 + $0x53] sm:$0xff]  ;;  %v2532_v47 = vld [vmem:[%s3541_s16 + $0x5b] sm:$0xff] }
  0x4f   : > { %2831 = vmatprep.mubr.msk.bf16.mxu1 %vm3409_vm1, %v3408_v2  ;;  %2865 = vmatprep.mubr.msk.bf16.mxu0 %vm3409_vm1, %v3408_v2  ;;  %v994_v48 = vpack.c.bf16 %v2532_v47, %v2531_v46 }
  0x50   : > { %3011 = vmatprep.subr.bf16.mxu0 %v3408_v2 }
  0x55   : > { %2866 = vmatmul.mubr.msk.bf16.gmra.mrb[24].mxu0 %vm328_vm2, %v3630_v52 }
  0x56   : > { %2832 = vmatmul.mubr.msk.bf16.gmra.mrb[24].mxu1 %vm328_vm2, %v289_v53  ;;  %2869 = vmatprep.mubr.msk.bf16.mxu0 %vm3409_vm1, %v3408_v2  ;;  %v2536_v53 = vld [vmem:[%s3541_s16 + $0x7b] sm:$0xff] }
  0x57   : > { %2835 = vmatprep.mubr.msk.bf16.mxu1 %vm3409_vm1, %v3408_v2 }
  0x5d   : > { %2870 = vmatmul.mubr.msk.bf16.gmra.mrb[28].mxu0 %vm328_vm2, %v3643_v58 }
  0x5e   : > { %2836 = vmatmul.mubr.msk.bf16.gmra.mrb[28].mxu1 %vm328_vm2, %v290_v59  ;;  %2873 = vmatprep.mubr.msk.bf16.mxu0 %vm3409_vm1, %v3408_v2  ;;  %v997_v59 = vpack.c.bf16 %v2538_v56, %v2537_v55 }
  0x5f   : > { %2839 = vmatprep.mubr.msk.bf16.mxu1 %vm3409_vm1, %v3408_v2 }
  0x65   : > { %2874 = vmatmul.mubr.msk.bf16.gmra.mrb[32].mxu0 %vm328_vm2, %v3656_v0 }
  0x66   : > { %2840 = vmatmul.mubr.msk.bf16.gmra.mrb[32].mxu1 %vm328_vm2, %v291_v1  ;;  %2877 = vmatprep.mubr.msk.bf16.mxu0 %vm3409_vm1, %v3408_v2  ;;  %v998_v1 = vpack.c.bf16 %v2540_v62, %v2539_v61 }
  0x67   : > { %2843 = vmatprep.mubr.msk.bf16.mxu1 %vm3409_vm1, %v3408_v2 }
  0x6d   : > { %2878 = vmatmul.mubr.msk.bf16.gmra.mrb[36].mxu0 %vm328_vm2, %v3669_v7 }
  0x6e   : > { %2844 = vmatmul.mubr.msk.bf16.gmra.mrb[36].mxu1 %vm328_vm2, %v292_v8  ;;  %2881 = vmatprep.mubr.msk.bf16.mxu0 %vm3409_vm1, %v3408_v2  ;;  %v2661_v8 = vld [vmem:[%s4396_s2 + $0x10] sm:$0x3] }
  0x6f   : > { %2847 = vmatprep.mubr.msk.bf16.mxu1 %vm3409_vm1, %v3408_v2  ;;  %v1766_v10 = vsel %vm356_vm0, %v2661_v8, 0 }
  0x75   : > { %2882 = vmatmul.mubr.msk.bf16.gmra.mrb[40].mxu0 %vm328_vm2, %v3682_v13 }
  0x76   : > { %2848 = vmatmul.mubr.msk.bf16.gmra.mrb[40].mxu1 %vm328_vm2, %v293_v14  ;;  %2885 = vmatprep.mubr.msk.bf16.mxu0 %vm3409_vm1, %v3408_v2  ;;  %v2559_v14 = vld [vmem:[%s3541_s16 + $0x44] sm:$0xff] }
  0x77   : > { %2851 = vmatprep.mubr.msk.bf16.mxu1 %vm3409_vm1, %v3408_v2  ;;  %v1177_v16 = vpack.c.bf16 %v2560_v15, %v2559_v14 }
  0x7d   : > { %2886 = vmatmul.mubr.msk.bf16.gmra.mrb[44].mxu0 %vm328_vm2, %v3695_v19 }
  0x7e   : > { %2852 = vmatmul.mubr.msk.bf16.gmra.mrb[44].mxu1 %vm328_vm2, %v294_v20  ;;  %2889 = vmatprep.mubr.msk.bf16.mxu0 %vm3409_vm1, %v3408_v2  ;;  %v2563_v20 = vld [vmem:[%s3541_s16 + $0x64] sm:$0xff] }
  0x7f   : > { %2855 = vmatprep.mubr.msk.bf16.mxu1 %vm3409_vm1, %v3408_v2 }
  0x85   : > { %2890 = vmatmul.mubr.msk.bf16.gmra.mrb[48].mxu0 %vm328_vm2, %v627_v25 }
  0x86   : > { %2856 = vmatmul.mubr.msk.bf16.gmra.mrb[48].mxu1 %vm328_vm2, %v295_v26  ;;  %2893 = vmatprep.mubr.msk.bf16.mxu0 %vm3409_vm1, %v3408_v2 }
  0x87   : > { %2899 = vmatprep.mubr.msk.bf16.mxu1 %vm3409_vm1, %v3408_v2 }
  0x8d   : > { %2894 = vmatmul.mubr.msk.bf16.gmra.mrb[52].mxu0 %vm328_vm2, %v628_v29 }
  0x8e   : > { %2900 = vmatmul.mubr.msk.bf16.vlgmr.msra.gmra.mrb[52].mxu1 %vm328_vm2, %v3630_v52  ;;  %2937 = vmatprep.mubr.msk.bf16.mxu0 %vm3409_vm1, %v3408_v2  ;;  %v2535_v52 = vld [vmem:[%s3541_s16 + $0x73] sm:$0xff] }
  0x8f   : > { %2974 = vmatpush3.bf16.msra.mxu1 %v1213_v31  ;;  %2903 = vmatprep.mubr.msk.bf16.mxu1 %vm3409_vm1, %v3408_v2  ;;  %v996_v54 = vpack.c.bf16 %v2536_v53, %v2535_v52  ;;  %v2565_v31 = vld [vmem:[%s3541_s16 + $0x74] sm:$0xff] }
  0x90   : > { %3049 = vmatprep.subr.bf16.mxu1 %v3408_v2  ;;  %v2569_v53 = vld [vmem:[%s3541_s16 + $0x94] sm:$0xff] }
  0x95   : > { %2938 = vmatmul.mubr.msk.bf16.vlgmr.msra.gmra.mrb[56].mxu0 %vm328_vm2, %v990_v35 }
  0x96   : > { %2904 = vmatmul.mubr.msk.bf16.gmra.mrb[56].mxu1 %vm328_vm2, %v3643_v58  ;;  %3012 = vmatpush3.bf16.msra.mxu0 %v1398_v36  ;;  %v2510_v58 = vld [vmem:[%s3541_s16 + $0x9a] sm:$0xff]  ;;  %v1180_v36 = vpack.c.bf16 %v2566_v32, %v2565_v31 }
  0x97   : > { %2907 = vmatprep.mubr.msk.bf16.mxu1 %vm3409_vm1, %v3408_v2  ;;  %2941 = vmatprep.mubr.msk.bf16.mxu0 %vm3409_vm1, %v3408_v2  ;;  %v814_v60 = vpack.c.bf16 %v2510_v58, %v2509_v57  ;;  %v2028_v32 = vld [vmem:[%s3929_s19 + $0x18] sm:$0xff] }
  0x98   : > { %3087 = vmatprep.subr.bf16.mxu0 %v3408_v2 }
  0x9d   : > { %2942 = vmatmul.mubr.msk.bf16.gmra.mrb[60].mxu0 %vm328_vm2, %v991_v39 }
  0x9e   : > { %2908 = vmatmul.mubr.msk.bf16.gmra.mrb[60].mxu1 %vm328_vm2, %v3656_v0  ;;  %2945 = vmatprep.mubr.msk.bf16.mxu0 %vm3409_vm1, %v3408_v2  ;;  %v2554_v0 = vld [vmem:[%s3541_s16 + $0x1c] sm:$0xff] }
  0x9f   : > { %2911 = vmatprep.mubr.msk.bf16.mxu1 %vm3409_vm1, %v3408_v2  ;;  %v1174_v4 = vpack.c.bf16 %v2554_v0, %v2553_v63  ;;  %v3410_v0 = vmov 0  }
  0xa0   : > { %3225 = vset.pattern.permute.xlu0 %v3410_v0  ;;  %3226 = vset.pattern.permute.xlu1 %v3410_v0  ;;  %v2032_v0 = vld [vmem:[%s3929_s19 + $0x38] sm:$0xff] }
  0xa5   : > { %2946 = vmatmul.mubr.msk.bf16.gmra.mrb[64].mxu0 %vm328_vm2, %v992_v42  ;;  %v2567_v42 = vld [vmem:[%s3541_s16 + $0x84] sm:$0xff] }
  0xa6   : > { %2912 = vmatmul.mubr.msk.bf16.gmra.mrb[64].mxu1 %vm328_vm2, %v3669_v7  ;;  %2949 = vmatprep.mubr.msk.bf16.mxu0 %vm3409_vm1, %v3408_v2  ;;  %v2556_v7 = vld [vmem:[%s3541_s16 + $0x2c] sm:$0xff]  ;;  %v1181_v47 = vpack.c.bf16 %v2568_v43, %v2567_v42 }
  0xa7   : > { %2915 = vmatprep.mubr.msk.bf16.mxu1 %vm3409_vm1, %v3408_v2  ;;  %v1175_v9 = vpack.c.bf16 %v2556_v7, %v2555_v6 }
  0xad   : > { %2950 = vmatmul.mubr.msk.bf16.gmra.mrb[68].mxu0 %vm328_vm2, %v993_v45 }
  0xae   : > { %2916 = vmatmul.mubr.msk.bf16.gmra.mrb[68].mxu1 %vm328_vm2, %v3682_v13  ;;  %2953 = vmatprep.mubr.msk.bf16.mxu0 %vm3409_vm1, %v3408_v2  ;;  %v1176_v13 = vpack.c.bf16 %v2558_v12, %v2557_v11 }
  0xaf   : > { %2919 = vmatprep.mubr.msk.bf16.mxu1 %vm3409_vm1, %v3408_v2 }
  0xb5   : > { %2954 = vmatmul.mubr.msk.bf16.gmra.mrb[72].mxu0 %vm328_vm2, %v994_v48 }
  0xb6   : > { %2920 = vmatmul.mubr.msk.bf16.gmra.mrb[72].mxu1 %vm328_vm2, %v3695_v19  ;;  %2957 = vmatprep.mubr.msk.bf16.mxu0 %vm3409_vm1, %v3408_v2  ;;  %v1178_v19 = vpack.c.bf16 %v2562_v18, %v2561_v17 }
  0xb7   : > { %2923 = vmatprep.mubr.msk.bf16.mxu1 %vm3409_vm1, %v3408_v2 }
  0xbd   : > { %2958 = vmatmul.mubr.msk.bf16.gmra.mrb[76].mxu0 %vm328_vm2, %v995_v51 }
  0xbe   : > { %2924 = vmatmul.mubr.msk.bf16.gmra.mrb[76].mxu1 %vm328_vm2, %v627_v25  ;;  %2961 = vmatprep.mubr.msk.bf16.mxu0 %vm3409_vm1, %v3408_v2  ;;  %v1179_v25 = vpack.c.bf16 %v2564_v21, %v2563_v20  ;;  %v2026_v20 = vld [vmem:[%s3929_s19 + $0x8] sm:$0xff] }
  0xbf   : > { %2927 = vmatprep.mubr.msk.bf16.mxu1 %vm3409_vm1, %v3408_v2  ;;  %v2643_v21 = vld [vmem:[%s3541_s16 + $0x26] sm:$0xff] }
  0xc5   : > { %2962 = vmatmul.mubr.msk.bf16.gmra.mrb[80].mxu0 %vm328_vm2, %v996_v54  ;;  %v2570_v54 = vld [vmem:[%s3541_s16 + $0x9c] sm:$0xff] }
  0xc6   : > { %2928 = vmatmul.mubr.msk.bf16.gmra.mrb[80].mxu1 %vm328_vm2, %v628_v29  ;;  %2965 = vmatprep.mubr.msk.bf16.mxu0 %vm3409_vm1, %v3408_v2  ;;  %v1182_v58 = vpack.c.bf16 %v2570_v54, %v2569_v53  ;;  %v2646_v53 = vld [vmem:[%s3541_s16 + $0x3e] sm:$0xff] }
  0xc7   : > { %2931 = vmatprep.mubr.msk.bf16.mxu1 %vm3409_vm1, %v3408_v2  ;;  %v2617_v54 = vld [vmem:[%s3541_s16 + $0x45] sm:$0xff] }
  0xcd   : > { %2966 = vmatmul.mubr.msk.bf16.gmra.mrb[84].mxu0 %vm328_vm2, %v997_v59 }
  0xce   : > { %2932 = vmatmul.mubr.msk.bf16.gmra.mrb[84].mxu1 %vm328_vm2, %v814_v60  ;;  %2969 = vmatprep.mubr.msk.bf16.mxu0 %vm3409_vm1, %v3408_v2 }
  0xcf   : > { %2975 = vmatprep.mubr.msk.bf16.mxu1 %vm3409_vm1, %v3408_v2 }
  0xd5   : > { %2970 = vmatmul.mubr.msk.bf16.gmra.mrb[88].mxu0 %vm328_vm2, %v998_v1  ;;  %v2599_v1 = vld [vmem:[%s3541_s16 + $0xa4] sm:$0xff] }
  0xd6   : > { %2976 = vmatmul.mubr.msk.bf16.vlgmr.msra.gmra.mrb[88].mxu1 %vm328_vm2, %v1174_v4  ;;  %3013 = vmatprep.mubr.msk.bf16.mxu0 %vm3409_vm1, %v3408_v2  ;;  %v2613_v4 = vld [vmem:[%s3541_s16 + $0x25] sm:$0xff] }
  0xd7   : > { %3050 = vmatpush3.bf16.msra.mxu1 %v1582_v5  ;;  %2979 = vmatprep.mubr.msk.bf16.mxu1 %vm3409_vm1, %v3408_v2  ;;  %v2614_v5 = vld [vmem:[%s3541_s16 + $0x2d] sm:$0xff] }
  0xd8   : > { %v1543_v14 = vpack.c.bf16 %v2614_v5, %v2613_v4 }
  0xdd   : > { %3014 = vmatmul.mubr.msk.bf16.vlgmr.msra.gmra.mrb[92].mxu0 %vm328_vm2, %v1175_v9 }
  0xde   : > { %2980 = vmatmul.mubr.msk.bf16.gmra.mrb[92].mxu1 %vm328_vm2, %v1175_v9  ;;  %3088 = vmatpush3.bf16.msra.mxu0 %v1766_v10  ;;  %v1367_v9 = vpack.c.bf16 %v2600_v3, %v2599_v1  ;;  %v2025_v10 = vld [vmem:[%s3929_s19] sm:$0xff] }
  0xdf   : > { %2983 = vmatprep.mubr.msk.bf16.mxu1 %vm3409_vm1, %v3408_v2  ;;  %3017 = vmatprep.mubr.msk.bf16.mxu0 %vm3409_vm1, %v3408_v2  ;;  %v2033_v1 = vld [vmem:[%s3929_s19 + $0x40] sm:$0xff] }
  0xe0   : > { %2046 = vperm.xlu0 %3225, %v2025_v10  }
  0xe4   : > { %2051 = vperm.xlu0 %3225, %v2026_v20  }
  0xe5   : > { %3018 = vmatmul.mubr.msk.bf16.gmra.mrb[96].mxu0 %vm328_vm2, %v1176_v13 }
  0xe6   : > { %2984 = vmatmul.mubr.msk.bf16.gmra.mrb[96].mxu1 %vm328_vm2, %v1176_v13  ;;  %3021 = vmatprep.mubr.msk.bf16.mxu0 %vm3409_vm1, %v3408_v2 }
  0xe7   : > { %2987 = vmatprep.mubr.msk.bf16.mxu1 %vm3409_vm1, %v3408_v2 }
  0xed   : > { %3022 = vmatmul.mubr.msk.bf16.gmra.mrb[100].mxu0 %vm328_vm2, %v1177_v16 }
  0xee   : > { %2988 = vmatmul.mubr.msk.bf16.gmra.mrb[100].mxu1 %vm328_vm2, %v1177_v16  ;;  %3025 = vmatprep.mubr.msk.bf16.mxu0 %vm3409_vm1, %v3408_v2 }
  0xef   : > { %2991 = vmatprep.mubr.msk.bf16.mxu1 %vm3409_vm1, %v3408_v2 }
  0xf5   : > { %3026 = vmatmul.mubr.msk.bf16.gmra.mrb[104].mxu0 %vm328_vm2, %v1178_v19 }
  0xf6   : > { %2992 = vmatmul.mubr.msk.bf16.gmra.mrb[104].mxu1 %vm328_vm2, %v1178_v19  ;;  %3029 = vmatprep.mubr.msk.bf16.mxu0 %vm3409_vm1, %v3408_v2  ;;  %v2027_v19 = vld [vmem:[%s3929_s19 + $0x10] sm:$0xff] }
  0xf7   : > { %2995 = vmatprep.mubr.msk.bf16.mxu1 %vm3409_vm1, %v3408_v2  ;;  %2056 = vperm.xlu1 %3226, %v2027_v19  }
  0xf8   : > { %v3856_v22 = vpop.f32.mrb[0].mxu0 }
  0xf9   : > { %v2787_v23 = vpop.f32.mrb[1].mxu0  ;;  %v3858_v24 = vpop.f32.mrb[0].mxu1 }
  0xfa   : > { %v3860_v26 = vpop.f32.mrb[2].mxu0  ;;  %v2807_v27 = vpop.f32.mrb[1].mxu1  ;;  %v2615_v23 = vld [vmem:[%s3541_s16 + $0x35] sm:$0xff] }
  0xfb   : > { %v2788_v28 = vpop.f32.mrb[3].mxu0  ;;  %v3862_v29 = vpop.f32.mrb[2].mxu1  ;;  %2061 = vperm.xlu1 %3226, %v2028_v32  }
  0xfc   : > { %v2808_v30 = vpop.f32.mrb[3].mxu1 }
  0xfd   : > { %3030 = vmatmul.mubr.msk.bf16.gmra.mrb[108].mxu0 %vm328_vm2, %v1179_v25 }
  0xfe   : > { %2996 = vmatmul.mubr.msk.bf16.gmra.mrb[108].mxu1 %vm328_vm2, %v1179_v25  ;;  %3033 = vmatprep.mubr.msk.bf16.mxu0 %vm3409_vm1, %v3408_v2  ;;  %v2616_v25 = vld [vmem:[%s3541_s16 + $0x3d] sm:$0xff] }
  0xff   : > { %2999 = vmatprep.mubr.msk.bf16.mxu1 %vm3409_vm1, %v3408_v2 }
 0x100   : > { %v3872_v33 = vpop.f32.mrb[4].mxu0 }
 0x101   : > { %v2791_v34 = vpop.f32.mrb[5].mxu0  ;;  %v3874_v35 = vpop.f32.mrb[4].mxu1 }
 0x102   : > { %v3876_v37 = vpop.f32.mrb[6].mxu0  ;;  %v2811_v38 = vpop.f32.mrb[5].mxu1  ;;  %v2029_v34 = vld [vmem:[%s3929_s19 + $0x20] sm:$0xff] }
 0x103   : > { %v2792_v39 = vpop.f32.mrb[7].mxu0  ;;  %v3878_v40 = vpop.f32.mrb[6].mxu1  ;;  %2066 = vperm.xlu0 %3225, %v2029_v34  }
 0x104   : > { %v2812_v41 = vpop.f32.mrb[7].mxu1 }
 0x105   : > { %3034 = vmatmul.mubr.msk.bf16.gmra.mrb[112].mxu0 %vm328_vm2, %v1180_v36  ;;  %v1544_v41 = vpack.c.bf16 %v2616_v25, %v2615_v23  ;;  %v2036_v23 = vld [vmem:[%s3929_s19 + $0x58] sm:$0xff]  ;;  %v2037_v25 = vld [vmem:[%s3929_s19 + $0x60] sm:$0xff] }
 0x106   : > { %3000 = vmatmul.mubr.msk.bf16.gmra.mrb[112].mxu1 %vm328_vm2, %v1180_v36  ;;  %3037 = vmatprep.mubr.msk.bf16.mxu0 %vm3409_vm1, %v3408_v2 }
 0x107   : > { %3003 = vmatprep.mubr.msk.bf16.mxu1 %vm3409_vm1, %v3408_v2 }
 0x108   : > { %v3888_v44 = vpop.f32.mrb[8].mxu0 }
 0x109   : > { %v2795_v45 = vpop.f32.mrb[9].mxu0  ;;  %v3890_v46 = vpop.f32.mrb[8].mxu1 }
 0x10a   : > { %v3892_v48 = vpop.f32.mrb[10].mxu0  ;;  %v2815_v49 = vpop.f32.mrb[9].mxu1 }
 0x10b   : > { %v2796_v50 = vpop.f32.mrb[11].mxu0  ;;  %v3894_v51 = vpop.f32.mrb[10].mxu1 }
 0x10c   : > { %v2816_v52 = vpop.f32.mrb[11].mxu1  ;;  %v2030_v50 = vld [vmem:[%s3929_s19 + $0x28] sm:$0xff] }
 0x10d   : > { %3038 = vmatmul.mubr.msk.bf16.gmra.mrb[116].mxu0 %vm328_vm2, %v1181_v47  ;;  %v2645_v52 = vld [vmem:[%s3541_s16 + $0x36] sm:$0xff]  ;;  %2071 = vperm.xlu1 %3226, %v2030_v50  }
 0x10e   : > { %3004 = vmatmul.mubr.msk.bf16.gmra.mrb[116].mxu1 %vm328_vm2, %v1181_v47  ;;  %3041 = vmatprep.mubr.msk.bf16.mxu0 %vm3409_vm1, %v3408_v2 }
 0x10f   : > { %3007 = vmatprep.mubr.msk.bf16.mxu1 %vm3409_vm1, %v3408_v2 }
 0x110   : > { %v3904_v55 = vpop.f32.mrb[12].mxu0 }
 0x111   : > { %v2799_v56 = vpop.f32.mrb[13].mxu0  ;;  %v3906_v57 = vpop.f32.mrb[12].mxu1  ;;  %2081 = vperm.xlu1 %3226, %v2032_v0  }
 0x112   : > { %v3908_v59 = vpop.f32.mrb[14].mxu0  ;;  %v2819_v60 = vpop.f32.mrb[13].mxu1  ;;  %v2618_v56 = vld [vmem:[%s3541_s16 + $0x4d] sm:$0xff] }
 0x113   : > { %v2800_v61 = vpop.f32.mrb[15].mxu0  ;;  %v3910_v62 = vpop.f32.mrb[14].mxu1 }
 0x114   : > { %v2820_v63 = vpop.f32.mrb[15].mxu1 }
 0x115   : > { %3042 = vmatmul.mubr.msk.bf16.gmra.mrb[120].mxu0 %vm328_vm2, %v1182_v58  ;;  %v1728_v63 = vpack.c.bf16 %v2646_v53, %v2645_v52 }
 0x116   : > { %3008 = vmatmul.mubr.msk.bf16.gmra.mrb[120].mxu1 %vm328_vm2, %v1182_v58  ;;  %3045 = vmatprep.mubr.msk.bf16.mxu0 %vm3409_vm1, %v3408_v2 }
 0x117   : > { %3051 = vmatprep.mubr.msk.bf16.mxu1 %vm3409_vm1, %v3408_v2 }
 0x118   : > { %v3922_v6 = vpop.f32.mrb[16].mxu0 }
 0x119   : > { %v529_v7 = vpop.f32.mrb[16].mxu1  ;;  %v2803_v8 = vpop.f32.mrb[17].mxu0 }
 0x11a   : > { %v530_v11 = vadd.f32 %v529_v7, %v3856_v22  ;;  %v2825_v12 = vpop.f32.mrb[17].mxu1  ;;  %v3933_v13 = vpop.f32.mrb[18].mxu0  ;;  %v2644_v22 = vld [vmem:[%s3541_s16 + $0x2e] sm:$0xff]  ;;  %v1545_v7 = vpack.c.bf16 %v2618_v56, %v2617_v54  ;;  %v2040_v54 = vld [vmem:[%s3929_s19 + $0x78] sm:$0xff]  ;;  %v2041_v56 = vld [vmem:[%s3929_s19 + $0x80] sm:$0xff] }
 0x11b   : > { %v532_v15 = vpop.f32.mrb[18].mxu1  ;;  %v2804_v16 = vpop.f32.mrb[19].mxu0  ;;  %v1727_v31 = vpack.c.bf16 %v2644_v22, %v2643_v21 }
 0x11c   : > { %v533_v17 = vadd.f32 %v532_v15, %v3860_v26  ;;  %v2826_v18 = vpop.f32.mrb[19].mxu1  ;;  %v2647_v15 = vld [vmem:[%s3541_s16 + $0x46] sm:$0xff]  ;;  %v2648_v16 = vld [vmem:[%s3541_s16 + $0x4e] sm:$0xff] }
 0x11d   : > { %3046 = vmatmul.mubr.msk.bf16.gmra.mrb[124].mxu0 %vm328_vm2, %v1367_v9  ;;  %v1729_v22 = vpack.c.bf16 %v2648_v16, %v2647_v15 }
 0x11e   : > { %3052 = vmatmul.mubr.msk.bf16.vlgmr.msra.gmra.mrb[124].mxu1 %vm328_vm2, %v1543_v14  ;;  %3089 = vmatprep.mubr.msk.bf16.mxu0 %vm3409_vm1, %v3408_v2  ;;  %v2034_v14 = vld [vmem:[%s3929_s19 + $0x48] sm:$0xff] }
 0x11f   : > { %3055 = vmatprep.mubr.msk.bf16.mxu1 %vm3409_vm1, %v3408_v2  ;;  %2091 = vperm.xlu1 %3226, %v2034_v14  }
 0x120   : > { %v695_v26 = vpop.f32.mrb[20].mxu0 }
 0x121   : > { %v537_v27 = vpop.f32.mrb[20].mxu1  ;;  %v3948_v28 = vadd.f32 %v695_v26, %v530_v11  ;;  %v2863_v30 = vpop.f32.mrb[21].mxu0 }
 0x122   : > { %v538_v36 = vadd.f32 %v537_v27, %v3872_v33  ;;  %v2829_v38 = vpop.f32.mrb[21].mxu1  ;;  %v698_v39 = vpop.f32.mrb[22].mxu0  ;;  %v2031_v33 = vld [vmem:[%s3929_s19 + $0x30] sm:$0xff] }
 0x123   : > { %v540_v42 = vpop.f32.mrb[22].mxu1  ;;  %v3953_v43 = vadd.f32 %v698_v39, %v533_v17  ;;  %v2864_v45 = vpop.f32.mrb[23].mxu0  ;;  %2076 = vperm.xlu0 %3225, %v2031_v33   ;;  %v2619_v17 = vld [vmem:[%s3541_s16 + $0x55] sm:$0xff]  ;;  %2101 = vperm.xlu1 %3226, %v2036_v23  }
 0x124   : > { %v541_v47 = vadd.f32 %v540_v42, %v3876_v37  ;;  %v2830_v49 = vpop.f32.mrb[23].mxu1  ;;  %v2649_v42 = vld [vmem:[%s3541_s16 + $0x56] sm:$0xff]  ;;  %v2650_v45 = vld [vmem:[%s3541_s16 + $0x5e] sm:$0xff] }
 0x125   : > { %3090 = vmatmul.mubr.msk.bf16.vlgmr.msra.gmra.mrb[128].mxu0 %vm328_vm2, %v1727_v31  ;;  %v1730_v53 = vpack.c.bf16 %v2650_v45, %v2649_v42 }
 0x126   : > { %3056 = vmatmul.mubr.msk.bf16.gmra.mrb[128].mxu1 %vm328_vm2, %v1544_v41  ;;  %3093 = vmatprep.mubr.msk.bf16.mxu0 %vm3409_vm1, %v3408_v2  ;;  %v2038_v41 = vld [vmem:[%s3929_s19 + $0x68] sm:$0xff] }
 0x127   : > { %3059 = vmatprep.mubr.msk.bf16.mxu1 %vm3409_vm1, %v3408_v2  ;;  %2086 = vperm.xlu0 %3225, %v2033_v1  }
 0x128   : > { %v703_v37 = vpop.f32.mrb[24].mxu0  ;;  %2111 = vperm.xlu1 %3226, %v2038_v41  }
 0x129   : > { %v545_v58 = vpop.f32.mrb[24].mxu1  ;;  %v3968_v60 = vadd.f32 %v703_v37, %v538_v36  ;;  %v2867_v61 = vpop.f32.mrb[25].mxu0 }
 0x12a   : > { %v546_v3 = vadd.f32 %v545_v58, %v3888_v44  ;;  %v2833_v4 = vpop.f32.mrb[25].mxu1  ;;  %v706_v5 = vpop.f32.mrb[26].mxu0  ;;  %v2035_v44 = vld [vmem:[%s3929_s19 + $0x50] sm:$0xff] }
 0x12b   : > { %v548_v8 = vpop.f32.mrb[26].mxu1  ;;  %v3973_v9 = vadd.f32 %v706_v5, %v541_v47  ;;  %v2868_v10 = vpop.f32.mrb[27].mxu0  ;;  %2096 = vperm.xlu0 %3225, %v2035_v44   ;;  %v2621_v47 = vld [vmem:[%s3541_s16 + $0x65] sm:$0xff] }
 0x12c   : > { %v549_v11 = vadd.f32 %v548_v8, %v3892_v48  ;;  %v2834_v12 = vpop.f32.mrb[27].mxu1  ;;  %v2620_v48 = vld [vmem:[%s3541_s16 + $0x5d] sm:$0xff]  ;;  %2121 = vperm.xlu1 %3226, %v2040_v54   ;;  %v2652_v8 = vld [vmem:[%s3541_s16 + $0x6e] sm:$0xff] }
 0x12d   : > { %3094 = vmatmul.mubr.msk.bf16.gmra.mrb[132].mxu0 %vm328_vm2, %v1728_v63  ;;  %v1546_v31 = vpack.c.bf16 %v2620_v48, %v2619_v17  ;;  %v2623_v10 = vld [vmem:[%s3541_s16 + $0x75] sm:$0xff]  ;;  %v2628_v54 = vld [vmem:[%s3541_s16 + $0x9d] sm:$0xff] }
 0x12e   : > { %3060 = vmatmul.mubr.msk.bf16.gmra.mrb[132].mxu1 %vm328_vm2, %v1545_v7  ;;  %3097 = vmatprep.mubr.msk.bf16.mxu0 %vm3409_vm1, %v3408_v2  ;;  %v2042_v7 = vld [vmem:[%s3929_s19 + $0x88] sm:$0xff] }
 0x12f   : > { %3063 = vmatprep.mubr.msk.bf16.mxu1 %vm3409_vm1, %v3408_v2  ;;  %2106 = vperm.xlu0 %3225, %v2037_v25  }
 0x130   : > { %v711_v18 = vpop.f32.mrb[28].mxu0  ;;  %2131 = vperm.xlu1 %3226, %v2042_v7  }
 0x131   : > { %v553_v19 = vpop.f32.mrb[28].mxu1  ;;  %v3988_v20 = vadd.f32 %v711_v18, %v546_v3  ;;  %v2871_v21 = vpop.f32.mrb[29].mxu0 }
 0x132   : > { %v554_v26 = vadd.f32 %v553_v19, %v3904_v55  ;;  %v2837_v27 = vpop.f32.mrb[29].mxu1  ;;  %v714_v30 = vpop.f32.mrb[30].mxu0  ;;  %v2039_v55 = vld [vmem:[%s3929_s19 + $0x70] sm:$0xff] }
 0x133   : > { %v556_v32 = vpop.f32.mrb[30].mxu1  ;;  %v3993_v34 = vadd.f32 %v714_v30, %v549_v11  ;;  %v2872_v36 = vpop.f32.mrb[31].mxu0  ;;  %2116 = vperm.xlu0 %3225, %v2039_v55   ;;  %v2624_v11 = vld [vmem:[%s3541_s16 + $0x7d] sm:$0xff]  ;;  %v2625_v27 = vld [vmem:[%s3541_s16 + $0x85] sm:$0xff]  ;;  %v2626_v30 = vld [vmem:[%s3541_s16 + $0x8d] sm:$0xff] }
 0x134   : > { %v557_v38 = vadd.f32 %v556_v32, %v3908_v59  ;;  %v2838_v39 = vpop.f32.mrb[31].mxu1  ;;  %v2622_v59 = vld [vmem:[%s3541_s16 + $0x6d] sm:$0xff]  ;;  %v1548_v18 = vpack.c.bf16 %v2624_v11, %v2623_v10  ;;  %v1549_v42 = vpack.c.bf16 %v2626_v30, %v2625_v27  ;;  %v2657_v11 = vld [vmem:[%s3541_s16 + $0x96] sm:$0xff] }
 0x135   : > { %3098 = vmatmul.mubr.msk.bf16.gmra.mrb[136].mxu0 %vm328_vm2, %v1729_v22  ;;  %v1547_v63 = vpack.c.bf16 %v2622_v59, %v2621_v47  ;;  %v2659_v30 = vld [vmem:[%s3541_s16 + $0xa6] sm:$0xff] }
 0x136   : > { %3064 = vmatmul.mubr.msk.bf16.gmra.mrb[136].mxu1 %vm328_vm2, %v1546_v31  ;;  %3101 = vmatprep.mubr.msk.bf16.mxu0 %vm3409_vm1, %v3408_v2 }
 0x137   : > { %3067 = vmatprep.mubr.msk.bf16.mxu1 %vm3409_vm1, %v3408_v2  ;;  %2126 = vperm.xlu0 %3225, %v2041_v56  }
 0x138   : > { %v719_v49 = vpop.f32.mrb[32].mxu0 }
 0x139   : > { %v561_v50 = vpop.f32.mrb[32].mxu1  ;;  %v4008_v33 = vadd.f32 %v719_v49, %v554_v26  ;;  %v2875_v52 = vpop.f32.mrb[33].mxu0  ;;  %v2653_v26 = vld [vmem:[%s3541_s16 + $0x76] sm:$0xff] }
 0x13a   : > { %v562_v37 = vadd.f32 %v561_v50, %v3922_v6  ;;  %v2841_v58 = vpop.f32.mrb[33].mxu1  ;;  %v722_v61 = vpop.f32.mrb[34].mxu0  ;;  %v2651_v6 = vld [vmem:[%s3541_s16 + $0x66] sm:$0xff] }
 0x13b   : > { %v564_v0 = vpop.f32.mrb[34].mxu1  ;;  %v4013_v1 = vadd.f32 %v722_v61, %v557_v38  ;;  %v2876_v3 = vpop.f32.mrb[35].mxu0  ;;  %v1731_v15 = vpack.c.bf16 %v2652_v8, %v2651_v6  ;;  %v2655_v52 = vld [vmem:[%s3541_s16 + $0x86] sm:$0xff] }
 0x13c   : > { %v565_v4 = vadd.f32 %v564_v0, %v3933_v13  ;;  %v2842_v5 = vpop.f32.mrb[35].mxu1 }
 0x13d   : > { %3102 = vmatmul.mubr.msk.bf16.gmra.mrb[140].mxu0 %vm328_vm2, %v1730_v53  ;;  %v2627_v53 = vld [vmem:[%s3541_s16 + $0x95] sm:$0xff] }
 0x13e   : > { %3068 = vmatmul.mubr.msk.bf16.gmra.mrb[140].mxu1 %vm328_vm2, %v1547_v63  ;;  %3105 = vmatprep.mubr.msk.bf16.mxu0 %vm3409_vm1, %v3408_v2 }
 0x13f   : > { %3071 = vmatprep.mubr.msk.bf16.mxu1 %vm3409_vm1, %v3408_v2 }
 0x140   : > { %v727_v12 = vpop.f32.mrb[36].mxu0 }
 0x141   : > { %v569_v13 = vpop.f32.mrb[36].mxu1  ;;  %v4027_v14 = vadd.f32 %v727_v12, %v562_v37  ;;  %v2879_v44 = vpop.f32.mrb[37].mxu0  ;;  %v2629_v12 = vld [vmem:[%s3541_s16 + $0xa5] sm:$0xff] }
 0x142   : > { %v570_v16 = vadd.f32 %v569_v13, %v3858_v24  ;;  %v2845_v17 = vpop.f32.mrb[37].mxu1  ;;  %v730_v48 = vpop.f32.mrb[38].mxu0  ;;  %v2654_v24 = vld [vmem:[%s3541_s16 + $0x7e] sm:$0xff]  ;;  %v2630_v13 = vld [vmem:[%s3541_s16 + $0xad] sm:$0xff] }
 0x143   : > { %v572_v19 = vpop.f32.mrb[38].mxu1  ;;  %v4030_v21 = vadd.f32 %v730_v48, %v565_v4  ;;  %v2880_v22 = vpop.f32.mrb[39].mxu0  ;;  %v1732_v38 = vpack.c.bf16 %v2654_v24, %v2653_v26  ;;  %v1550_v4 = vpack.c.bf16 %v2628_v54, %v2627_v53 }
 0x144   : > { %v573_v23 = vadd.f32 %v572_v19, %v3862_v29  ;;  %v2846_v25 = vpop.f32.mrb[39].mxu1  ;;  %v1551_v22 = vpack.c.bf16 %v2630_v13, %v2629_v12 }
 0x145   : > { %3106 = vmatmul.mubr.msk.bf16.gmra.mrb[144].mxu0 %vm328_vm2, %v1731_v15 }
 0x146   : > { %3072 = vmatmul.mubr.msk.bf16.gmra.mrb[144].mxu1 %vm328_vm2, %v1548_v18  ;;  %3109 = vmatprep.mubr.msk.bf16.mxu0 %vm3409_vm1, %v3408_v2 }
 0x147   : > { %3075 = vmatprep.mubr.msk.bf16.mxu1 %vm3409_vm1, %v3408_v2 }
 0x148   : > { %v735_v31 = vpop.f32.mrb[40].mxu0 }
 0x149   : > { %v577_v32 = vpop.f32.mrb[40].mxu1  ;;  %v4043_v36 = vadd.f32 %v735_v31, %v570_v16  ;;  %v2883_v29 = vpop.f32.mrb[41].mxu0  ;;  %v2660_v31 = vld [vmem:[%s3541_s16 + $0xae] sm:$0xff] }
 0x14a   : > { %v578_v39 = vadd.f32 %v577_v32, %v3874_v35  ;;  %v2849_v41 = vpop.f32.mrb[41].mxu1  ;;  %v738_v55 = vpop.f32.mrb[42].mxu0  ;;  %v2656_v35 = vld [vmem:[%s3541_s16 + $0x8e] sm:$0xff] }
 0x14b   : > { %v580_v45 = vpop.f32.mrb[42].mxu1  ;;  %v4046_v47 = vadd.f32 %v738_v55, %v573_v23  ;;  %v2884_v59 = vpop.f32.mrb[43].mxu0  ;;  %v1733_v61 = vpack.c.bf16 %v2656_v35, %v2655_v52 }
 0x14c   : > { %v581_v49 = vadd.f32 %v580_v45, %v3878_v40  ;;  %v2850_v50 = vpop.f32.mrb[43].mxu1 }
 0x14d   : > { %3110 = vmatmul.mubr.msk.bf16.gmra.mrb[148].mxu0 %vm328_vm2, %v1732_v38 }
 0x14e   : > { %3076 = vmatmul.mubr.msk.bf16.gmra.mrb[148].mxu1 %vm328_vm2, %v1549_v42  ;;  %3113 = vmatprep.mubr.msk.bf16.mxu0 %vm3409_vm1, %v3408_v2 }
 0x14f   : > { %3079 = vmatprep.mubr.msk.bf16.mxu1 %vm3409_vm1, %v3408_v2 }
 0x150   : > { %v743_v56 = vpop.f32.mrb[44].mxu0 }
 0x151   : > { %v585_v37 = vpop.f32.mrb[44].mxu1  ;;  %v4059_v58 = vadd.f32 %v743_v56, %v578_v39  ;;  %v2887_v40 = vpop.f32.mrb[45].mxu0  ;;  %v1735_v39 = vpack.c.bf16 %v2660_v31, %v2659_v30 }
 0x152   : > { %v586_v63 = vadd.f32 %v585_v37, %v3890_v46  ;;  %v2853_v0 = vpop.f32.mrb[45].mxu1  ;;  %v746_v3 = vpop.f32.mrb[46].mxu0  ;;  %v2658_v46 = vld [vmem:[%s3541_s16 + $0x9e] sm:$0xff] }
 0x153   : > { %v588_v5 = vpop.f32.mrb[46].mxu1  ;;  %v4062_v7 = vadd.f32 %v746_v3, %v581_v49  ;;  %v2888_v6 = vpop.f32.mrb[47].mxu0  ;;  %v1734_v17 = vpack.c.bf16 %v2658_v46, %v2657_v11 }
 0x154   : > { %v589_v8 = vadd.f32 %v588_v5, %v3894_v51  ;;  %v2854_v10 = vpop.f32.mrb[47].mxu1 }
 0x155   : > { %3114 = vmatmul.mubr.msk.bf16.gmra.mrb[152].mxu0 %vm328_vm2, %v1733_v61 }
 0x156   : > { %3080 = vmatmul.mubr.msk.bf16.gmra.mrb[152].mxu1 %vm328_vm2, %v1550_v4  ;;  %3117 = vmatprep.mubr.msk.bf16.mxu0 %vm3409_vm1, %v3408_v2 }
 0x157   : > { %3083 = vmatprep.mubr.msk.bf16.mxu1 %vm3409_vm1, %v3408_v2 }
 0x158   : > { %v751_v44 = vpop.f32.mrb[48].mxu0 }
 0x159   : > { %v593_v15 = vpop.f32.mrb[48].mxu1  ;;  %v4075_v16 = vadd.f32 %v751_v44, %v586_v63  ;;  %v2891_v51 = vpop.f32.mrb[49].mxu0 }
 0x15a   : > { %v594_v48 = vadd.f32 %v593_v15, %v3906_v57  ;;  %v2857_v18 = vpop.f32.mrb[49].mxu1  ;;  %v754_v19 = vpop.f32.mrb[50].mxu0 }
 0x15b   : > { %v596_v23 = vpop.f32.mrb[50].mxu1  ;;  %v4078_v25 = vadd.f32 %v754_v19, %v589_v8  ;;  %v2892_v26 = vpop.f32.mrb[51].mxu0 }
 0x15c   : > { %v597_v24 = vadd.f32 %v596_v23, %v3910_v62  ;;  %v2858_v27 = vpop.f32.mrb[51].mxu1 }
 0x15d   : > { %3118 = vmatmul.mubr.msk.bf16.gmra.mrb[156].mxu0 %vm328_vm2, %v1734_v17 }
 0x15e   : > { %3084 = vmatmul.mubr.msk.bf16.gmra.mrb[156].mxu1 %vm328_vm2, %v1551_v22  ;;  %3121 = vmatprep.mubr.msk.bf16.mxu0 %vm3409_vm1, %v3408_v2 }
 0x160   : > { %v759_v57 = vpop.f32.mrb[52].mxu0 }
 0x161   : > { %v4087_v32 = vadd.f32 %v759_v57, %v594_v48  ;;  %v881_v29 = vpop.f32.mrb[52].mxu1  ;;  %v2895_v38 = vpop.f32.mrb[53].mxu0 }
 0x162   : > { %v952_v41 = vadd.f32 %v881_v29, %v3948_v28  ;;  %v2901_v55 = vpop.f32.mrb[53].mxu1  ;;  %v762_v62 = vpop.f32.mrb[54].mxu0 }
 0x163   : > { %v4090_v42 = vadd.f32 %v762_v62, %v597_v24  ;;  %v884_v45 = vpop.f32.mrb[54].mxu1  ;;  %v2896_v59 = vpop.f32.mrb[55].mxu0 }
 0x164   : > { %v953_v49 = vadd.f32 %v884_v45, %v3953_v43  ;;  %v2902_v50 = vpop.f32.mrb[55].mxu1 }
 0x165   : > { %3122 = vmatmul.mubr.msk.bf16.gmra.mrb[160].mxu0 %vm328_vm2, %v1735_v39 }
 0x168   : > { %v1065_v2 = vpop.f32.mrb[56].mxu0 }
 0x169   : > { %v889_v52 = vpop.f32.mrb[56].mxu1  ;;  %v4094_v35 = vadd.f32 %v1065_v2, %v952_v41  ;;  %v2939_v53 = vpop.f32.mrb[57].mxu0 }
 0x16a   : > { %v954_v54 = vadd.f32 %v889_v52, %v3968_v60  ;;  %v2905_v56 = vpop.f32.mrb[57].mxu1  ;;  %v1068_v28 = vpop.f32.mrb[58].mxu0 }
 0x16b   : > { %v892_v37 = vpop.f32.mrb[58].mxu1  ;;  %v4097_v40 = vadd.f32 %v1068_v28, %v953_v49  ;;  %v2940_v61 = vpop.f32.mrb[59].mxu0 }
 0x16c   : > { %v955_v63 = vadd.f32 %v892_v37, %v3973_v9  ;;  %v2906_v0 = vpop.f32.mrb[59].mxu1 }
 0x170   : > { %v1073_v43 = vpop.f32.mrb[60].mxu0 }
 0x171   : > { %v897_v3 = vpop.f32.mrb[60].mxu1  ;;  %v4100_v4 = vadd.f32 %v1073_v43, %v954_v54  ;;  %v2943_v5 = vpop.f32.mrb[61].mxu0 }
 0x172   : > { %v956_v6 = vadd.f32 %v897_v3, %v3988_v20  ;;  %v2909_v8 = vpop.f32.mrb[61].mxu1  ;;  %v1076_v10 = vpop.f32.mrb[62].mxu0 }
 0x173   : > { %v900_v11 = vpop.f32.mrb[62].mxu1  ;;  %v4103_v60 = vadd.f32 %v1076_v10, %v955_v63  ;;  %v2944_v46 = vpop.f32.mrb[63].mxu0 }
 0x174   : > { %v957_v12 = vadd.f32 %v900_v11, %v3993_v34  ;;  %v2910_v13 = vpop.f32.mrb[63].mxu1 }
 0x178   : > { %v1081_v44 = vpop.f32.mrb[64].mxu0 }
 0x179   : > { %v905_v15 = vpop.f32.mrb[64].mxu1  ;;  %v4106_v9 = vadd.f32 %v1081_v44, %v956_v6  ;;  %v2947_v51 = vpop.f32.mrb[65].mxu0 }
 0x17a   : > { %v958_v17 = vadd.f32 %v905_v15, %v4008_v33  ;;  %v2913_v48 = vpop.f32.mrb[65].mxu1  ;;  %v1084_v18 = vpop.f32.mrb[66].mxu0 }
 0x17b   : > { %v908_v19 = vpop.f32.mrb[66].mxu1  ;;  %v4109_v20 = vadd.f32 %v1084_v18, %v957_v12  ;;  %v2948_v22 = vpop.f32.mrb[67].mxu0 }
 0x17c   : > { %v959_v23 = vadd.f32 %v908_v19, %v4013_v1  ;;  %v2914_v26 = vpop.f32.mrb[67].mxu1 }
 0x180   : > { %v1089_v24 = vpop.f32.mrb[68].mxu0 }
 0x181   : > { %v913_v27 = vpop.f32.mrb[68].mxu1  ;;  %v4112_v34 = vadd.f32 %v1089_v24, %v958_v17  ;;  %v2951_v30 = vpop.f32.mrb[69].mxu0 }
 0x182   : > { %v960_v31 = vadd.f32 %v913_v27, %v4027_v14  ;;  %v2917_v57 = vpop.f32.mrb[69].mxu1  ;;  %v1092_v29 = vpop.f32.mrb[70].mxu0 }
 0x183   : > { %v916_v38 = vpop.f32.mrb[70].mxu1  ;;  %v4115_v33 = vadd.f32 %v1092_v29, %v959_v23  ;;  %v2952_v39 = vpop.f32.mrb[71].mxu0 }
 0x184   : > { %v961_v41 = vadd.f32 %v916_v38, %v4030_v21  ;;  %v2918_v55 = vpop.f32.mrb[71].mxu1 }
 0x188   : > { %v1097_v62 = vpop.f32.mrb[72].mxu0 }
 0x189   : > { %v921_v45 = vpop.f32.mrb[72].mxu1  ;;  %v4118_v1 = vadd.f32 %v1097_v62, %v960_v31  ;;  %v2955_v59 = vpop.f32.mrb[73].mxu0 }
 0x18a   : > { %v962_v49 = vadd.f32 %v921_v45, %v4043_v36  ;;  %v2921_v50 = vpop.f32.mrb[73].mxu1  ;;  %v1100_v2 = vpop.f32.mrb[74].mxu0 }
 0x18b   : > { %v924_v52 = vpop.f32.mrb[74].mxu1  ;;  %v4121_v14 = vadd.f32 %v1100_v2, %v961_v41  ;;  %v2956_v53 = vpop.f32.mrb[75].mxu0 }
 0x18c   : > { %v963_v54 = vadd.f32 %v924_v52, %v4046_v47  ;;  %v2922_v56 = vpop.f32.mrb[75].mxu1 }
 0x190   : > { %v1105_v28 = vpop.f32.mrb[76].mxu0 }
 0x191   : > { %v929_v37 = vpop.f32.mrb[76].mxu1  ;;  %v4124_v21 = vadd.f32 %v1105_v28, %v962_v49  ;;  %v2959_v61 = vpop.f32.mrb[77].mxu0 }
 0x192   : > { %v964_v63 = vadd.f32 %v929_v37, %v4059_v58  ;;  %v2925_v0 = vpop.f32.mrb[77].mxu1  ;;  %v1108_v43 = vpop.f32.mrb[78].mxu0 }
 0x193   : > { %v932_v3 = vpop.f32.mrb[78].mxu1  ;;  %v4127_v36 = vadd.f32 %v1108_v43, %v963_v54  ;;  %v2960_v5 = vpop.f32.mrb[79].mxu0 }
 0x194   : > { %v965_v6 = vadd.f32 %v932_v3, %v4062_v7  ;;  %v2926_v8 = vpop.f32.mrb[79].mxu1 }
 0x198   : > { %v1113_v10 = vpop.f32.mrb[80].mxu0 }
 0x199   : > { %v937_v11 = vpop.f32.mrb[80].mxu1  ;;  %v4130_v47 = vadd.f32 %v1113_v10, %v964_v63  ;;  %v2963_v46 = vpop.f32.mrb[81].mxu0 }
 0x19a   : > { %v966_v12 = vadd.f32 %v937_v11, %v4075_v16  ;;  %v2929_v13 = vpop.f32.mrb[81].mxu1  ;;  %v1116_v44 = vpop.f32.mrb[82].mxu0 }
 0x19b   : > { %v940_v15 = vpop.f32.mrb[82].mxu1  ;;  %v4133_v58 = vadd.f32 %v1116_v44, %v965_v6  ;;  %v2964_v51 = vpop.f32.mrb[83].mxu0 }
 0x19c   : > { %v967_v17 = vadd.f32 %v940_v15, %v4078_v25  ;;  %v2930_v48 = vpop.f32.mrb[83].mxu1 }
 0x1a0   : > { %v1121_v18 = vpop.f32.mrb[84].mxu0 }
 0x1a1   : > { %v945_v19 = vpop.f32.mrb[84].mxu1  ;;  %v4136_v7 = vadd.f32 %v1121_v18, %v966_v12  ;;  %v2967_v22 = vpop.f32.mrb[85].mxu0 }
 0x1a2   : > { %v968_v23 = vadd.f32 %v945_v19, %v4087_v32  ;;  %v2933_v26 = vpop.f32.mrb[85].mxu1  ;;  %v1124_v24 = vpop.f32.mrb[86].mxu0 }
 0x1a3   : > { %v948_v27 = vpop.f32.mrb[86].mxu1  ;;  %v4139_v16 = vadd.f32 %v1124_v24, %v967_v17  ;;  %v2968_v30 = vpop.f32.mrb[87].mxu0 }
 0x1a4   : > { %v969_v31 = vadd.f32 %v948_v27, %v4090_v42  ;;  %v2934_v57 = vpop.f32.mrb[87].mxu1 }
 0x1a8   : > { %v1129_v29 = vpop.f32.mrb[88].mxu0 }
 0x1a9   : > { %v4142_v38 = vadd.f32 %v1129_v29, %v968_v23  ;;  %v1249_v25 = vpop.f32.mrb[88].mxu1  ;;  %v2971_v39 = vpop.f32.mrb[89].mxu0 }
 0x1aa   : > { %v1320_v41 = vadd.f32 %v1249_v25, %v4094_v35  ;;  %v2977_v55 = vpop.f32.mrb[89].mxu1  ;;  %v1132_v62 = vpop.f32.mrb[90].mxu0 }
 0x1ab   : > { %v4145_v45 = vadd.f32 %v1132_v62, %v969_v31  ;;  %v1252_v32 = vpop.f32.mrb[90].mxu1  ;;  %v2972_v59 = vpop.f32.mrb[91].mxu0 }
 0x1ac   : > { %v1321_v49 = vadd.f32 %v1252_v32, %v4097_v40  ;;  %v2978_v50 = vpop.f32.mrb[91].mxu1 }
 0x1b0   : > { %v1434_v2 = vpop.f32.mrb[92].mxu0 }
 0x1b1   : > { %v1257_v52 = vpop.f32.mrb[92].mxu1  ;;  %v4148_v42 = vadd.f32 %v1434_v2, %v1320_v41  ;;  %v3015_v53 = vpop.f32.mrb[93].mxu0 }
 0x1b2   : > { %v1322_v54 = vadd.f32 %v1257_v52, %v4100_v4  ;;  %v2981_v56 = vpop.f32.mrb[93].mxu1  ;;  %v1437_v28 = vpop.f32.mrb[94].mxu0 }
 0x1b3   : > { %v1260_v37 = vpop.f32.mrb[94].mxu1  ;;  %v4151_v35 = vadd.f32 %v1437_v28, %v1321_v49  ;;  %v3016_v61 = vpop.f32.mrb[95].mxu0 }
 0x1b4   : > { %v1323_v63 = vadd.f32 %v1260_v37, %v4103_v60  ;;  %v2982_v0 = vpop.f32.mrb[95].mxu1 }
 0x1b8   : > { %v1442_v43 = vpop.f32.mrb[96].mxu0 }
 0x1b9   : > { %v1265_v3 = vpop.f32.mrb[96].mxu1  ;;  %v4154_v40 = vadd.f32 %v1442_v43, %v1322_v54  ;;  %v3019_v5 = vpop.f32.mrb[97].mxu0 }
 0x1ba   : > { %v1324_v6 = vadd.f32 %v1265_v3, %v4106_v9  ;;  %v2985_v8 = vpop.f32.mrb[97].mxu1  ;;  %v1445_v10 = vpop.f32.mrb[98].mxu0 }
 0x1bb   : > { %v1268_v11 = vpop.f32.mrb[98].mxu1  ;;  %v4157_v4 = vadd.f32 %v1445_v10, %v1323_v63  ;;  %v3020_v46 = vpop.f32.mrb[99].mxu0 }
 0x1bc   : > { %v1325_v12 = vadd.f32 %v1268_v11, %v4109_v20  ;;  %v2986_v13 = vpop.f32.mrb[99].mxu1 }
 0x1c0   : > { %v1450_v44 = vpop.f32.mrb[100].mxu0 }
 0x1c1   : > { %v1273_v15 = vpop.f32.mrb[100].mxu1  ;;  %v4160_v60 = vadd.f32 %v1450_v44, %v1324_v6  ;;  %v3023_v51 = vpop.f32.mrb[101].mxu0 }
 0x1c2   : > { %v1326_v17 = vadd.f32 %v1273_v15, %v4112_v34  ;;  %v2989_v48 = vpop.f32.mrb[101].mxu1  ;;  %v1453_v18 = vpop.f32.mrb[102].mxu0 }
 0x1c3   : > { %v1276_v19 = vpop.f32.mrb[102].mxu1  ;;  %v4163_v9 = vadd.f32 %v1453_v18, %v1325_v12  ;;  %v3024_v22 = vpop.f32.mrb[103].mxu0 }
 0x1c4   : > { %v1327_v23 = vadd.f32 %v1276_v19, %v4115_v33  ;;  %v2990_v26 = vpop.f32.mrb[103].mxu1 }
 0x1c8   : > { %v1458_v24 = vpop.f32.mrb[104].mxu0 }
 0x1c9   : > { %v1281_v27 = vpop.f32.mrb[104].mxu1  ;;  %v4166_v20 = vadd.f32 %v1458_v24, %v1326_v17  ;;  %v3027_v30 = vpop.f32.mrb[105].mxu0 }
 0x1ca   : > { %v1328_v31 = vadd.f32 %v1281_v27, %v4118_v1  ;;  %v2993_v57 = vpop.f32.mrb[105].mxu1  ;;  %v1461_v29 = vpop.f32.mrb[106].mxu0 }
 0x1cb   : > { %v1284_v25 = vpop.f32.mrb[106].mxu1  ;;  %v4169_v34 = vadd.f32 %v1461_v29, %v1327_v23  ;;  %v3028_v39 = vpop.f32.mrb[107].mxu0 }
 0x1cc   : > { %v1329_v41 = vadd.f32 %v1284_v25, %v4121_v14  ;;  %v2994_v55 = vpop.f32.mrb[107].mxu1 }
 0x1d0   : > { %v1466_v62 = vpop.f32.mrb[108].mxu0 }
 0x1d1   : > { %v1289_v32 = vpop.f32.mrb[108].mxu1  ;;  %v4172_v33 = vadd.f32 %v1466_v62, %v1328_v31  ;;  %v3031_v59 = vpop.f32.mrb[109].mxu0 }
 0x1d2   : > { %v1330_v49 = vadd.f32 %v1289_v32, %v4124_v21  ;;  %v2997_v50 = vpop.f32.mrb[109].mxu1  ;;  %v1469_v2 = vpop.f32.mrb[110].mxu0 }
 0x1d3   : > { %v1292_v52 = vpop.f32.mrb[110].mxu1  ;;  %v4175_v1 = vadd.f32 %v1469_v2, %v1329_v41  ;;  %v3032_v53 = vpop.f32.mrb[111].mxu0 }
 0x1d4   : > { %v1331_v54 = vadd.f32 %v1292_v52, %v4127_v36  ;;  %v2998_v56 = vpop.f32.mrb[111].mxu1 }
 0x1d8   : > { %v1474_v28 = vpop.f32.mrb[112].mxu0 }
 0x1d9   : > { %v1297_v37 = vpop.f32.mrb[112].mxu1  ;;  %v4178_v14 = vadd.f32 %v1474_v28, %v1330_v49  ;;  %v3035_v61 = vpop.f32.mrb[113].mxu0 }
 0x1da   : > { %v1332_v63 = vadd.f32 %v1297_v37, %v4130_v47  ;;  %v3001_v0 = vpop.f32.mrb[113].mxu1  ;;  %v1477_v43 = vpop.f32.mrb[114].mxu0 }
 0x1db   : > { %v1300_v3 = vpop.f32.mrb[114].mxu1  ;;  %v4181_v21 = vadd.f32 %v1477_v43, %v1331_v54  ;;  %v3036_v5 = vpop.f32.mrb[115].mxu0 }
 0x1dc   : > { %v1333_v6 = vadd.f32 %v1300_v3, %v4133_v58  ;;  %v3002_v8 = vpop.f32.mrb[115].mxu1 }
 0x1e0   : > { %v1482_v10 = vpop.f32.mrb[116].mxu0 }
 0x1e1   : > { %v1305_v11 = vpop.f32.mrb[116].mxu1  ;;  %v4184_v36 = vadd.f32 %v1482_v10, %v1332_v63  ;;  %v3039_v46 = vpop.f32.mrb[117].mxu0 }
 0x1e2   : > { %v1334_v12 = vadd.f32 %v1305_v11, %v4136_v7  ;;  %v3005_v13 = vpop.f32.mrb[117].mxu1  ;;  %v1485_v44 = vpop.f32.mrb[118].mxu0 }
 0x1e3   : > { %v1308_v15 = vpop.f32.mrb[118].mxu1  ;;  %v4187_v47 = vadd.f32 %v1485_v44, %v1333_v6  ;;  %v3040_v51 = vpop.f32.mrb[119].mxu0 }
 0x1e4   : > { %v1335_v17 = vadd.f32 %v1308_v15, %v4139_v16  ;;  %v3006_v48 = vpop.f32.mrb[119].mxu1 }
 0x1e8   : > { %v1490_v18 = vpop.f32.mrb[120].mxu0 }
 0x1e9   : > { %v1313_v19 = vpop.f32.mrb[120].mxu1  ;;  %v4190_v58 = vadd.f32 %v1490_v18, %v1334_v12  ;;  %v3043_v22 = vpop.f32.mrb[121].mxu0 }
 0x1ea   : > { %v1336_v23 = vadd.f32 %v1313_v19, %v4142_v38  ;;  %v3009_v26 = vpop.f32.mrb[121].mxu1  ;;  %v1493_v24 = vpop.f32.mrb[122].mxu0 }
 0x1eb   : > { %v1316_v27 = vpop.f32.mrb[122].mxu1  ;;  %v4193_v7 = vadd.f32 %v1493_v24, %v1335_v17  ;;  %v3044_v30 = vpop.f32.mrb[123].mxu0 }
 0x1ec   : > { %v1337_v31 = vadd.f32 %v1316_v27, %v4145_v45  ;;  %v3010_v57 = vpop.f32.mrb[123].mxu1  ;;  %v4205_v45 = vld [vmem:[%s4397_s3] ss:$0 sm:$0xff] }
 0x1f0   : > { %v1498_v29 = vpop.f32.mrb[124].mxu0 }
 0x1f1   : > { %v4196_v25 = vadd.f32 %v1498_v29, %v1336_v23  ;;  %v1618_v16 = vpop.f32.mrb[124].mxu1  ;;  %v3047_v39 = vpop.f32.mrb[125].mxu0 }
 0x1f2   : > { %v1689_v41 = vadd.f32 %v1618_v16, %v4148_v42  ;;  %v3053_v55 = vpop.f32.mrb[125].mxu1  ;;  %v1501_v62 = vpop.f32.mrb[126].mxu0 }
 0x1f3   : > { %v4199_v32 = vadd.f32 %v1501_v62, %v1337_v31  ;;  %v1621_v38 = vpop.f32.mrb[126].mxu1  ;;  %v3048_v59 = vpop.f32.mrb[127].mxu0 }
 0x1f4   : > { %v1690_v49 = vadd.f32 %v1621_v38, %v4151_v35  ;;  %v3054_v50 = vpop.f32.mrb[127].mxu1 }
 0x1f8   : > { %v1802_v2 = vpop.f32.mrb[128].mxu0 }
 0x1f9   : > { %v1626_v52 = vpop.f32.mrb[128].mxu1  ;;  %v1873_v53 = vadd.f32 %v1802_v2, %v1689_v41  ;;  %v3091_v54 = vpop.f32.mrb[129].mxu0 }
 0x1fa   : > { %v1691_v42 = vadd.f32 %v1626_v52, %v4154_v40  ;;  %v3057_v56 = vpop.f32.mrb[129].mxu1  ;;  %v1805_v28 = vpop.f32.mrb[130].mxu0 }
 0x1fb   : > { %v4209_v37 = vadd.f32 %v4205_v45, %v1873_v53  ;;  %v1629_v61 = vpop.f32.mrb[130].mxu1  ;;  %v1874_v63 = vadd.f32 %v1805_v28, %v1690_v49  ;;  %v3092_v35 = vpop.f32.mrb[131].mxu0 }
 0x1fc   : > { %v1692_v0 = vadd.f32 %v1629_v61, %v4157_v4  ;;  %v3058_v43 = vpop.f32.mrb[131].mxu1  ;;  %v2047_v28 = vpop.permute.xlu0 %2046 }
 0x1fd   : > { %v1916_v3 = vsub.f32 0.0, %v4209_v37  ;;  %v4214_v5 = vadd.f32 %v4205_v45, %v1874_v63 }
 0x1ff   : > { %v1934_v6 = vmul.f32 1.442695, %v1916_v3  ;;  %v1917_v8 = vsub.f32 0.0, %v4214_v5 }
 0x200   : > { %v1810_v40 = vpop.f32.mrb[132].mxu0 }
 0x201   : > { %3227 = vpow2.f32 %v1934_v6  ;;  %v1936_v10 = vmul.f32 1.442695, %v1917_v8  ;;  %v1634_v11 = vpop.f32.mrb[132].mxu1  ;;  %v1875_v46 = vadd.f32 %v1810_v40, %v1691_v42  ;;  %v3095_v12 = vpop.f32.mrb[133].mxu0 }
 0x202   : > { %v1693_v13 = vadd.f32 %v1634_v11, %v4160_v60  ;;  %v3061_v44 = vpop.f32.mrb[133].mxu1  ;;  %v1813_v15 = vpop.f32.mrb[134].mxu0 }
 0x203   : > { %3229 = vpow2.f32 %v1936_v10  ;;  %v4219_v4 = vadd.f32 %v4205_v45, %v1875_v46  ;;  %v1637_v51 = vpop.f32.mrb[134].mxu1  ;;  %v1876_v17 = vadd.f32 %v1813_v15, %v1692_v0  ;;  %v3096_v48 = vpop.f32.mrb[135].mxu0 }
 0x204   : > { %v1694_v18 = vadd.f32 %v1637_v51, %v4163_v9  ;;  %v3062_v19 = vpop.f32.mrb[135].mxu1 }
 0x205   : > { %v1918_v22 = vsub.f32 0.0, %v4219_v4  ;;  %v4224_v23 = vadd.f32 %v4205_v45, %v1876_v17 }
 0x207   : > { %v1938_v26 = vmul.f32 1.442695, %v1918_v22  ;;  %v1919_v60 = vsub.f32 0.0, %v4224_v23  ;;  %v2052_v22 = vpop.permute.xlu0 %2051 }
 0x208   : > { %v1818_v24 = vpop.f32.mrb[136].mxu0 }
 0x209   : > { %3231 = vpow2.f32 %v1938_v26  ;;  %v1940_v27 = vmul.f32 1.442695, %v1919_v60  ;;  %v1642_v30 = vpop.f32.mrb[136].mxu1  ;;  %v1877_v31 = vadd.f32 %v1818_v24, %v1693_v13  ;;  %v3099_v57 = vpop.f32.mrb[137].mxu0 }
 0x20a   : > { %v1695_v29 = vadd.f32 %v1642_v30, %v4166_v20  ;;  %v3065_v16 = vpop.f32.mrb[137].mxu1  ;;  %v1821_v39 = vpop.f32.mrb[138].mxu0 }
 0x20b   : > { %v3228_v9 = vpop.eup %3227  ;;  %3233 = vpow2.f32 %v1940_v27  ;;  %v4229_v41 = vadd.f32 %v4205_v45, %v1877_v31  ;;  %v1645_v55 = vpop.f32.mrb[138].mxu1  ;;  %v1878_v62 = vadd.f32 %v1821_v39, %v1694_v18 }
 0x20c   : > { %v3100_v38 = vpop.f32.mrb[139].mxu0  ;;  %v1970_v59 = vadd.f32 1.0, %v3228_v9  ;;  %v1696_v49 = vadd.f32 %v1645_v55, %v4169_v34  ;;  %v3066_v50 = vpop.f32.mrb[139].mxu1 }
 0x20d   : > { %v3230_v2 = vpop.eup %3229  ;;  %v1920_v52 = vsub.f32 0.0, %v4229_v41  ;;  %v4234_v53 = vadd.f32 %v4205_v45, %v1878_v62 }
 0x20e   : > { %3235 = vrcp.f32 %v1970_v59  ;;  %v1971_v20 = vadd.f32 1.0, %v3230_v2 }
 0x20f   : > { %v1942_v54 = vmul.f32 1.442695, %v1920_v52  ;;  %v1921_v42 = vsub.f32 0.0, %v4234_v53 }
 0x210   : > { %3237 = vrcp.f32 %v1971_v20  ;;  %v1826_v56 = vpop.f32.mrb[140].mxu0 }
 0x211   : > { %3239 = vpow2.f32 %v1942_v54  ;;  %v1944_v61 = vmul.f32 1.442695, %v1921_v42  ;;  %v1650_v63 = vpop.f32.mrb[140].mxu1  ;;  %v1879_v35 = vadd.f32 %v1826_v56, %v1695_v29  ;;  %v3103_v34 = vpop.f32.mrb[141].mxu0 }
 0x212   : > { %v1697_v0 = vadd.f32 %v1650_v63, %v4172_v33  ;;  %v3069_v43 = vpop.f32.mrb[141].mxu1  ;;  %v1829_v3 = vpop.f32.mrb[142].mxu0 }
 0x213   : > { %v3232_v6 = vpop.eup %3231  ;;  %3241 = vpow2.f32 %v1944_v61  ;;  %v4239_v8 = vadd.f32 %v4205_v45, %v1879_v35  ;;  %v1653_v40 = vpop.f32.mrb[142].mxu1  ;;  %v1880_v10 = vadd.f32 %v1829_v3, %v1696_v49 }
 0x214   : > { %v3104_v11 = vpop.f32.mrb[143].mxu0  ;;  %v1972_v46 = vadd.f32 1.0, %v3232_v6  ;;  %v1698_v12 = vadd.f32 %v1653_v40, %v4175_v1  ;;  %v3070_v13 = vpop.f32.mrb[143].mxu1 }
 0x215   : > { %v3234_v44 = vpop.eup %3233  ;;  %v1922_v15 = vsub.f32 0.0, %v4239_v8  ;;  %v4244_v51 = vadd.f32 %v4205_v45, %v1880_v10  ;;  %v2057_v54 = vpop.permute.xlu1 %2056 }
 0x216   : > { %3243 = vrcp.f32 %v1972_v46  ;;  %v1973_v33 = vadd.f32 1.0, %v3234_v44 }
 0x217   : > { %v1946_v17 = vmul.f32 1.442695, %v1922_v15  ;;  %v1923_v48 = vsub.f32 0.0, %v4244_v51 }
 0x218   : > { %v3236_v18 = vpop.eup %3235  ;;  %3245 = vrcp.f32 %v1973_v33  ;;  %v1834_v19 = vpop.f32.mrb[144].mxu0 }
 0x219   : > { %3247 = vpow2.f32 %v1946_v17  ;;  %v1948_v26 = vmul.f32 1.442695, %v1923_v48  ;;  %v1658_v60 = vpop.f32.mrb[144].mxu1  ;;  %v1881_v1 = vadd.f32 %v1834_v19, %v1697_v0  ;;  %v3107_v24 = vpop.f32.mrb[145].mxu0  ;;  %v2006_v30 = vmul.f32 %v3236_v18, %v4209_v37 }
 0x21a   : > { %v3238_v27 = vpop.eup %3237  ;;  %v1699_v31 = vadd.f32 %v1658_v60, %v4178_v14  ;;  %v3073_v57 = vpop.f32.mrb[145].mxu1 }
 0x21b   : > { %v1837_v29 = vpop.f32.mrb[146].mxu0  ;;  %v3240_v16 = vpop.eup %3239  ;;  %3249 = vpow2.f32 %v1948_v26  ;;  %v4250_v39 = vadd.f32 %v4205_v45, %v1881_v1  ;;  %v2007_v49 = vmul.f32 %v3238_v27, %v4214_v5  ;;  %v2134_v20 = vmul.f32 %v2047_v28, %v2006_v30 }
 0x21c   : > { %v1661_v9 = vpop.f32.mrb[146].mxu1  ;;  %v1882_v55 = vadd.f32 %v1837_v29, %v1698_v12  ;;  %v3108_v62 = vpop.f32.mrb[147].mxu0  ;;  %v1974_v38 = vadd.f32 1.0, %v3240_v16 }
 0x21d   : > { %v1700_v59 = vadd.f32 %v1661_v9, %v4181_v21  ;;  %v3074_v50 = vpop.f32.mrb[147].mxu1  ;;  %v3242_v2 = vpop.eup %3241  ;;  %v1924_v37 = vsub.f32 0.0, %v4250_v39  ;;  %v2135_v42 = vmul.f32 %v2052_v22, %v2007_v49 }
 0x21e   : > { %v4256_v14 = vadd.f32 %v4205_v45, %v1882_v55  ;;  %3251 = vrcp.f32 %v1974_v38  ;;  %v1975_v52 = vadd.f32 1.0, %v3242_v2  ;;  %v2067_v30 = vpop.permute.xlu0 %2066 }
 0x21f   : > { %v1950_v56 = vmul.f32 1.442695, %v1924_v37  ;;  %v2152_v21 = vadd.f32 %v2135_v42, %v2134_v20 }
 0x220   : > { %v1925_v61 = vsub.f32 0.0, %v4256_v14  ;;  %v3244_v63 = vpop.eup %3243  ;;  %3253 = vrcp.f32 %v1975_v52  ;;  %v1842_v35 = vpop.f32.mrb[148].mxu0 }
 0x221   : > { %3255 = vpow2.f32 %v1950_v56  ;;  %v2008_v34 = vmul.f32 %v3244_v63, %v4219_v4  ;;  %v1666_v0 = vpop.f32.mrb[148].mxu1  ;;  %v1883_v43 = vadd.f32 %v1842_v35, %v1699_v31  ;;  %v3111_v3 = vpop.f32.mrb[149].mxu0 }
 0x222   : > { %v1952_v5 = vmul.f32 1.442695, %v1925_v61  ;;  %v3246_v6 = vpop.eup %3245  ;;  %v1701_v40 = vadd.f32 %v1666_v0, %v4184_v36  ;;  %v3077_v28 = vpop.f32.mrb[149].mxu1 }
 0x223   : > { %v1845_v10 = vpop.f32.mrb[150].mxu0  ;;  %v3248_v11 = vpop.eup %3247  ;;  %v2136_v46 = vmul.f32 %v2057_v54, %v2008_v34  ;;  %v2009_v12 = vmul.f32 %v3246_v6, %v4224_v23  ;;  %v4263_v13 = vadd.f32 %v4205_v45, %v1883_v43 }
 0x224   : > { %3257 = vpow2.f32 %v1952_v5  ;;  %v1669_v44 = vpop.f32.mrb[150].mxu1  ;;  %v3112_v15 = vpop.f32.mrb[151].mxu0  ;;  %v1976_v33 = vadd.f32 1.0, %v3248_v11  ;;  %v1884_v48 = vadd.f32 %v1845_v10, %v1700_v59 }
 0x225   : > { %v2062_v4 = vpop.permute.xlu1 %2061  ;;  %v1702_v17 = vadd.f32 %v1669_v44, %v4187_v47  ;;  %v3078_v18 = vpop.f32.mrb[151].mxu1  ;;  %v2153_v22 = vadd.f32 %v2152_v21, %v2136_v46  ;;  %v1926_v26 = vsub.f32 0.0, %v4263_v13 }
 0x226   : > { %v3250_v19 = vpop.eup %3249  ;;  %v2137_v36 = vmul.f32 %v2062_v4, %v2009_v12  ;;  %3259 = vrcp.f32 %v1976_v33  ;;  %v4268_v23 = vadd.f32 %v4205_v45, %v1884_v48 }
 0x227   : > { %v1977_v60 = vadd.f32 1.0, %v3250_v19  ;;  %v1954_v24 = vmul.f32 1.442695, %v1926_v26 }
 0x228   : > { %v2154_v1 = vadd.f32 %v2153_v22, %v2137_v36  ;;  %v3252_v27 = vpop.eup %3251  ;;  %v1927_v31 = vsub.f32 0.0, %v4268_v23  ;;  %v1850_v47 = vpop.f32.mrb[152].mxu0 }
 0x229   : > { %3261 = vrcp.f32 %v1977_v60  ;;  %v2010_v57 = vmul.f32 %v3252_v27, %v4229_v41  ;;  %v1674_v29 = vpop.f32.mrb[152].mxu1  ;;  %v1885_v16 = vadd.f32 %v1850_v47, %v1701_v40  ;;  %v3115_v9 = vpop.f32.mrb[153].mxu0 }
 0x22a   : > { %3263 = vpow2.f32 %v1954_v24  ;;  %v3254_v55 = vpop.eup %3253  ;;  %v1956_v62 = vmul.f32 1.442695, %v1927_v31  ;;  %v1703_v38 = vadd.f32 %v1674_v29, %v4190_v58  ;;  %v3081_v59 = vpop.f32.mrb[153].mxu1 }
 0x22b   : > { %v1853_v49 = vpop.f32.mrb[154].mxu0  ;;  %v3256_v50 = vpop.eup %3255  ;;  %v2138_v2 = vmul.f32 %v2067_v30, %v2010_v57  ;;  %v2011_v37 = vmul.f32 %v3254_v55, %v4234_v53  ;;  %v4275_v52 = vadd.f32 %v4205_v45, %v1885_v16 }
 0x22c   : > { %v1677_v20 = vpop.f32.mrb[154].mxu1  ;;  %v1886_v54 = vadd.f32 %v1853_v49, %v1702_v17  ;;  %v3116_v41 = vpop.f32.mrb[155].mxu0  ;;  %v1978_v42 = vadd.f32 1.0, %v3256_v50  ;;  %3265 = vpow2.f32 %v1956_v62 }
 0x22d   : > { %v2072_v56 = vpop.permute.xlu1 %2071  ;;  %v1704_v61 = vadd.f32 %v1677_v20, %v4193_v7  ;;  %v3082_v63 = vpop.f32.mrb[155].mxu1  ;;  %v2155_v58 = vadd.f32 %v2154_v1, %v2138_v2  ;;  %v1928_v5 = vsub.f32 0.0, %v4275_v52 }
 0x22e   : > { %v3258_v21 = vpop.eup %3257  ;;  %v2139_v35 = vmul.f32 %v2072_v56, %v2011_v37  ;;  %v4280_v34 = vadd.f32 %v4205_v45, %v1886_v54  ;;  %3267 = vrcp.f32 %v1978_v42  ;;  %v2077_v40 = vpop.permute.xlu0 %2076 }
 0x22f   : > { %v1979_v53 = vadd.f32 1.0, %v3258_v21  ;;  %v1958_v43 = vmul.f32 1.442695, %v1928_v5 }
 0x230   : > { %v2156_v0 = vadd.f32 %v2155_v58, %v2139_v35  ;;  %v1929_v3 = vsub.f32 0.0, %v4280_v34  ;;  %v3260_v6 = vpop.eup %3259  ;;  %v1858_v28 = vpop.f32.mrb[156].mxu0 }
 0x231   : > { %3269 = vrcp.f32 %v1979_v53  ;;  %v2012_v7 = vmul.f32 %v3260_v6, %v4239_v8  ;;  %v1682_v11 = vpop.f32.mrb[156].mxu1  ;;  %v1887_v46 = vadd.f32 %v1858_v28, %v1703_v38  ;;  %v3119_v12 = vpop.f32.mrb[157].mxu0 }
 0x232   : > { %3271 = vpow2.f32 %v1958_v43  ;;  %v1960_v10 = vmul.f32 1.442695, %v1929_v3  ;;  %v1705_v15 = vadd.f32 %v1682_v11, %v4196_v25  ;;  %v3085_v33 = vpop.f32.mrb[157].mxu1  ;;  %v1861_v4 = vpop.f32.mrb[158].mxu0 }
 0x233   : > { %v3262_v44 = vpop.eup %3261  ;;  %v2140_v48 = vmul.f32 %v2077_v40, %v2012_v7  ;;  %v4287_v19 = vadd.f32 %v4205_v45, %v1887_v46  ;;  %v1685_v36 = vpop.f32.mrb[158].mxu1  ;;  %v1888_v1 = vadd.f32 %v1861_v4, %v1704_v61 }
 0x234   : > { %v3264_v17 = vpop.eup %3263  ;;  %v2013_v18 = vmul.f32 %v3262_v44, %v4244_v51  ;;  %3273 = vpow2.f32 %v1960_v10  ;;  %v3120_v8 = vpop.f32.mrb[159].mxu0  ;;  %v1706_v60 = vadd.f32 %v1685_v36, %v4199_v32 }
 0x235   : > { %v1980_v22 = vadd.f32 1.0, %v3264_v17  ;;  %v2082_v26 = vpop.permute.xlu1 %2081  ;;  %v3086_v24 = vpop.f32.mrb[159].mxu1  ;;  %v2157_v27 = vadd.f32 %v2156_v0, %v2140_v48  ;;  %v1930_v30 = vsub.f32 0.0, %v4287_v19  ;;  %v4292_v51 = vadd.f32 %v4205_v45, %v1888_v1 }
 0x236   : > { %v2141_v25 = vmul.f32 %v2082_v26, %v2013_v18  ;;  %v3266_v31 = vpop.eup %3265  ;;  %v2087_v49 = vpop.permute.xlu0 %2086 }
 0x237   : > { %3275 = vrcp.f32 %v1980_v22  ;;  %v1981_v47 = vadd.f32 1.0, %v3266_v31  ;;  %v1962_v29 = vmul.f32 1.442695, %v1930_v30  ;;  %v1931_v9 = vsub.f32 0.0, %v4292_v51 }
 0x238   : > { %v2158_v57 = vadd.f32 %v2157_v27, %v2141_v25  ;;  %v3268_v16 = vpop.eup %3267  ;;  %v1866_v55 = vpop.f32.mrb[160].mxu0 }
 0x239   : > { %3277 = vrcp.f32 %v1981_v47  ;;  %v2014_v32 = vmul.f32 %v3268_v16, %v4250_v39  ;;  %v1889_v62 = vadd.f32 %v1866_v55, %v1705_v15  ;;  %v3123_v38 = vpop.f32.mrb[161].mxu0  ;;  %v1964_v50 = vmul.f32 1.442695, %v1931_v9  ;;  %v2092_v63 = vpop.permute.xlu1 %2091 }
 0x23a   : > { %3279 = vpow2.f32 %v1962_v29  ;;  %v1869_v2 = vpop.f32.mrb[162].mxu0  ;;  %v2097_v28 = vpop.permute.xlu0 %2096 }
 0x23b   : > { %v3270_v59 = vpop.eup %3269  ;;  %v2142_v20 = vmul.f32 %v2087_v49, %v2014_v32  ;;  %v4298_v41 = vadd.f32 %v4205_v45, %v1889_v62  ;;  %v1890_v42 = vadd.f32 %v1869_v2, %v1706_v60  ;;  %v3124_v56 = vpop.f32.mrb[163].mxu0  ;;  %3281 = vpow2.f32 %v1964_v50 }
 0x23c   : > { %v3272_v37 = vpop.eup %3271  ;;  %v2015_v54 = vmul.f32 %v3270_v59, %v4256_v14 }
 0x23d   : > { %v1982_v61 = vadd.f32 1.0, %v3272_v37  ;;  %v2159_v21 = vadd.f32 %v2158_v57, %v2142_v20  ;;  %v1932_v35 = vsub.f32 0.0, %v4298_v41  ;;  %v1915_v5 = vadd.f32 %v4205_v45, %v1890_v42  ;;  %v2102_v45 = vpop.permute.xlu1 %2101 }
 0x23e   : > { %v3274_v39 = vpop.eup %3273  ;;  %v2143_v58 = vmul.f32 %v2092_v63, %v2015_v54  ;;  %v2107_v36 = vpop.permute.xlu0 %2106 }
 0x23f   : > { %3283 = vrcp.f32 %v1982_v61  ;;  %v1983_v53 = vadd.f32 1.0, %v3274_v39  ;;  %v1966_v43 = vmul.f32 1.442695, %v1932_v35  ;;  %v1933_v14 = vsub.f32 0.0, %v1915_v5  ;;  %v2043_v39 = vld [vmem:[#allocation2] sm:$0x1] }
 0x240   : > { %v2160_v0 = vadd.f32 %v2159_v21, %v2143_v58  ;;  %v3411_v35 = vmov (!%p2672_p0), 0.0  }
 0x241   : > { %v3276_v3 = vpop.eup %3275  ;;  %3285 = vrcp.f32 %v1983_v53  ;;  %v1968_v40 = vmul.f32 1.442695, %v1933_v14  ;;  %v2112_v60 = vpop.permute.xlu1 %2111  ;;  %3125 = vmatprep.subr.bf16.mxu0 (!%p2672_p0), %v3411_v35  ;;  %3141 = vmatprep.mubr.msk.bf16.mxu0 (!%p2672_p0), %vm3412_vm3, %v3411_v35  ;;  %v3301_v53 = vld [vmem:[%s4398_s4 + $0x10] sm:$0xff] (!%p2672_p0)   ;;  %v3304_v14 = vld [vmem:[%s4398_s4 + $0x28] sm:$0xff] (!%p2672_p0)  }
 0x242   : > { %v2016_v6 = vmul.f32 %v3276_v3, %v4263_v13  ;;  %3287 = vpow2.f32 %v1966_v43  ;;  %v2117_v57 = vpop.permute.xlu0 %2116  ;;  %v3303_v43 = vld [vmem:[%s4398_s4 + $0x20] sm:$0xff] (!%p2672_p0)   ;;  %v3305_v3 = vld [vmem:[%s4398_s4 + $0x30] sm:$0xff] (!%p2672_p0)  }
 0x243   : > { %v3278_v7 = vpop.eup %3277  ;;  %3289 = vpow2.f32 %v1968_v40 }
 0x244   : > { %v2144_v10 = vmul.f32 %v2097_v28, %v2016_v6  ;;  %v3280_v11 = vpop.eup %3279  ;;  %v2017_v46 = vmul.f32 %v3278_v7, %v4268_v23  ;;  %v3306_v28 = vld [vmem:[%s4398_s4 + $0x38] sm:$0xff] (!%p2672_p0)  }
 0x245   : > { %v1984_v44 = vadd.f32 1.0, %v3280_v11  ;;  %v3282_v15 = vpop.eup %3281  ;;  %v2122_v9 = vpop.permute.xlu1 %2121 }
 0x246   : > { %v2161_v12 = vadd.f32 %v2160_v0, %v2144_v10  ;;  %v2145_v33 = vmul.f32 %v2102_v45, %v2017_v46  ;;  %v1985_v4 = vadd.f32 1.0, %v3282_v15  ;;  %v2127_v49 = vpop.permute.xlu0 %2126  ;;  %v3302_v0 = vld [vmem:[%s4398_s4 + $0x18] sm:$0xff] (!%p2672_p0)   ;;  %v2200_v10 = vld [vmem:[%s4399_s5] sm:$0x1] (!%p2672_p0) }
 0x247   : > { %3291 = vrcp.f32 %v1984_v44 }
 0x248   : > { %v2162_v48 = vadd.f32 %v2161_v12, %v2145_v33  ;;  %3293 = vrcp.f32 %v1985_v4 }
 0x249   : > { %v3284_v17 = vpop.eup %3283  ;;  %v2132_v37 = vpop.permute.xlu1 %2131 }
 0x24a   : > { %v2018_v13 = vmul.f32 %v3284_v17, %v4275_v52 }
 0x24b   : > { %v3286_v18 = vpop.eup %3285 }
 0x24c   : > { %v3288_v8 = vpop.eup %3287  ;;  %v2146_v22 = vmul.f32 %v2107_v36, %v2018_v13  ;;  %v2019_v26 = vmul.f32 %v3286_v18, %v4280_v34 }
 0x24d   : > { %v1986_v23 = vadd.f32 1.0, %v3288_v8  ;;  %v3290_v1 = vpop.eup %3289 }
 0x24e   : > { %v2163_v24 = vadd.f32 %v2162_v48, %v2146_v22  ;;  %v2147_v27 = vmul.f32 %v2112_v60, %v2019_v26  ;;  %v1987_v25 = vadd.f32 1.0, %v3290_v1  ;;  %v2296_v48 = vlaneseq (!%p2672_p0) }
 0x24f   : > { %3295 = vrcp.f32 %v1986_v23 }
 0x250   : > { %v2164_v30 = vadd.f32 %v2163_v24, %v2147_v27  ;;  %3297 = vrcp.f32 %v1987_v25  ;;  %v2297_v13 = vand.u32 (!%p2672_p0), 127, %v2296_v48 }
 0x251   : > { %v3292_v31 = vpop.eup %3291 }
 0x252   : > { %v2020_v47 = vmul.f32 %v3292_v31, %v4287_v19  ;;  %v3294_v52 = vpop.eup %3293  ;;  %vm2298_vm5 = vcmp.lt.s32.totalorder (!%p2672_p0), %v2297_v13, 8 }
 0x253   : > { %v2021_v16 = vmul.f32 %v3294_v52, %v4292_v51 }
 0x254   : > { %v2148_v29 = vmul.f32 %v2117_v57, %v2020_v47 }
 0x255   : > { %v2149_v34 = vmul.f32 %v2122_v9, %v2021_v16 }
 0x256   : > { %v2165_v55 = vadd.f32 %v2164_v30, %v2148_v29 }
 0x258   : > { %v2166_v62 = vadd.f32 %v2165_v55, %v2149_v34 }
 0x259   : > { %v3296_v32 = vpop.eup %3295 }
 0x25a   : > { %v2022_v38 = vmul.f32 %v3296_v32, %v4298_v41  ;;  %v3298_v59 = vpop.eup %3297  ;;  %v3299_v41 = vld [vmem:[%s4398_s4] sm:$0xff] (!%p2672_p0)  }
 0x25b   : > { %v2023_v50 = vmul.f32 %v3298_v59, %v1915_v5  ;;  %3126 = vmatpush3.bf16.msra.mxu0 (!%p2672_p0), %v3299_v41  ;;  %v3300_v5 = vld [vmem:[%s4398_s4 + $0x8] sm:$0xff] (!%p2672_p0)  }
 0x25c   : > { %v2150_v2 = vmul.f32 %v2127_v49, %v2022_v38  ;;  %3127 = vmatprep.subr.bf16.mxu0 (!%p2672_p0), %v3411_v35 }
 0x25d   : > { %v2151_v20 = vmul.f32 %v2132_v37, %v2023_v50 }
 0x25e   : > { %v2167_v54 = vadd.f32 %v2166_v62, %v2150_v2 }
 0x25f   : > { %3128 = vmatpush3.bf16.msra.mxu0 (!%p2672_p0), %v3300_v5 }
 0x260   : > { %v2168_v19 = vadd.f32 %v2167_v54, %v2151_v20  ;;  %3129 = vmatprep.subr.bf16.mxu0 (!%p2672_p0), %v3411_v35 }
 0x262   : > { %v2169_v42 = vrot.slane %v2168_v19, 4 }
 0x263   : > { %3130 = vmatpush3.bf16.msra.mxu0 (!%p2672_p0), %v3301_v53 }
 0x264   : > { %v2170_v56 = vadd.f32 %v2169_v42, %v2168_v19  ;;  %3131 = vmatprep.subr.bf16.mxu0 (!%p2672_p0), %v3411_v35 }
 0x266   : > { %v2171_v61 = vrot.slane %v2170_v56, 2 }
 0x267   : > { %3132 = vmatpush3.bf16.msra.mxu0 (!%p2672_p0), %v3302_v0 }
 0x268   : > { %v2172_v63 = vadd.f32 %v2171_v61, %v2170_v56  ;;  %3133 = vmatprep.subr.bf16.mxu0 (!%p2672_p0), %v3411_v35 }
 0x26a   : > { %v2173_v51 = vrot.slane %v2172_v63, 1  ;;  %2180 = sbr.rel (%p2672_p0) target bundleno = 1166 (0x48e), region = 52 }
 0x26b   : > { %3134 = vmatpush3.bf16.msra.mxu0 (!%p2672_p0), %v3303_v43 }
 0x26c   : > { %v2174_v21 = vadd.f32 %v2173_v51, %v2172_v63  ;;  %3135 = vmatprep.subr.bf16.mxu0 (!%p2672_p0), %v3411_v35 }
 0x26e   : > { %v2175_v58 = vadd.f32 %v2174_v21, %v2043_v39 }
 0x26f   : > { %3136 = vmatpush3.bf16.msra.mxu0 (!%p2672_p0), %v3304_v14 }
 0x270   : > { %2176 = vst [vmem:[#allocation2] sm:$0x1] %v2175_v58  ;;  %3137 = vmatprep.subr.bf16.mxu0 (!%p2672_p0), %v3411_v35 }
 0x273   : > { %3138 = vmatpush3.bf16.msra.mxu0 %v3305_v3 }
 0x274   : > { %3139 = vmatprep.subr.bf16.mxu0 %v3411_v35 }
 0x277   : > { %v2181_v6 = vld [vmem:[#allocation2] sm:$0x1]  ;;  %3140 = vmatpush3.bf16.msra.mxu0 %v3306_v28 }
 0x278   : > { %v2182_v40 = vmul.f32 0.00390625, %v2181_v6 }
 0x27a   : > { %v2183_v7 = vpack.c.bf16 %v2182_v40, %v2182_v40 }
 0x27c   : > { %3142 = vmatmul.mubr.bf16.vlgmr.msra.gmra.mrb[0].mxu0 %v2183_v7 }
 0x34f   : > { %v2283_v11 = vpop.f32.mrb[0].mxu0 }
 0x350   : > { %v2284_v46 = vadd.f32 %v2283_v11, %v2200_v10  ;;  %v3143_v12 = vpop.f32.mrb[1].mxu0 }
 0x351   : > { %v2286_v45 = vpop.f32.mrb[2].mxu0 }
 0x352   : > { %v3144_v44 = vpop.f32.mrb[3].mxu0  ;;  %v2290_v15 = vsel %vm2289_vm4, %v2284_v46, -inf }
 0x353   : > { %2291 = vmax.xlane.f32.xlu0 %v2290_v15 }
 0x3e0   : > { %v2292_v33 = vpop.xlane.xlu0 %2291 }
 0x3e1   : > { %v2293_v4 = vsub.f32 %v2284_v46, %v2292_v33 }
 0x3e3   : > { %v2294_v17 = vmul.f32 1.442695, %v2293_v4 }
 0x3e5   : > { %3307 = vpow2.f32 %v2294_v17 }
 0x3ef   : > { %v3308_v18 = vpop.eup %3307 }
 0x3f0   : > { %v2299_v36 = vsel %vm2298_vm5, %v3308_v18, 0.0 }
 0x3f1   : > { %v2300_v8 = vsel %vm2289_vm4, %v2299_v36, 0.0 }
 0x3f2   : > { %2301 = vadd.xlane.f32.xlu0 %v2300_v8 }
 0x47f   : > { %v2302_v22 = vpop.xlane.xlu0 %2301 }
 0x480   : > { %3309 = vrcp.f32 %v2302_v22 }
 0x48a   : > { %v3310_v26 = vpop.eup %3309 }
 0x48b   : > { %v2304_v60 = vmul.f32 %v3310_v26, %v2299_v36 }
 0x48d   : > { %2305 = vst [vmem:[%s3526_s20] sm:$0x1] %v2304_v60 }
 0x48e PF: > { %s2681_s11 = sshll.u32 %s3393_s25, 4  ;;  %s2319_s12 = sshll.u32 %s3526_s20, 4  ;;  %s2320_s12 = int_to_ptr.vmem [resolvable:$true] %s2319_s12 }
 0x48f   : > { %s4344_s30 = scalar_lea.hbm %s4400_s6, %s2681_s11  ;;  %s2307_s15 = scalar_lea.sflag [#allocation4], %s254_s14 }
 0x490   : > { %s3311_s17 = scalar_lea.vmem %s2320_s12, 16  ;;  %s3413_s18 = smov [#allocation3]  }
 0x491   : > { %p3312_p1 = scmp.ne.s32.totalorder %s2320_s12, %s3311_s17  ;;  %s3315_s24 = sshll.u32 %s3413_s18, 4  ;;  %s3316_s24 = int_to_ptr.vmem [resolvable:$false] %s3315_s24 }
 0x492   : > { %s3317_s19 = scalar_lea.vmem %s3316_s24, 32  ;;  %p3318_p5 = scmp.lt.s32.totalorder %s2320_s12, %s3316_s24 }
 0x493   : > { %p3313_p2 = pnand %p3312_p1, %p3498_p3  ;;  %p3319_p6 = scmp.lt.s32.totalorder %s3317_s19, %s3311_s17 }
 0x495   : > { %p3314_p4 = pneg %p3313_p2  ;;  %p3320_p7 = por %p3319_p6, %p3318_p5 }
 0x497   : > { %p3321_p8 = pnand %p3320_p7, %p3314_p4 }
 0x499   : > { %3324 = shalt.err (!%p3321_p8)
}
 0x49a   : > { %s3325_s25 = scalar_lea.hbm %s4344_s30, 16  ;;  %s3329_s11 = scalar_lea.hbm %s4400_s6, 32 }
 0x49b   : > { %p3326_p10 = scmp.ne.s32.totalorder %s4344_s30, %s3325_s25  ;;  %p3330_p13 = scmp.lt.u32.totalorder %s4344_s30, %s4400_s6 }
 0x49c   : > { %p3331_p0 = scmp.lt.u32.totalorder %s3329_s11, %s3325_s25  ;;  %p3333_p2 = scmp.lt.u32.totalorder %s3325_s25, %s4344_s30 }
 0x49d   : > { %p3327_p11 = pnand %p3326_p10, %p3498_p3 }
 0x49e   : > { %p3332_p1 = por %p3331_p0, %p3330_p13 }
 0x49f   : > { %p3328_p12 = pneg %p3327_p11 }
 0x4a0   : > { %p3334_p4 = por %p3333_p2, %p3332_p1 }
 0x4a2   : > { %p3335_p5 = pnand %p3334_p4, %p3328_p12 }
 0x4a4   : > { %3338 = shalt.err (!%p3335_p5)
}
 0x4a5   : > { %3148 = dma.vmem_to_hbm [thread:$0]  (%p3498_p3), %s2320_s12, 16, %s4344_s30, %s2307_s15  }
 0x4a6 PF: > { %p3154_p6 = scmp.ge.s32.totalorder %s3405_s28, 2  ;;  %s2331_s17 = sand.u32 1, %s3377_s21  }
 0x4a7   : > { %s2332_s18 = scalar_lea.sflag [#allocation4], %s2331_s17 }
 0x4a8   : > { %p3151_p7 = pnand %p3154_p6, %p3508_p9 }
 0x4aa   : > { %3372 = dma.done.wait (!%p3151_p7), %s2332_s18, 16  }
 0x4ab   : > { %3374 = vsyncadd (!%p3151_p7), %s2332_s18, 4294967280  ;;  %s19_s28 = sadd.s32 1, %s3405_s28   ;;  %s4403_s21 = smov %s3381_s22 }
 0x4ac   : > { %p16_p8 = scmp.ge.s32.totalorder %s19_s28, 6   ;;  %s4404_s22 = smov %s3385_s23 }
 0x4ad   : > { %s4405_s23 = smov %s3516_s13  ;;  %s4406_s24 = smov %s3397_s26 }
 0x4ae   : > { %s4407_s25 = smov %s3401_s27  ;;  %s4408_s26 = smov %s4411_s7 }
 0x4af   : > { %s4409_s27 = smov %s4415_s8  ;;  %18 = sbr.rel (!%p16_p8) target bundleno = 5 (0x5), region = 105 }
 0x4b6   :  { %2336 = vsyncpa [#allocation4], 1 }
 0x4b7   :  { %2338 = vsyncpa [#allocation4 + $0x1], 1 }

</bundles_post_ra>
